<compile_context>
chip_gen: v6e
topology: v6e:2x2x1
jax: 0.10.0
libtpu: 0.0.40
codegen_flags: <defaults>
</compile_context>

<pallas_src>
import functools

import jax
import jax.numpy as jnp
from jax.experimental import pallas as pl
from jax.experimental.pallas import tpu as pltpu

BN_EPS = 1e-5        # PyTorch BatchNorm1d default eps
NEG_SLOPE = 0.1      # leaky_relu slope used by the module
N_LAYERS = 12
N_HBM_W = N_LAYERS - 1   # fc2..fc11 weights are manually prefetched


def layer_specs(latent_dim, input_dim, n_dim):
    """(name, in_features, out_features, use_bn, activation) — mirrors myVAE."""
    return [
        ("fc1",  input_dim,      input_dim // 5, True,  "leaky_relu"),
        ("fc2",  input_dim // 5, input_dim // 5, True,  "leaky_relu"),
        ("fc3",  input_dim // 5, n_dim,          True,  "leaky_relu"),
        ("fc4",  n_dim,          n_dim,          True,  "leaky_relu"),
        ("fc5",  n_dim,          n_dim // 5,     True,  "leaky_relu"),
        ("fcs",  n_dim // 5,     latent_dim,     True,  "none"),
        ("fc6",  latent_dim,     n_dim // 5,     True,  "relu"),
        ("fc7",  n_dim // 5,     n_dim,          True,  "relu"),
        ("fc8",  n_dim,          n_dim,          True,  "relu"),
        ("fc9",  n_dim,          input_dim // 5, True,  "relu"),
        ("fc10", input_dim // 5, input_dim // 5, True,  "relu"),
        ("fc11", input_dim // 5, input_dim,      False, "relu"),
    ]


# ----------------------------------------------------------------------------
# The fused kernel.
# refs = (x, w_fc1, bn_table, hbm_w[0..10],       # inputs
#         s_out, recon_out,                        # outputs
#         wbuf[0..10], dma_sem)                    # scratch
# ----------------------------------------------------------------------------
def _vae_fused_kernel(*refs, cfg, neg_slope):
    x_ref, w1_ref, bnp_ref = refs[0], refs[1], refs[2]
    hbm_w = refs[3:3 + N_HBM_W]
    s_ref, recon_ref = refs[3 + N_HBM_W], refs[4 + N_HBM_W]
    wbufs = refs[5 + N_HBM_W:5 + 2 * N_HBM_W]
    sem = refs[-1]

    # Kick off all weight prefetches up front; they stream HBM->VMEM while the
    # earlier layers compute (waited on just-in-time below).
    for i in range(N_HBM_W):
        pltpu.make_async_copy(hbm_w[i], wbufs[i], sem.at[i]).start()

    batch = x_ref.shape[0]
    inv_b = 1.0 / batch
    h = x_ref[...]                                  # f32 activations, on-chip
    row = 0                                         # cursor into the BN table
    for li, (name, fout, use_bn, act) in enumerate(cfg):   # fully unrolled
        if li == 0:
            w = w1_ref[...]                         # resident via auto DMA
        else:
            j = li - 1
            pltpu.make_async_copy(hbm_w[j], wbufs[j], sem.at[j]).wait()
            w = wbufs[j][...]
        # bf16 x bf16 MXU matmul with f32 accumulation.
        y = jnp.dot(h.astype(jnp.bfloat16), w,
                    preferred_element_type=jnp.float32)
        if use_bn:
            gamma = bnp_ref[pl.ds(row, 1), pl.ds(0, fout)]      # (1, fout)
            beta = bnp_ref[pl.ds(row + 1, 1), pl.ds(0, fout)]   # (1, fout)
            row += 2
            # Training-mode BatchNorm1d (biased variance).  Linear bias is
            # omitted (exactly cancelled by the mean subtraction).  Two
            # independent reductions; gamma folded into the per-feature scale
            # so the full-width work is a single mul + add.
            mean = jnp.sum(y, axis=0, keepdims=True) * inv_b
            msq = jnp.sum(y * y, axis=0, keepdims=True) * inv_b
            var = jnp.maximum(msq - mean * mean, 0.0)   # guard cancellation
            scale = gamma * jax.lax.rsqrt(var + BN_EPS)
            shift = beta - mean * scale
            y = y * scale + shift
        else:
            bias = bnp_ref[pl.ds(row, 1), pl.ds(0, fout)]
            row += 1
            y = y + bias
        if act == "leaky_relu":
            y = jnp.maximum(y, neg_slope * y)       # ≡ leaky_relu, 0<slope<1
        elif act == "relu":
            y = jnp.maximum(y, 0.0)
        # act == "none": identity (latent head `fcs`)
        if name == "fcs":
            s_ref[...] = y.astype(s_ref.dtype)      # latent output
        h = y
    recon_ref[...] = h.astype(recon_ref.dtype)


# ----------------------------------------------------------------------------
# Parameters: PyTorch-default-style init, weights pre-transposed ([in,out])
# in bf16, all gamma/beta/bias rows packed into one f32 table.
# ----------------------------------------------------------------------------
def build_vae_params(key, latent_dim, input_dim, n_dim,
                     weight_dtype=jnp.bfloat16):
    specs = layer_specs(latent_dim, input_dim, n_dim)
    max_out = max(s[2] for s in specs)              # widest feature dim (640)
    keys = jax.random.split(key, len(specs))
    weights, rows = [], []
    for k, (name, fin, fout, use_bn, _act) in zip(keys, specs):
        kw, kb = jax.random.split(k)
        bound = 1.0 / (fin ** 0.5)
        w = jax.random.uniform(kw, (fout, fin), jnp.float32, -bound, bound)
        b = jax.random.uniform(kb, (fout,), jnp.float32, -bound, bound)
        weights.append(jnp.asarray(w.T, dtype=weight_dtype))    # [fin, fout]
        if use_bn:
            # BatchNorm affine defaults: gamma=1, beta=0.  Linear bias dropped
            # (cancelled by batch-mean subtraction in training-mode BN).
            rows.append(jnp.zeros((max_out,), jnp.float32).at[:fout].set(1.0))
            rows.append(jnp.zeros((max_out,), jnp.float32))
        else:
            rows.append(jnp.zeros((max_out,), jnp.float32).at[:fout].set(b))
    while len(rows) % 8 != 0:                       # sublane-aligned row count
        rows.append(jnp.zeros((max_out,), jnp.float32))
    return {"weights": weights, "bn_table": jnp.stack(rows)}


# ----------------------------------------------------------------------------
# Forward pass (mirrors myVAE.forward) — one fused pallas_call.
# ----------------------------------------------------------------------------
def vae_forward(params, x, *, latent_dim, input_dim, n_dim):
    specs = layer_specs(latent_dim, input_dim, n_dim)
    batch = x.shape[0]
    weights = params["weights"]
    bn_table = params["bn_table"]

    cfg = tuple((name, fout, use_bn, act)
                for (name, _fin, fout, use_bn, act) in specs)
    flat_args = [x, weights[0], bn_table] + list(weights[1:])

    # Advisory cost so XLA does not treat the fused call as zero-cost.
    flops = sum(2 * batch * fin * fout for (_, fin, fout, _, _) in specs)
    transcendentals = sum(fout for (_, _, fout, use_bn, _) in specs if use_bn)
    bytes_accessed = sum(int(a.size) * a.dtype.itemsize for a in flat_args)
    bytes_accessed += batch * (latent_dim + input_dim) * 4      # outputs

    kernel = functools.partial(_vae_fused_kernel, cfg=cfg, neg_slope=NEG_SLOPE)
    vmem = pl.BlockSpec(memory_space=pltpu.MemorySpace.VMEM)
    hbm = pl.BlockSpec(memory_space=pl.ANY)

    s, recon = pl.pallas_call(
        kernel,
        out_shape=(jax.ShapeDtypeStruct((batch, latent_dim), jnp.float32),
                   jax.ShapeDtypeStruct((batch, input_dim), jnp.float32)),
        in_specs=[vmem, vmem, vmem] + [hbm] * N_HBM_W,
        out_specs=(vmem, vmem),
        scratch_shapes=[pltpu.VMEM(tuple(w.shape), w.dtype)
                        for w in weights[1:]]
                       + [pltpu.SemaphoreType.DMA((N_HBM_W,))],
        cost_estimate=pl.CostEstimate(flops=flops,
                                      transcendentals=transcendentals,
                                      bytes_accessed=bytes_accessed),
    )(*flat_args)
    return s, recon


# ----------------------------------------------------------------------------
# Pure-JAX reference (mirrors the kernel math/dtypes) for a sanity check.
# ----------------------------------------------------------------------------
def vae_reference(params, x, *, latent_dim, input_dim, n_dim):
    specs = layer_specs(latent_dim, input_dim, n_dim)
    weights, bn_table = params["weights"], params["bn_table"]
    batch = x.shape[0]
    h, s, row = x, None, 0
    for li, (name, _fin, fout, use_bn, act) in enumerate(specs):
        y = jnp.dot(h.astype(jnp.bfloat16), weights[li],
                    preferred_element_type=jnp.float32)
        if use_bn:
            gamma = bn_table[row:row + 1, :fout]
            beta = bn_table[row + 1:row + 2, :fout]
            row += 2
            mean = jnp.sum(y, axis=0, keepdims=True) / batch
            msq = jnp.sum(y * y, axis=0, keepdims=True) / batch
            var = jnp.maximum(msq - mean * mean, 0.0)
            scale = gamma * jax.lax.rsqrt(var + BN_EPS)
            y = y * scale + (beta - mean * scale)
        else:
            y = y + bn_table[row:row + 1, :fout]
            row += 1
        if act == "leaky_relu":
            y = jnp.maximum(y, NEG_SLOPE * y)
        elif act == "relu":
            y = jnp.maximum(y, 0.0)
        if name == "fcs":
            s = y
        h = y
    return s, h


if __name__ == "__main__":
    # Small shapes consistent with the module's structure (divisible by 5).
    INPUT_DIM = 640   # input_dim // 5 = 128
    N_DIM = 160       # n_dim // 5 = 32
    LATENT_DIM = 16
    BATCH = 8

    root = jax.random.PRNGKey(0)
    k_param, k_x = jax.random.split(root)
    params = build_vae_params(k_param, LATENT_DIM, INPUT_DIM, N_DIM)
    x = jax.random.normal(k_x, (BATCH, INPUT_DIM), dtype=jnp.float32)

    fwd = jax.jit(functools.partial(vae_forward, latent_dim=LATENT_DIM,
                                    input_dim=INPUT_DIM, n_dim=N_DIM))
    s, recon = fwd(params, x)
    jax.block_until_ready((s, recon))

    assert s.shape == (BATCH, LATENT_DIM)
    assert recon.shape == (BATCH, INPUT_DIM)
    assert bool(jnp.all(recon >= 0.0))                          # final relu
    assert bool(jnp.all(jnp.isfinite(s)))
    assert bool(jnp.all(jnp.isfinite(recon)))

    # Sanity-check against the pure-JAX reference (bf16 weights => lenient tol).
    ref = jax.jit(functools.partial(vae_reference, latent_dim=LATENT_DIM,
                                    input_dim=INPUT_DIM, n_dim=N_DIM))
    s_ref, recon_ref = ref(params, x)
    assert bool(jnp.allclose(s, s_ref, atol=5e-2, rtol=5e-2))
    assert bool(jnp.allclose(recon, recon_ref, atol=5e-2, rtol=5e-2))

    print("KERNEL_OK")
</pallas_src>

<mosaic_0001>
module attributes {stable_mosaic.version = 11 : i64} {
  func.func @_vae_fused_kernel(%arg0: memref<8x640xf32, #tpu.memory_space<vmem>>, %arg1: memref<640x128xbf16, #tpu.memory_space<vmem>>, %arg2: memref<24x640xf32, #tpu.memory_space<vmem>>, %arg3: memref<128x128xbf16, #tpu.memory_space<any>>, %arg4: memref<128x160xbf16, #tpu.memory_space<any>>, %arg5: memref<160x160xbf16, #tpu.memory_space<any>>, %arg6: memref<160x32xbf16, #tpu.memory_space<any>>, %arg7: memref<32x16xbf16, #tpu.memory_space<any>>, %arg8: memref<16x32xbf16, #tpu.memory_space<any>>, %arg9: memref<32x160xbf16, #tpu.memory_space<any>>, %arg10: memref<160x160xbf16, #tpu.memory_space<any>>, %arg11: memref<160x128xbf16, #tpu.memory_space<any>>, %arg12: memref<128x128xbf16, #tpu.memory_space<any>>, %arg13: memref<128x640xbf16, #tpu.memory_space<any>>, %arg14: memref<8x16xf32, #tpu.memory_space<vmem>>, %arg15: memref<8x640xf32, #tpu.memory_space<vmem>>, %arg16: memref<128x128xbf16, #tpu.memory_space<vmem>>, %arg17: memref<128x160xbf16, #tpu.memory_space<vmem>>, %arg18: memref<160x160xbf16, #tpu.memory_space<vmem>>, %arg19: memref<160x32xbf16, #tpu.memory_space<vmem>>, %arg20: memref<32x16xbf16, #tpu.memory_space<vmem>>, %arg21: memref<16x32xbf16, #tpu.memory_space<vmem>>, %arg22: memref<32x160xbf16, #tpu.memory_space<vmem>>, %arg23: memref<160x160xbf16, #tpu.memory_space<vmem>>, %arg24: memref<160x128xbf16, #tpu.memory_space<vmem>>, %arg25: memref<128x128xbf16, #tpu.memory_space<vmem>>, %arg26: memref<128x640xbf16, #tpu.memory_space<vmem>>, %arg27: memref<11x!tpu.dma_semaphore, #tpu.memory_space<semaphore_mem>>) attributes {dimension_semantics = [], scalar_prefetch = 0 : i64, scratch_operands = 12 : i64, tpu.core_type = #tpu.core_type<tc>} {
    %c0_i32 = arith.constant 0 : i32
    %0 = tpu.memref_slice %arg27[%c0_i32] : memref<11x!tpu.dma_semaphore, #tpu.memory_space<semaphore_mem>> -> memref<1x!tpu.dma_semaphore, #tpu.memory_space<semaphore_mem>>
    %1 = tpu.memref_squeeze %0 : memref<1x!tpu.dma_semaphore, #tpu.memory_space<semaphore_mem>> -> memref<!tpu.dma_semaphore, #tpu.memory_space<semaphore_mem>>
    tpu.enqueue_dma source(%arg3 : memref<128x128xbf16, #tpu.memory_space<any>>) target(%arg16 : memref<128x128xbf16, #tpu.memory_space<vmem>>) target_semaphore(%1 : memref<!tpu.dma_semaphore, #tpu.memory_space<semaphore_mem>>)
    %c1_i32 = arith.constant 1 : i32
    %2 = tpu.memref_slice %arg27[%c1_i32] : memref<11x!tpu.dma_semaphore, #tpu.memory_space<semaphore_mem>> -> memref<1x!tpu.dma_semaphore, #tpu.memory_space<semaphore_mem>>
    %3 = tpu.memref_squeeze %2 : memref<1x!tpu.dma_semaphore, #tpu.memory_space<semaphore_mem>> -> memref<!tpu.dma_semaphore, #tpu.memory_space<semaphore_mem>>
    tpu.enqueue_dma source(%arg4 : memref<128x160xbf16, #tpu.memory_space<any>>) target(%arg17 : memref<128x160xbf16, #tpu.memory_space<vmem>>) target_semaphore(%3 : memref<!tpu.dma_semaphore, #tpu.memory_space<semaphore_mem>>)
    %c2_i32 = arith.constant 2 : i32
    %4 = tpu.memref_slice %arg27[%c2_i32] : memref<11x!tpu.dma_semaphore, #tpu.memory_space<semaphore_mem>> -> memref<1x!tpu.dma_semaphore, #tpu.memory_space<semaphore_mem>>
    %5 = tpu.memref_squeeze %4 : memref<1x!tpu.dma_semaphore, #tpu.memory_space<semaphore_mem>> -> memref<!tpu.dma_semaphore, #tpu.memory_space<semaphore_mem>>
    tpu.enqueue_dma source(%arg5 : memref<160x160xbf16, #tpu.memory_space<any>>) target(%arg18 : memref<160x160xbf16, #tpu.memory_space<vmem>>) target_semaphore(%5 : memref<!tpu.dma_semaphore, #tpu.memory_space<semaphore_mem>>)
    %c3_i32 = arith.constant 3 : i32
    %6 = tpu.memref_slice %arg27[%c3_i32] : memref<11x!tpu.dma_semaphore, #tpu.memory_space<semaphore_mem>> -> memref<1x!tpu.dma_semaphore, #tpu.memory_space<semaphore_mem>>
    %7 = tpu.memref_squeeze %6 : memref<1x!tpu.dma_semaphore, #tpu.memory_space<semaphore_mem>> -> memref<!tpu.dma_semaphore, #tpu.memory_space<semaphore_mem>>
    tpu.enqueue_dma source(%arg6 : memref<160x32xbf16, #tpu.memory_space<any>>) target(%arg19 : memref<160x32xbf16, #tpu.memory_space<vmem>>) target_semaphore(%7 : memref<!tpu.dma_semaphore, #tpu.memory_space<semaphore_mem>>)
    %c4_i32 = arith.constant 4 : i32
    %8 = tpu.memref_slice %arg27[%c4_i32] : memref<11x!tpu.dma_semaphore, #tpu.memory_space<semaphore_mem>> -> memref<1x!tpu.dma_semaphore, #tpu.memory_space<semaphore_mem>>
    %9 = tpu.memref_squeeze %8 : memref<1x!tpu.dma_semaphore, #tpu.memory_space<semaphore_mem>> -> memref<!tpu.dma_semaphore, #tpu.memory_space<semaphore_mem>>
    tpu.enqueue_dma source(%arg7 : memref<32x16xbf16, #tpu.memory_space<any>>) target(%arg20 : memref<32x16xbf16, #tpu.memory_space<vmem>>) target_semaphore(%9 : memref<!tpu.dma_semaphore, #tpu.memory_space<semaphore_mem>>)
    %c5_i32 = arith.constant 5 : i32
    %10 = tpu.memref_slice %arg27[%c5_i32] : memref<11x!tpu.dma_semaphore, #tpu.memory_space<semaphore_mem>> -> memref<1x!tpu.dma_semaphore, #tpu.memory_space<semaphore_mem>>
    %11 = tpu.memref_squeeze %10 : memref<1x!tpu.dma_semaphore, #tpu.memory_space<semaphore_mem>> -> memref<!tpu.dma_semaphore, #tpu.memory_space<semaphore_mem>>
    tpu.enqueue_dma source(%arg8 : memref<16x32xbf16, #tpu.memory_space<any>>) target(%arg21 : memref<16x32xbf16, #tpu.memory_space<vmem>>) target_semaphore(%11 : memref<!tpu.dma_semaphore, #tpu.memory_space<semaphore_mem>>)
    %c6_i32 = arith.constant 6 : i32
    %12 = tpu.memref_slice %arg27[%c6_i32] : memref<11x!tpu.dma_semaphore, #tpu.memory_space<semaphore_mem>> -> memref<1x!tpu.dma_semaphore, #tpu.memory_space<semaphore_mem>>
    %13 = tpu.memref_squeeze %12 : memref<1x!tpu.dma_semaphore, #tpu.memory_space<semaphore_mem>> -> memref<!tpu.dma_semaphore, #tpu.memory_space<semaphore_mem>>
    tpu.enqueue_dma source(%arg9 : memref<32x160xbf16, #tpu.memory_space<any>>) target(%arg22 : memref<32x160xbf16, #tpu.memory_space<vmem>>) target_semaphore(%13 : memref<!tpu.dma_semaphore, #tpu.memory_space<semaphore_mem>>)
    %c7_i32 = arith.constant 7 : i32
    %14 = tpu.memref_slice %arg27[%c7_i32] : memref<11x!tpu.dma_semaphore, #tpu.memory_space<semaphore_mem>> -> memref<1x!tpu.dma_semaphore, #tpu.memory_space<semaphore_mem>>
    %15 = tpu.memref_squeeze %14 : memref<1x!tpu.dma_semaphore, #tpu.memory_space<semaphore_mem>> -> memref<!tpu.dma_semaphore, #tpu.memory_space<semaphore_mem>>
    tpu.enqueue_dma source(%arg10 : memref<160x160xbf16, #tpu.memory_space<any>>) target(%arg23 : memref<160x160xbf16, #tpu.memory_space<vmem>>) target_semaphore(%15 : memref<!tpu.dma_semaphore, #tpu.memory_space<semaphore_mem>>)
    %c8_i32 = arith.constant 8 : i32
    %16 = tpu.memref_slice %arg27[%c8_i32] : memref<11x!tpu.dma_semaphore, #tpu.memory_space<semaphore_mem>> -> memref<1x!tpu.dma_semaphore, #tpu.memory_space<semaphore_mem>>
    %17 = tpu.memref_squeeze %16 : memref<1x!tpu.dma_semaphore, #tpu.memory_space<semaphore_mem>> -> memref<!tpu.dma_semaphore, #tpu.memory_space<semaphore_mem>>
    tpu.enqueue_dma source(%arg11 : memref<160x128xbf16, #tpu.memory_space<any>>) target(%arg24 : memref<160x128xbf16, #tpu.memory_space<vmem>>) target_semaphore(%17 : memref<!tpu.dma_semaphore, #tpu.memory_space<semaphore_mem>>)
    %c9_i32 = arith.constant 9 : i32
    %18 = tpu.memref_slice %arg27[%c9_i32] : memref<11x!tpu.dma_semaphore, #tpu.memory_space<semaphore_mem>> -> memref<1x!tpu.dma_semaphore, #tpu.memory_space<semaphore_mem>>
    %19 = tpu.memref_squeeze %18 : memref<1x!tpu.dma_semaphore, #tpu.memory_space<semaphore_mem>> -> memref<!tpu.dma_semaphore, #tpu.memory_space<semaphore_mem>>
    tpu.enqueue_dma source(%arg12 : memref<128x128xbf16, #tpu.memory_space<any>>) target(%arg25 : memref<128x128xbf16, #tpu.memory_space<vmem>>) target_semaphore(%19 : memref<!tpu.dma_semaphore, #tpu.memory_space<semaphore_mem>>)
    %c10_i32 = arith.constant 10 : i32
    %20 = tpu.memref_slice %arg27[%c10_i32] : memref<11x!tpu.dma_semaphore, #tpu.memory_space<semaphore_mem>> -> memref<1x!tpu.dma_semaphore, #tpu.memory_space<semaphore_mem>>
    %21 = tpu.memref_squeeze %20 : memref<1x!tpu.dma_semaphore, #tpu.memory_space<semaphore_mem>> -> memref<!tpu.dma_semaphore, #tpu.memory_space<semaphore_mem>>
    tpu.enqueue_dma source(%arg13 : memref<128x640xbf16, #tpu.memory_space<any>>) target(%arg26 : memref<128x640xbf16, #tpu.memory_space<vmem>>) target_semaphore(%21 : memref<!tpu.dma_semaphore, #tpu.memory_space<semaphore_mem>>)
    %c0 = arith.constant 0 : index
    %c0_0 = arith.constant 0 : index
    %22 = vector.load %arg0[%c0, %c0_0] : memref<8x640xf32, #tpu.memory_space<vmem>>, vector<8x640xf32>
    %c0_1 = arith.constant 0 : index
    %c0_2 = arith.constant 0 : index
    %23 = vector.load %arg1[%c0_1, %c0_2] : memref<640x128xbf16, #tpu.memory_space<vmem>>, vector<640x128xbf16>
    %24 = arith.truncf %22 : vector<8x640xf32> to vector<8x640xbf16>
    %cst = arith.constant dense<0.000000e+00> : vector<8x128xf32>
    %25 = tpu.matmul %24, %23, %cst {dimension_numbers = #tpu.dot_dimension_numbers<[1], [0], [0], [1], [0, 0, 1, 1], [], []>} : vector<8x640xbf16>, vector<640x128xbf16>, vector<8x128xf32> -> vector<8x128xf32>
    %c0_3 = arith.constant 0 : index
    %c0_4 = arith.constant 0 : index
    %26 = vector.load %arg2[%c0_3, %c0_4] : memref<24x640xf32, #tpu.memory_space<vmem>>, vector<1x128xf32>
    %c1 = arith.constant 1 : index
    %c0_5 = arith.constant 0 : index
    %27 = vector.load %arg2[%c1, %c0_5] : memref<24x640xf32, #tpu.memory_space<vmem>>, vector<1x128xf32>
    %cst_6 = arith.constant dense<0.000000e+00> : vector<128xf32>
    %28 = vector.multi_reduction <add>, %25, %cst_6 [0] : vector<8x128xf32> to vector<128xf32>
    %29 = vector.shape_cast %28 : vector<128xf32> to vector<1x128xf32>
    %cst_7 = arith.constant 1.250000e-01 : f32
    %30 = vector.broadcast %cst_7 : f32 to vector<1x128xf32>
    %31 = arith.mulf %29, %30 : vector<1x128xf32>
    %32 = arith.mulf %25, %25 : vector<8x128xf32>
    %cst_8 = arith.constant dense<0.000000e+00> : vector<128xf32>
    %33 = vector.multi_reduction <add>, %32, %cst_8 [0] : vector<8x128xf32> to vector<128xf32>
    %34 = vector.shape_cast %33 : vector<128xf32> to vector<1x128xf32>
    %cst_9 = arith.constant 1.250000e-01 : f32
    %35 = vector.broadcast %cst_9 : f32 to vector<1x128xf32>
    %36 = arith.mulf %34, %35 : vector<1x128xf32>
    %37 = arith.mulf %31, %31 : vector<1x128xf32>
    %38 = arith.subf %36, %37 : vector<1x128xf32>
    %cst_10 = arith.constant 0.000000e+00 : f32
    %39 = vector.broadcast %cst_10 : f32 to vector<1x128xf32>
    %40 = arith.maximumf %38, %39 : vector<1x128xf32>
    %cst_11 = arith.constant 9.99999974E-6 : f32
    %41 = vector.broadcast %cst_11 : f32 to vector<1x128xf32>
    %42 = arith.addf %40, %41 : vector<1x128xf32>
    %43 = math.rsqrt %42 : vector<1x128xf32>
    %44 = arith.mulf %26, %43 : vector<1x128xf32>
    %45 = arith.mulf %31, %44 : vector<1x128xf32>
    %46 = arith.subf %27, %45 : vector<1x128xf32>
    %47 = vector.broadcast %44 : vector<1x128xf32> to vector<8x128xf32>
    %48 = arith.mulf %25, %47 : vector<8x128xf32>
    %49 = vector.broadcast %46 : vector<1x128xf32> to vector<8x128xf32>
    %50 = arith.addf %48, %49 : vector<8x128xf32>
    %cst_12 = arith.constant 1.000000e-01 : f32
    %51 = vector.broadcast %cst_12 : f32 to vector<8x128xf32>
    %52 = arith.mulf %51, %50 : vector<8x128xf32>
    %53 = arith.maximumf %50, %52 : vector<8x128xf32>
    %c0_i32_13 = arith.constant 0 : i32
    %54 = tpu.memref_slice %arg27[%c0_i32_13] : memref<11x!tpu.dma_semaphore, #tpu.memory_space<semaphore_mem>> -> memref<1x!tpu.dma_semaphore, #tpu.memory_space<semaphore_mem>>
    %55 = tpu.memref_squeeze %54 : memref<1x!tpu.dma_semaphore, #tpu.memory_space<semaphore_mem>> -> memref<!tpu.dma_semaphore, #tpu.memory_space<semaphore_mem>>
    tpu.wait_dma2 semaphore(%55 : memref<!tpu.dma_semaphore, #tpu.memory_space<semaphore_mem>>) src(%arg3 : memref<128x128xbf16, #tpu.memory_space<any>>) dst(%arg16 : memref<128x128xbf16, #tpu.memory_space<vmem>>)
    %c0_14 = arith.constant 0 : index
    %c0_15 = arith.constant 0 : index
    %56 = vector.load %arg16[%c0_14, %c0_15] : memref<128x128xbf16, #tpu.memory_space<vmem>>, vector<128x128xbf16>
    %57 = arith.truncf %53 : vector<8x128xf32> to vector<8x128xbf16>
    %cst_16 = arith.constant dense<0.000000e+00> : vector<8x128xf32>
    %58 = tpu.matmul %57, %56, %cst_16 {dimension_numbers = #tpu.dot_dimension_numbers<[1], [0], [0], [1], [0, 0, 1, 1], [], []>} : vector<8x128xbf16>, vector<128x128xbf16>, vector<8x128xf32> -> vector<8x128xf32>
    %c2 = arith.constant 2 : index
    %c0_17 = arith.constant 0 : index
    %59 = vector.load %arg2[%c2, %c0_17] : memref<24x640xf32, #tpu.memory_space<vmem>>, vector<1x128xf32>
    %c3 = arith.constant 3 : index
    %c0_18 = arith.constant 0 : index
    %60 = vector.load %arg2[%c3, %c0_18] : memref<24x640xf32, #tpu.memory_space<vmem>>, vector<1x128xf32>
    %cst_19 = arith.constant dense<0.000000e+00> : vector<128xf32>
    %61 = vector.multi_reduction <add>, %58, %cst_19 [0] : vector<8x128xf32> to vector<128xf32>
    %62 = vector.shape_cast %61 : vector<128xf32> to vector<1x128xf32>
    %cst_20 = arith.constant 1.250000e-01 : f32
    %63 = vector.broadcast %cst_20 : f32 to vector<1x128xf32>
    %64 = arith.mulf %62, %63 : vector<1x128xf32>
    %65 = arith.mulf %58, %58 : vector<8x128xf32>
    %cst_21 = arith.constant dense<0.000000e+00> : vector<128xf32>
    %66 = vector.multi_reduction <add>, %65, %cst_21 [0] : vector<8x128xf32> to vector<128xf32>
    %67 = vector.shape_cast %66 : vector<128xf32> to vector<1x128xf32>
    %cst_22 = arith.constant 1.250000e-01 : f32
    %68 = vector.broadcast %cst_22 : f32 to vector<1x128xf32>
    %69 = arith.mulf %67, %68 : vector<1x128xf32>
    %70 = arith.mulf %64, %64 : vector<1x128xf32>
    %71 = arith.subf %69, %70 : vector<1x128xf32>
    %cst_23 = arith.constant 0.000000e+00 : f32
    %72 = vector.broadcast %cst_23 : f32 to vector<1x128xf32>
    %73 = arith.maximumf %71, %72 : vector<1x128xf32>
    %cst_24 = arith.constant 9.99999974E-6 : f32
    %74 = vector.broadcast %cst_24 : f32 to vector<1x128xf32>
    %75 = arith.addf %73, %74 : vector<1x128xf32>
    %76 = math.rsqrt %75 : vector<1x128xf32>
    %77 = arith.mulf %59, %76 : vector<1x128xf32>
    %78 = arith.mulf %64, %77 : vector<1x128xf32>
    %79 = arith.subf %60, %78 : vector<1x128xf32>
    %80 = vector.broadcast %77 : vector<1x128xf32> to vector<8x128xf32>
    %81 = arith.mulf %58, %80 : vector<8x128xf32>
    %82 = vector.broadcast %79 : vector<1x128xf32> to vector<8x128xf32>
    %83 = arith.addf %81, %82 : vector<8x128xf32>
    %cst_25 = arith.constant 1.000000e-01 : f32
    %84 = vector.broadcast %cst_25 : f32 to vector<8x128xf32>
    %85 = arith.mulf %84, %83 : vector<8x128xf32>
    %86 = arith.maximumf %83, %85 : vector<8x128xf32>
    %c1_i32_26 = arith.constant 1 : i32
    %87 = tpu.memref_slice %arg27[%c1_i32_26] : memref<11x!tpu.dma_semaphore, #tpu.memory_space<semaphore_mem>> -> memref<1x!tpu.dma_semaphore, #tpu.memory_space<semaphore_mem>>
    %88 = tpu.memref_squeeze %87 : memref<1x!tpu.dma_semaphore, #tpu.memory_space<semaphore_mem>> -> memref<!tpu.dma_semaphore, #tpu.memory_space<semaphore_mem>>
    tpu.wait_dma2 semaphore(%88 : memref<!tpu.dma_semaphore, #tpu.memory_space<semaphore_mem>>) src(%arg4 : memref<128x160xbf16, #tpu.memory_space<any>>) dst(%arg17 : memref<128x160xbf16, #tpu.memory_space<vmem>>)
    %c0_27 = arith.constant 0 : index
    %c0_28 = arith.constant 0 : index
    %89 = vector.load %arg17[%c0_27, %c0_28] : memref<128x160xbf16, #tpu.memory_space<vmem>>, vector<128x160xbf16>
    %90 = arith.truncf %86 : vector<8x128xf32> to vector<8x128xbf16>
    %cst_29 = arith.constant dense<0.000000e+00> : vector<8x160xf32>
    %91 = tpu.matmul %90, %89, %cst_29 {dimension_numbers = #tpu.dot_dimension_numbers<[1], [0], [0], [1], [0, 0, 1, 1], [], []>} : vector<8x128xbf16>, vector<128x160xbf16>, vector<8x160xf32> -> vector<8x160xf32>
    %c4 = arith.constant 4 : index
    %c0_30 = arith.constant 0 : index
    %92 = vector.load %arg2[%c4, %c0_30] : memref<24x640xf32, #tpu.memory_space<vmem>>, vector<1x160xf32>
    %c5 = arith.constant 5 : index
    %c0_31 = arith.constant 0 : index
    %93 = vector.load %arg2[%c5, %c0_31] : memref<24x640xf32, #tpu.memory_space<vmem>>, vector<1x160xf32>
    %cst_32 = arith.constant dense<0.000000e+00> : vector<160xf32>
    %94 = vector.multi_reduction <add>, %91, %cst_32 [0] : vector<8x160xf32> to vector<160xf32>
    %95 = vector.shape_cast %94 : vector<160xf32> to vector<1x160xf32>
    %cst_33 = arith.constant 1.250000e-01 : f32
    %96 = vector.broadcast %cst_33 : f32 to vector<1x160xf32>
    %97 = arith.mulf %95, %96 : vector<1x160xf32>
    %98 = arith.mulf %91, %91 : vector<8x160xf32>
    %cst_34 = arith.constant dense<0.000000e+00> : vector<160xf32>
    %99 = vector.multi_reduction <add>, %98, %cst_34 [0] : vector<8x160xf32> to vector<160xf32>
    %100 = vector.shape_cast %99 : vector<160xf32> to vector<1x160xf32>
    %cst_35 = arith.constant 1.250000e-01 : f32
    %101 = vector.broadcast %cst_35 : f32 to vector<1x160xf32>
    %102 = arith.mulf %100, %101 : vector<1x160xf32>
    %103 = arith.mulf %97, %97 : vector<1x160xf32>
    %104 = arith.subf %102, %103 : vector<1x160xf32>
    %cst_36 = arith.constant 0.000000e+00 : f32
    %105 = vector.broadcast %cst_36 : f32 to vector<1x160xf32>
    %106 = arith.maximumf %104, %105 : vector<1x160xf32>
    %cst_37 = arith.constant 9.99999974E-6 : f32
    %107 = vector.broadcast %cst_37 : f32 to vector<1x160xf32>
    %108 = arith.addf %106, %107 : vector<1x160xf32>
    %109 = math.rsqrt %108 : vector<1x160xf32>
    %110 = arith.mulf %92, %109 : vector<1x160xf32>
    %111 = arith.mulf %97, %110 : vector<1x160xf32>
    %112 = arith.subf %93, %111 : vector<1x160xf32>
    %113 = vector.broadcast %110 : vector<1x160xf32> to vector<8x160xf32>
    %114 = arith.mulf %91, %113 : vector<8x160xf32>
    %115 = vector.broadcast %112 : vector<1x160xf32> to vector<8x160xf32>
    %116 = arith.addf %114, %115 : vector<8x160xf32>
    %cst_38 = arith.constant 1.000000e-01 : f32
    %117 = vector.broadcast %cst_38 : f32 to vector<8x160xf32>
    %118 = arith.mulf %117, %116 : vector<8x160xf32>
    %119 = arith.maximumf %116, %118 : vector<8x160xf32>
    %c2_i32_39 = arith.constant 2 : i32
    %120 = tpu.memref_slice %arg27[%c2_i32_39] : memref<11x!tpu.dma_semaphore, #tpu.memory_space<semaphore_mem>> -> memref<1x!tpu.dma_semaphore, #tpu.memory_space<semaphore_mem>>
    %121 = tpu.memref_squeeze %120 : memref<1x!tpu.dma_semaphore, #tpu.memory_space<semaphore_mem>> -> memref<!tpu.dma_semaphore, #tpu.memory_space<semaphore_mem>>
    tpu.wait_dma2 semaphore(%121 : memref<!tpu.dma_semaphore, #tpu.memory_space<semaphore_mem>>) src(%arg5 : memref<160x160xbf16, #tpu.memory_space<any>>) dst(%arg18 : memref<160x160xbf16, #tpu.memory_space<vmem>>)
    %c0_40 = arith.constant 0 : index
    %c0_41 = arith.constant 0 : index
    %122 = vector.load %arg18[%c0_40, %c0_41] : memref<160x160xbf16, #tpu.memory_space<vmem>>, vector<160x160xbf16>
    %123 = arith.truncf %119 : vector<8x160xf32> to vector<8x160xbf16>
    %cst_42 = arith.constant dense<0.000000e+00> : vector<8x160xf32>
    %124 = tpu.matmul %123, %122, %cst_42 {dimension_numbers = #tpu.dot_dimension_numbers<[1], [0], [0], [1], [0, 0, 1, 1], [], []>} : vector<8x160xbf16>, vector<160x160xbf16>, vector<8x160xf32> -> vector<8x160xf32>
    %c6 = arith.constant 6 : index
    %c0_43 = arith.constant 0 : index
    %125 = vector.load %arg2[%c6, %c0_43] : memref<24x640xf32, #tpu.memory_space<vmem>>, vector<1x160xf32>
    %c7 = arith.constant 7 : index
    %c0_44 = arith.constant 0 : index
    %126 = vector.load %arg2[%c7, %c0_44] : memref<24x640xf32, #tpu.memory_space<vmem>>, vector<1x160xf32>
    %cst_45 = arith.constant dense<0.000000e+00> : vector<160xf32>
    %127 = vector.multi_reduction <add>, %124, %cst_45 [0] : vector<8x160xf32> to vector<160xf32>
    %128 = vector.shape_cast %127 : vector<160xf32> to vector<1x160xf32>
    %cst_46 = arith.constant 1.250000e-01 : f32
    %129 = vector.broadcast %cst_46 : f32 to vector<1x160xf32>
    %130 = arith.mulf %128, %129 : vector<1x160xf32>
    %131 = arith.mulf %124, %124 : vector<8x160xf32>
    %cst_47 = arith.constant dense<0.000000e+00> : vector<160xf32>
    %132 = vector.multi_reduction <add>, %131, %cst_47 [0] : vector<8x160xf32> to vector<160xf32>
    %133 = vector.shape_cast %132 : vector<160xf32> to vector<1x160xf32>
    %cst_48 = arith.constant 1.250000e-01 : f32
    %134 = vector.broadcast %cst_48 : f32 to vector<1x160xf32>
    %135 = arith.mulf %133, %134 : vector<1x160xf32>
    %136 = arith.mulf %130, %130 : vector<1x160xf32>
    %137 = arith.subf %135, %136 : vector<1x160xf32>
    %cst_49 = arith.constant 0.000000e+00 : f32
    %138 = vector.broadcast %cst_49 : f32 to vector<1x160xf32>
    %139 = arith.maximumf %137, %138 : vector<1x160xf32>
    %cst_50 = arith.constant 9.99999974E-6 : f32
    %140 = vector.broadcast %cst_50 : f32 to vector<1x160xf32>
    %141 = arith.addf %139, %140 : vector<1x160xf32>
    %142 = math.rsqrt %141 : vector<1x160xf32>
    %143 = arith.mulf %125, %142 : vector<1x160xf32>
    %144 = arith.mulf %130, %143 : vector<1x160xf32>
    %145 = arith.subf %126, %144 : vector<1x160xf32>
    %146 = vector.broadcast %143 : vector<1x160xf32> to vector<8x160xf32>
    %147 = arith.mulf %124, %146 : vector<8x160xf32>
    %148 = vector.broadcast %145 : vector<1x160xf32> to vector<8x160xf32>
    %149 = arith.addf %147, %148 : vector<8x160xf32>
    %cst_51 = arith.constant 1.000000e-01 : f32
    %150 = vector.broadcast %cst_51 : f32 to vector<8x160xf32>
    %151 = arith.mulf %150, %149 : vector<8x160xf32>
    %152 = arith.maximumf %149, %151 : vector<8x160xf32>
    %c3_i32_52 = arith.constant 3 : i32
    %153 = tpu.memref_slice %arg27[%c3_i32_52] : memref<11x!tpu.dma_semaphore, #tpu.memory_space<semaphore_mem>> -> memref<1x!tpu.dma_semaphore, #tpu.memory_space<semaphore_mem>>
    %154 = tpu.memref_squeeze %153 : memref<1x!tpu.dma_semaphore, #tpu.memory_space<semaphore_mem>> -> memref<!tpu.dma_semaphore, #tpu.memory_space<semaphore_mem>>
    tpu.wait_dma2 semaphore(%154 : memref<!tpu.dma_semaphore, #tpu.memory_space<semaphore_mem>>) src(%arg6 : memref<160x32xbf16, #tpu.memory_space<any>>) dst(%arg19 : memref<160x32xbf16, #tpu.memory_space<vmem>>)
    %c0_53 = arith.constant 0 : index
    %c0_54 = arith.constant 0 : index
    %155 = vector.load %arg19[%c0_53, %c0_54] : memref<160x32xbf16, #tpu.memory_space<vmem>>, vector<160x32xbf16>
    %156 = arith.truncf %152 : vector<8x160xf32> to vector<8x160xbf16>
    %cst_55 = arith.constant dense<0.000000e+00> : vector<8x32xf32>
    %157 = tpu.matmul %156, %155, %cst_55 {dimension_numbers = #tpu.dot_dimension_numbers<[1], [0], [0], [1], [0, 0, 1, 1], [], []>} : vector<8x160xbf16>, vector<160x32xbf16>, vector<8x32xf32> -> vector<8x32xf32>
    %c8 = arith.constant 8 : index
    %c0_56 = arith.constant 0 : index
    %158 = vector.load %arg2[%c8, %c0_56] : memref<24x640xf32, #tpu.memory_space<vmem>>, vector<1x32xf32>
    %c9 = arith.constant 9 : index
    %c0_57 = arith.constant 0 : index
    %159 = vector.load %arg2[%c9, %c0_57] : memref<24x640xf32, #tpu.memory_space<vmem>>, vector<1x32xf32>
    %cst_58 = arith.constant dense<0.000000e+00> : vector<32xf32>
    %160 = vector.multi_reduction <add>, %157, %cst_58 [0] : vector<8x32xf32> to vector<32xf32>
    %161 = vector.shape_cast %160 : vector<32xf32> to vector<1x32xf32>
    %cst_59 = arith.constant 1.250000e-01 : f32
    %162 = vector.broadcast %cst_59 : f32 to vector<1x32xf32>
    %163 = arith.mulf %161, %162 : vector<1x32xf32>
    %164 = arith.mulf %157, %157 : vector<8x32xf32>
    %cst_60 = arith.constant dense<0.000000e+00> : vector<32xf32>
    %165 = vector.multi_reduction <add>, %164, %cst_60 [0] : vector<8x32xf32> to vector<32xf32>
    %166 = vector.shape_cast %165 : vector<32xf32> to vector<1x32xf32>
    %cst_61 = arith.constant 1.250000e-01 : f32
    %167 = vector.broadcast %cst_61 : f32 to vector<1x32xf32>
    %168 = arith.mulf %166, %167 : vector<1x32xf32>
    %169 = arith.mulf %163, %163 : vector<1x32xf32>
    %170 = arith.subf %168, %169 : vector<1x32xf32>
    %cst_62 = arith.constant 0.000000e+00 : f32
    %171 = vector.broadcast %cst_62 : f32 to vector<1x32xf32>
    %172 = arith.maximumf %170, %171 : vector<1x32xf32>
    %cst_63 = arith.constant 9.99999974E-6 : f32
    %173 = vector.broadcast %cst_63 : f32 to vector<1x32xf32>
    %174 = arith.addf %172, %173 : vector<1x32xf32>
    %175 = math.rsqrt %174 : vector<1x32xf32>
    %176 = arith.mulf %158, %175 : vector<1x32xf32>
    %177 = arith.mulf %163, %176 : vector<1x32xf32>
    %178 = arith.subf %159, %177 : vector<1x32xf32>
    %179 = vector.broadcast %176 : vector<1x32xf32> to vector<8x32xf32>
    %180 = arith.mulf %157, %179 : vector<8x32xf32>
    %181 = vector.broadcast %178 : vector<1x32xf32> to vector<8x32xf32>
    %182 = arith.addf %180, %181 : vector<8x32xf32>
    %cst_64 = arith.constant 1.000000e-01 : f32
    %183 = vector.broadcast %cst_64 : f32 to vector<8x32xf32>
    %184 = arith.mulf %183, %182 : vector<8x32xf32>
    %185 = arith.maximumf %182, %184 : vector<8x32xf32>
    %c4_i32_65 = arith.constant 4 : i32
    %186 = tpu.memref_slice %arg27[%c4_i32_65] : memref<11x!tpu.dma_semaphore, #tpu.memory_space<semaphore_mem>> -> memref<1x!tpu.dma_semaphore, #tpu.memory_space<semaphore_mem>>
    %187 = tpu.memref_squeeze %186 : memref<1x!tpu.dma_semaphore, #tpu.memory_space<semaphore_mem>> -> memref<!tpu.dma_semaphore, #tpu.memory_space<semaphore_mem>>
    tpu.wait_dma2 semaphore(%187 : memref<!tpu.dma_semaphore, #tpu.memory_space<semaphore_mem>>) src(%arg7 : memref<32x16xbf16, #tpu.memory_space<any>>) dst(%arg20 : memref<32x16xbf16, #tpu.memory_space<vmem>>)
    %c0_66 = arith.constant 0 : index
    %c0_67 = arith.constant 0 : index
    %188 = vector.load %arg20[%c0_66, %c0_67] : memref<32x16xbf16, #tpu.memory_space<vmem>>, vector<32x16xbf16>
    %189 = arith.truncf %185 : vector<8x32xf32> to vector<8x32xbf16>
    %cst_68 = arith.constant dense<0.000000e+00> : vector<8x16xf32>
    %190 = tpu.matmul %189, %188, %cst_68 {dimension_numbers = #tpu.dot_dimension_numbers<[1], [0], [0], [1], [0, 0, 1, 1], [], []>} : vector<8x32xbf16>, vector<32x16xbf16>, vector<8x16xf32> -> vector<8x16xf32>
    %c10 = arith.constant 10 : index
    %c0_69 = arith.constant 0 : index
    %191 = vector.load %arg2[%c10, %c0_69] : memref<24x640xf32, #tpu.memory_space<vmem>>, vector<1x16xf32>
    %c11 = arith.constant 11 : index
    %c0_70 = arith.constant 0 : index
    %192 = vector.load %arg2[%c11, %c0_70] : memref<24x640xf32, #tpu.memory_space<vmem>>, vector<1x16xf32>
    %cst_71 = arith.constant dense<0.000000e+00> : vector<16xf32>
    %193 = vector.multi_reduction <add>, %190, %cst_71 [0] : vector<8x16xf32> to vector<16xf32>
    %194 = vector.shape_cast %193 : vector<16xf32> to vector<1x16xf32>
    %cst_72 = arith.constant 1.250000e-01 : f32
    %195 = vector.broadcast %cst_72 : f32 to vector<1x16xf32>
    %196 = arith.mulf %194, %195 : vector<1x16xf32>
    %197 = arith.mulf %190, %190 : vector<8x16xf32>
    %cst_73 = arith.constant dense<0.000000e+00> : vector<16xf32>
    %198 = vector.multi_reduction <add>, %197, %cst_73 [0] : vector<8x16xf32> to vector<16xf32>
    %199 = vector.shape_cast %198 : vector<16xf32> to vector<1x16xf32>
    %cst_74 = arith.constant 1.250000e-01 : f32
    %200 = vector.broadcast %cst_74 : f32 to vector<1x16xf32>
    %201 = arith.mulf %199, %200 : vector<1x16xf32>
    %202 = arith.mulf %196, %196 : vector<1x16xf32>
    %203 = arith.subf %201, %202 : vector<1x16xf32>
    %cst_75 = arith.constant 0.000000e+00 : f32
    %204 = vector.broadcast %cst_75 : f32 to vector<1x16xf32>
    %205 = arith.maximumf %203, %204 : vector<1x16xf32>
    %cst_76 = arith.constant 9.99999974E-6 : f32
    %206 = vector.broadcast %cst_76 : f32 to vector<1x16xf32>
    %207 = arith.addf %205, %206 : vector<1x16xf32>
    %208 = math.rsqrt %207 : vector<1x16xf32>
    %209 = arith.mulf %191, %208 : vector<1x16xf32>
    %210 = arith.mulf %196, %209 : vector<1x16xf32>
    %211 = arith.subf %192, %210 : vector<1x16xf32>
    %212 = vector.broadcast %209 : vector<1x16xf32> to vector<8x16xf32>
    %213 = arith.mulf %190, %212 : vector<8x16xf32>
    %214 = vector.broadcast %211 : vector<1x16xf32> to vector<8x16xf32>
    %215 = arith.addf %213, %214 : vector<8x16xf32>
    %c0_77 = arith.constant 0 : index
    %c0_78 = arith.constant 0 : index
    %216 = vector.load %arg14[%c0_77, %c0_78] : memref<8x16xf32, #tpu.memory_space<vmem>>, vector<8x16xf32>
    tpu.vector_store %arg14[%c0_77, %c0_78], %215 {strides = array<i32>} : memref<8x16xf32, #tpu.memory_space<vmem>>, vector<8x16xf32>,
    %c5_i32_79 = arith.constant 5 : i32
    %217 = tpu.memref_slice %arg27[%c5_i32_79] : memref<11x!tpu.dma_semaphore, #tpu.memory_space<semaphore_mem>> -> memref<1x!tpu.dma_semaphore, #tpu.memory_space<semaphore_mem>>
    %218 = tpu.memref_squeeze %217 : memref<1x!tpu.dma_semaphore, #tpu.memory_space<semaphore_mem>> -> memref<!tpu.dma_semaphore, #tpu.memory_space<semaphore_mem>>
    tpu.wait_dma2 semaphore(%218 : memref<!tpu.dma_semaphore, #tpu.memory_space<semaphore_mem>>) src(%arg8 : memref<16x32xbf16, #tpu.memory_space<any>>) dst(%arg21 : memref<16x32xbf16, #tpu.memory_space<vmem>>)
    %c0_80 = arith.constant 0 : index
    %c0_81 = arith.constant 0 : index
    %219 = vector.load %arg21[%c0_80, %c0_81] : memref<16x32xbf16, #tpu.memory_space<vmem>>, vector<16x32xbf16>
    %220 = arith.truncf %215 : vector<8x16xf32> to vector<8x16xbf16>
    %cst_82 = arith.constant dense<0.000000e+00> : vector<8x32xf32>
    %221 = tpu.matmul %220, %219, %cst_82 {dimension_numbers = #tpu.dot_dimension_numbers<[1], [0], [0], [1], [0, 0, 1, 1], [], []>} : vector<8x16xbf16>, vector<16x32xbf16>, vector<8x32xf32> -> vector<8x32xf32>
    %c12 = arith.constant 12 : index
    %c0_83 = arith.constant 0 : index
    %222 = vector.load %arg2[%c12, %c0_83] : memref<24x640xf32, #tpu.memory_space<vmem>>, vector<1x32xf32>
    %c13 = arith.constant 13 : index
    %c0_84 = arith.constant 0 : index
    %223 = vector.load %arg2[%c13, %c0_84] : memref<24x640xf32, #tpu.memory_space<vmem>>, vector<1x32xf32>
    %cst_85 = arith.constant dense<0.000000e+00> : vector<32xf32>
    %224 = vector.multi_reduction <add>, %221, %cst_85 [0] : vector<8x32xf32> to vector<32xf32>
    %225 = vector.shape_cast %224 : vector<32xf32> to vector<1x32xf32>
    %cst_86 = arith.constant 1.250000e-01 : f32
    %226 = vector.broadcast %cst_86 : f32 to vector<1x32xf32>
    %227 = arith.mulf %225, %226 : vector<1x32xf32>
    %228 = arith.mulf %221, %221 : vector<8x32xf32>
    %cst_87 = arith.constant dense<0.000000e+00> : vector<32xf32>
    %229 = vector.multi_reduction <add>, %228, %cst_87 [0] : vector<8x32xf32> to vector<32xf32>
    %230 = vector.shape_cast %229 : vector<32xf32> to vector<1x32xf32>
    %cst_88 = arith.constant 1.250000e-01 : f32
    %231 = vector.broadcast %cst_88 : f32 to vector<1x32xf32>
    %232 = arith.mulf %230, %231 : vector<1x32xf32>
    %233 = arith.mulf %227, %227 : vector<1x32xf32>
    %234 = arith.subf %232, %233 : vector<1x32xf32>
    %cst_89 = arith.constant 0.000000e+00 : f32
    %235 = vector.broadcast %cst_89 : f32 to vector<1x32xf32>
    %236 = arith.maximumf %234, %235 : vector<1x32xf32>
    %cst_90 = arith.constant 9.99999974E-6 : f32
    %237 = vector.broadcast %cst_90 : f32 to vector<1x32xf32>
    %238 = arith.addf %236, %237 : vector<1x32xf32>
    %239 = math.rsqrt %238 : vector<1x32xf32>
    %240 = arith.mulf %222, %239 : vector<1x32xf32>
    %241 = arith.mulf %227, %240 : vector<1x32xf32>
    %242 = arith.subf %223, %241 : vector<1x32xf32>
    %243 = vector.broadcast %240 : vector<1x32xf32> to vector<8x32xf32>
    %244 = arith.mulf %221, %243 : vector<8x32xf32>
    %245 = vector.broadcast %242 : vector<1x32xf32> to vector<8x32xf32>
    %246 = arith.addf %244, %245 : vector<8x32xf32>
    %cst_91 = arith.constant 0.000000e+00 : f32
    %247 = vector.broadcast %cst_91 : f32 to vector<8x32xf32>
    %248 = arith.maximumf %246, %247 : vector<8x32xf32>
    %c6_i32_92 = arith.constant 6 : i32
    %249 = tpu.memref_slice %arg27[%c6_i32_92] : memref<11x!tpu.dma_semaphore, #tpu.memory_space<semaphore_mem>> -> memref<1x!tpu.dma_semaphore, #tpu.memory_space<semaphore_mem>>
    %250 = tpu.memref_squeeze %249 : memref<1x!tpu.dma_semaphore, #tpu.memory_space<semaphore_mem>> -> memref<!tpu.dma_semaphore, #tpu.memory_space<semaphore_mem>>
    tpu.wait_dma2 semaphore(%250 : memref<!tpu.dma_semaphore, #tpu.memory_space<semaphore_mem>>) src(%arg9 : memref<32x160xbf16, #tpu.memory_space<any>>) dst(%arg22 : memref<32x160xbf16, #tpu.memory_space<vmem>>)
    %c0_93 = arith.constant 0 : index
    %c0_94 = arith.constant 0 : index
    %251 = vector.load %arg22[%c0_93, %c0_94] : memref<32x160xbf16, #tpu.memory_space<vmem>>, vector<32x160xbf16>
    %252 = arith.truncf %248 : vector<8x32xf32> to vector<8x32xbf16>
    %cst_95 = arith.constant dense<0.000000e+00> : vector<8x160xf32>
    %253 = tpu.matmul %252, %251, %cst_95 {dimension_numbers = #tpu.dot_dimension_numbers<[1], [0], [0], [1], [0, 0, 1, 1], [], []>} : vector<8x32xbf16>, vector<32x160xbf16>, vector<8x160xf32> -> vector<8x160xf32>
    %c14 = arith.constant 14 : index
    %c0_96 = arith.constant 0 : index
    %254 = vector.load %arg2[%c14, %c0_96] : memref<24x640xf32, #tpu.memory_space<vmem>>, vector<1x160xf32>
    %c15 = arith.constant 15 : index
    %c0_97 = arith.constant 0 : index
    %255 = vector.load %arg2[%c15, %c0_97] : memref<24x640xf32, #tpu.memory_space<vmem>>, vector<1x160xf32>
    %cst_98 = arith.constant dense<0.000000e+00> : vector<160xf32>
    %256 = vector.multi_reduction <add>, %253, %cst_98 [0] : vector<8x160xf32> to vector<160xf32>
    %257 = vector.shape_cast %256 : vector<160xf32> to vector<1x160xf32>
    %cst_99 = arith.constant 1.250000e-01 : f32
    %258 = vector.broadcast %cst_99 : f32 to vector<1x160xf32>
    %259 = arith.mulf %257, %258 : vector<1x160xf32>
    %260 = arith.mulf %253, %253 : vector<8x160xf32>
    %cst_100 = arith.constant dense<0.000000e+00> : vector<160xf32>
    %261 = vector.multi_reduction <add>, %260, %cst_100 [0] : vector<8x160xf32> to vector<160xf32>
    %262 = vector.shape_cast %261 : vector<160xf32> to vector<1x160xf32>
    %cst_101 = arith.constant 1.250000e-01 : f32
    %263 = vector.broadcast %cst_101 : f32 to vector<1x160xf32>
    %264 = arith.mulf %262, %263 : vector<1x160xf32>
    %265 = arith.mulf %259, %259 : vector<1x160xf32>
    %266 = arith.subf %264, %265 : vector<1x160xf32>
    %cst_102 = arith.constant 0.000000e+00 : f32
    %267 = vector.broadcast %cst_102 : f32 to vector<1x160xf32>
    %268 = arith.maximumf %266, %267 : vector<1x160xf32>
    %cst_103 = arith.constant 9.99999974E-6 : f32
    %269 = vector.broadcast %cst_103 : f32 to vector<1x160xf32>
    %270 = arith.addf %268, %269 : vector<1x160xf32>
    %271 = math.rsqrt %270 : vector<1x160xf32>
    %272 = arith.mulf %254, %271 : vector<1x160xf32>
    %273 = arith.mulf %259, %272 : vector<1x160xf32>
    %274 = arith.subf %255, %273 : vector<1x160xf32>
    %275 = vector.broadcast %272 : vector<1x160xf32> to vector<8x160xf32>
    %276 = arith.mulf %253, %275 : vector<8x160xf32>
    %277 = vector.broadcast %274 : vector<1x160xf32> to vector<8x160xf32>
    %278 = arith.addf %276, %277 : vector<8x160xf32>
    %cst_104 = arith.constant 0.000000e+00 : f32
    %279 = vector.broadcast %cst_104 : f32 to vector<8x160xf32>
    %280 = arith.maximumf %278, %279 : vector<8x160xf32>
    %c7_i32_105 = arith.constant 7 : i32
    %281 = tpu.memref_slice %arg27[%c7_i32_105] : memref<11x!tpu.dma_semaphore, #tpu.memory_space<semaphore_mem>> -> memref<1x!tpu.dma_semaphore, #tpu.memory_space<semaphore_mem>>
    %282 = tpu.memref_squeeze %281 : memref<1x!tpu.dma_semaphore, #tpu.memory_space<semaphore_mem>> -> memref<!tpu.dma_semaphore, #tpu.memory_space<semaphore_mem>>
    tpu.wait_dma2 semaphore(%282 : memref<!tpu.dma_semaphore, #tpu.memory_space<semaphore_mem>>) src(%arg10 : memref<160x160xbf16, #tpu.memory_space<any>>) dst(%arg23 : memref<160x160xbf16, #tpu.memory_space<vmem>>)
    %c0_106 = arith.constant 0 : index
    %c0_107 = arith.constant 0 : index
    %283 = vector.load %arg23[%c0_106, %c0_107] : memref<160x160xbf16, #tpu.memory_space<vmem>>, vector<160x160xbf16>
    %284 = arith.truncf %280 : vector<8x160xf32> to vector<8x160xbf16>
    %cst_108 = arith.constant dense<0.000000e+00> : vector<8x160xf32>
    %285 = tpu.matmul %284, %283, %cst_108 {dimension_numbers = #tpu.dot_dimension_numbers<[1], [0], [0], [1], [0, 0, 1, 1], [], []>} : vector<8x160xbf16>, vector<160x160xbf16>, vector<8x160xf32> -> vector<8x160xf32>
    %c16 = arith.constant 16 : index
    %c0_109 = arith.constant 0 : index
    %286 = vector.load %arg2[%c16, %c0_109] : memref<24x640xf32, #tpu.memory_space<vmem>>, vector<1x160xf32>
    %c17 = arith.constant 17 : index
    %c0_110 = arith.constant 0 : index
    %287 = vector.load %arg2[%c17, %c0_110] : memref<24x640xf32, #tpu.memory_space<vmem>>, vector<1x160xf32>
    %cst_111 = arith.constant dense<0.000000e+00> : vector<160xf32>
    %288 = vector.multi_reduction <add>, %285, %cst_111 [0] : vector<8x160xf32> to vector<160xf32>
    %289 = vector.shape_cast %288 : vector<160xf32> to vector<1x160xf32>
    %cst_112 = arith.constant 1.250000e-01 : f32
    %290 = vector.broadcast %cst_112 : f32 to vector<1x160xf32>
    %291 = arith.mulf %289, %290 : vector<1x160xf32>
    %292 = arith.mulf %285, %285 : vector<8x160xf32>
    %cst_113 = arith.constant dense<0.000000e+00> : vector<160xf32>
    %293 = vector.multi_reduction <add>, %292, %cst_113 [0] : vector<8x160xf32> to vector<160xf32>
    %294 = vector.shape_cast %293 : vector<160xf32> to vector<1x160xf32>
    %cst_114 = arith.constant 1.250000e-01 : f32
    %295 = vector.broadcast %cst_114 : f32 to vector<1x160xf32>
    %296 = arith.mulf %294, %295 : vector<1x160xf32>
    %297 = arith.mulf %291, %291 : vector<1x160xf32>
    %298 = arith.subf %296, %297 : vector<1x160xf32>
    %cst_115 = arith.constant 0.000000e+00 : f32
    %299 = vector.broadcast %cst_115 : f32 to vector<1x160xf32>
    %300 = arith.maximumf %298, %299 : vector<1x160xf32>
    %cst_116 = arith.constant 9.99999974E-6 : f32
    %301 = vector.broadcast %cst_116 : f32 to vector<1x160xf32>
    %302 = arith.addf %300, %301 : vector<1x160xf32>
    %303 = math.rsqrt %302 : vector<1x160xf32>
    %304 = arith.mulf %286, %303 : vector<1x160xf32>
    %305 = arith.mulf %291, %304 : vector<1x160xf32>
    %306 = arith.subf %287, %305 : vector<1x160xf32>
    %307 = vector.broadcast %304 : vector<1x160xf32> to vector<8x160xf32>
    %308 = arith.mulf %285, %307 : vector<8x160xf32>
    %309 = vector.broadcast %306 : vector<1x160xf32> to vector<8x160xf32>
    %310 = arith.addf %308, %309 : vector<8x160xf32>
    %cst_117 = arith.constant 0.000000e+00 : f32
    %311 = vector.broadcast %cst_117 : f32 to vector<8x160xf32>
    %312 = arith.maximumf %310, %311 : vector<8x160xf32>
    %c8_i32_118 = arith.constant 8 : i32
    %313 = tpu.memref_slice %arg27[%c8_i32_118] : memref<11x!tpu.dma_semaphore, #tpu.memory_space<semaphore_mem>> -> memref<1x!tpu.dma_semaphore, #tpu.memory_space<semaphore_mem>>
    %314 = tpu.memref_squeeze %313 : memref<1x!tpu.dma_semaphore, #tpu.memory_space<semaphore_mem>> -> memref<!tpu.dma_semaphore, #tpu.memory_space<semaphore_mem>>
    tpu.wait_dma2 semaphore(%314 : memref<!tpu.dma_semaphore, #tpu.memory_space<semaphore_mem>>) src(%arg11 : memref<160x128xbf16, #tpu.memory_space<any>>) dst(%arg24 : memref<160x128xbf16, #tpu.memory_space<vmem>>)
    %c0_119 = arith.constant 0 : index
    %c0_120 = arith.constant 0 : index
    %315 = vector.load %arg24[%c0_119, %c0_120] : memref<160x128xbf16, #tpu.memory_space<vmem>>, vector<160x128xbf16>
    %316 = arith.truncf %312 : vector<8x160xf32> to vector<8x160xbf16>
    %cst_121 = arith.constant dense<0.000000e+00> : vector<8x128xf32>
    %317 = tpu.matmul %316, %315, %cst_121 {dimension_numbers = #tpu.dot_dimension_numbers<[1], [0], [0], [1], [0, 0, 1, 1], [], []>} : vector<8x160xbf16>, vector<160x128xbf16>, vector<8x128xf32> -> vector<8x128xf32>
    %c18 = arith.constant 18 : index
    %c0_122 = arith.constant 0 : index
    %318 = vector.load %arg2[%c18, %c0_122] : memref<24x640xf32, #tpu.memory_space<vmem>>, vector<1x128xf32>
    %c19 = arith.constant 19 : index
    %c0_123 = arith.constant 0 : index
    %319 = vector.load %arg2[%c19, %c0_123] : memref<24x640xf32, #tpu.memory_space<vmem>>, vector<1x128xf32>
    %cst_124 = arith.constant dense<0.000000e+00> : vector<128xf32>
    %320 = vector.multi_reduction <add>, %317, %cst_124 [0] : vector<8x128xf32> to vector<128xf32>
    %321 = vector.shape_cast %320 : vector<128xf32> to vector<1x128xf32>
    %cst_125 = arith.constant 1.250000e-01 : f32
    %322 = vector.broadcast %cst_125 : f32 to vector<1x128xf32>
    %323 = arith.mulf %321, %322 : vector<1x128xf32>
    %324 = arith.mulf %317, %317 : vector<8x128xf32>
    %cst_126 = arith.constant dense<0.000000e+00> : vector<128xf32>
    %325 = vector.multi_reduction <add>, %324, %cst_126 [0] : vector<8x128xf32> to vector<128xf32>
    %326 = vector.shape_cast %325 : vector<128xf32> to vector<1x128xf32>
    %cst_127 = arith.constant 1.250000e-01 : f32
    %327 = vector.broadcast %cst_127 : f32 to vector<1x128xf32>
    %328 = arith.mulf %326, %327 : vector<1x128xf32>
    %329 = arith.mulf %323, %323 : vector<1x128xf32>
    %330 = arith.subf %328, %329 : vector<1x128xf32>
    %cst_128 = arith.constant 0.000000e+00 : f32
    %331 = vector.broadcast %cst_128 : f32 to vector<1x128xf32>
    %332 = arith.maximumf %330, %331 : vector<1x128xf32>
    %cst_129 = arith.constant 9.99999974E-6 : f32
    %333 = vector.broadcast %cst_129 : f32 to vector<1x128xf32>
    %334 = arith.addf %332, %333 : vector<1x128xf32>
    %335 = math.rsqrt %334 : vector<1x128xf32>
    %336 = arith.mulf %318, %335 : vector<1x128xf32>
    %337 = arith.mulf %323, %336 : vector<1x128xf32>
    %338 = arith.subf %319, %337 : vector<1x128xf32>
    %339 = vector.broadcast %336 : vector<1x128xf32> to vector<8x128xf32>
    %340 = arith.mulf %317, %339 : vector<8x128xf32>
    %341 = vector.broadcast %338 : vector<1x128xf32> to vector<8x128xf32>
    %342 = arith.addf %340, %341 : vector<8x128xf32>
    %cst_130 = arith.constant 0.000000e+00 : f32
    %343 = vector.broadcast %cst_130 : f32 to vector<8x128xf32>
    %344 = arith.maximumf %342, %343 : vector<8x128xf32>
    %c9_i32_131 = arith.constant 9 : i32
    %345 = tpu.memref_slice %arg27[%c9_i32_131] : memref<11x!tpu.dma_semaphore, #tpu.memory_space<semaphore_mem>> -> memref<1x!tpu.dma_semaphore, #tpu.memory_space<semaphore_mem>>
    %346 = tpu.memref_squeeze %345 : memref<1x!tpu.dma_semaphore, #tpu.memory_space<semaphore_mem>> -> memref<!tpu.dma_semaphore, #tpu.memory_space<semaphore_mem>>
    tpu.wait_dma2 semaphore(%346 : memref<!tpu.dma_semaphore, #tpu.memory_space<semaphore_mem>>) src(%arg12 : memref<128x128xbf16, #tpu.memory_space<any>>) dst(%arg25 : memref<128x128xbf16, #tpu.memory_space<vmem>>)
    %c0_132 = arith.constant 0 : index
    %c0_133 = arith.constant 0 : index
    %347 = vector.load %arg25[%c0_132, %c0_133] : memref<128x128xbf16, #tpu.memory_space<vmem>>, vector<128x128xbf16>
    %348 = arith.truncf %344 : vector<8x128xf32> to vector<8x128xbf16>
    %cst_134 = arith.constant dense<0.000000e+00> : vector<8x128xf32>
    %349 = tpu.matmul %348, %347, %cst_134 {dimension_numbers = #tpu.dot_dimension_numbers<[1], [0], [0], [1], [0, 0, 1, 1], [], []>} : vector<8x128xbf16>, vector<128x128xbf16>, vector<8x128xf32> -> vector<8x128xf32>
    %c20 = arith.constant 20 : index
    %c0_135 = arith.constant 0 : index
    %350 = vector.load %arg2[%c20, %c0_135] : memref<24x640xf32, #tpu.memory_space<vmem>>, vector<1x128xf32>
    %c21 = arith.constant 21 : index
    %c0_136 = arith.constant 0 : index
    %351 = vector.load %arg2[%c21, %c0_136] : memref<24x640xf32, #tpu.memory_space<vmem>>, vector<1x128xf32>
    %cst_137 = arith.constant dense<0.000000e+00> : vector<128xf32>
    %352 = vector.multi_reduction <add>, %349, %cst_137 [0] : vector<8x128xf32> to vector<128xf32>
    %353 = vector.shape_cast %352 : vector<128xf32> to vector<1x128xf32>
    %cst_138 = arith.constant 1.250000e-01 : f32
    %354 = vector.broadcast %cst_138 : f32 to vector<1x128xf32>
    %355 = arith.mulf %353, %354 : vector<1x128xf32>
    %356 = arith.mulf %349, %349 : vector<8x128xf32>
    %cst_139 = arith.constant dense<0.000000e+00> : vector<128xf32>
    %357 = vector.multi_reduction <add>, %356, %cst_139 [0] : vector<8x128xf32> to vector<128xf32>
    %358 = vector.shape_cast %357 : vector<128xf32> to vector<1x128xf32>
    %cst_140 = arith.constant 1.250000e-01 : f32
    %359 = vector.broadcast %cst_140 : f32 to vector<1x128xf32>
    %360 = arith.mulf %358, %359 : vector<1x128xf32>
    %361 = arith.mulf %355, %355 : vector<1x128xf32>
    %362 = arith.subf %360, %361 : vector<1x128xf32>
    %cst_141 = arith.constant 0.000000e+00 : f32
    %363 = vector.broadcast %cst_141 : f32 to vector<1x128xf32>
    %364 = arith.maximumf %362, %363 : vector<1x128xf32>
    %cst_142 = arith.constant 9.99999974E-6 : f32
    %365 = vector.broadcast %cst_142 : f32 to vector<1x128xf32>
    %366 = arith.addf %364, %365 : vector<1x128xf32>
    %367 = math.rsqrt %366 : vector<1x128xf32>
    %368 = arith.mulf %350, %367 : vector<1x128xf32>
    %369 = arith.mulf %355, %368 : vector<1x128xf32>
    %370 = arith.subf %351, %369 : vector<1x128xf32>
    %371 = vector.broadcast %368 : vector<1x128xf32> to vector<8x128xf32>
    %372 = arith.mulf %349, %371 : vector<8x128xf32>
    %373 = vector.broadcast %370 : vector<1x128xf32> to vector<8x128xf32>
    %374 = arith.addf %372, %373 : vector<8x128xf32>
    %cst_143 = arith.constant 0.000000e+00 : f32
    %375 = vector.broadcast %cst_143 : f32 to vector<8x128xf32>
    %376 = arith.maximumf %374, %375 : vector<8x128xf32>
    %c10_i32_144 = arith.constant 10 : i32
    %377 = tpu.memref_slice %arg27[%c10_i32_144] : memref<11x!tpu.dma_semaphore, #tpu.memory_space<semaphore_mem>> -> memref<1x!tpu.dma_semaphore, #tpu.memory_space<semaphore_mem>>
    %378 = tpu.memref_squeeze %377 : memref<1x!tpu.dma_semaphore, #tpu.memory_space<semaphore_mem>> -> memref<!tpu.dma_semaphore, #tpu.memory_space<semaphore_mem>>
    tpu.wait_dma2 semaphore(%378 : memref<!tpu.dma_semaphore, #tpu.memory_space<semaphore_mem>>) src(%arg13 : memref<128x640xbf16, #tpu.memory_space<any>>) dst(%arg26 : memref<128x640xbf16, #tpu.memory_space<vmem>>)
    %c0_145 = arith.constant 0 : index
    %c0_146 = arith.constant 0 : index
    %379 = vector.load %arg26[%c0_145, %c0_146] : memref<128x640xbf16, #tpu.memory_space<vmem>>, vector<128x640xbf16>
    %380 = arith.truncf %376 : vector<8x128xf32> to vector<8x128xbf16>
    %cst_147 = arith.constant dense<0.000000e+00> : vector<8x640xf32>
    %381 = tpu.matmul %380, %379, %cst_147 {dimension_numbers = #tpu.dot_dimension_numbers<[1], [0], [0], [1], [0, 0, 1, 1], [], []>} : vector<8x128xbf16>, vector<128x640xbf16>, vector<8x640xf32> -> vector<8x640xf32>
    %c22 = arith.constant 22 : index
    %c0_148 = arith.constant 0 : index
    %382 = vector.load %arg2[%c22, %c0_148] : memref<24x640xf32, #tpu.memory_space<vmem>>, vector<1x640xf32>
    %383 = vector.broadcast %382 : vector<1x640xf32> to vector<8x640xf32>
    %384 = arith.addf %381, %383 : vector<8x640xf32>
    %cst_149 = arith.constant 0.000000e+00 : f32
    %385 = vector.broadcast %cst_149 : f32 to vector<8x640xf32>
    %386 = arith.maximumf %384, %385 : vector<8x640xf32>
    %c0_150 = arith.constant 0 : index
    %c0_151 = arith.constant 0 : index
    %387 = vector.load %arg15[%c0_150, %c0_151] : memref<8x640xf32, #tpu.memory_space<vmem>>, vector<8x640xf32>
    tpu.vector_store %arg15[%c0_150, %c0_151], %386 {strides = array<i32>} : memref<8x640xf32, #tpu.memory_space<vmem>>, vector<8x640xf32>,
    return
  }
}

</mosaic_0001>

<bundles_post_ra>
// kernel: vae_forward.1
= control target key start
LH: loop header
LB: loop body
LE: loop exit
PB: predicated region body
PF: predicated region fallthrough
CT: control target
= control target key end

     0   :  { %21 = vsyncpa [#allocation15], 0  ;;  %s4570_s0 = inlined_call_operand.vmem [shape: f32[8,640], index: 0, kind: input, shape index: {}]   ;;  %s4571_s1 = inlined_call_operand.vmem [shape: bf16[640,128], index: 1, kind: input, shape index: {}]   ;;  %s4572_s2 = inlined_call_operand.hbm [shape: f32[24,640], index: 2, kind: input, shape index: {}]   ;;  %s4573_s3 = inlined_call_operand.hbm [shape: bf16[128,128], index: 3, kind: input, shape index: {}]   ;;  %s4574_s4 = inlined_call_operand.vmem [shape: bf16[128,160], index: 4, kind: input, shape index: {}]   ;;  %s4575_s5 = inlined_call_operand.hbm [shape: bf16[160,160], index: 5, kind: input, shape index: {}]   ;;  %s4576_s6 = inlined_call_operand.vmem [shape: bf16[160,32], index: 6, kind: input, shape index: {}]   ;;  %s4577_s7 = inlined_call_operand.vmem [shape: bf16[32,16], index: 7, kind: input, shape index: {}]   ;;  %s4578_s8 = inlined_call_operand.hbm [shape: bf16[16,32], index: 8, kind: input, shape index: {}]   ;;  %s4579_s9 = inlined_call_operand.hbm [shape: bf16[32,160], index: 9, kind: input, shape index: {}]   ;;  %s4580_s10 = inlined_call_operand.hbm [shape: bf16[160,160], index: 10, kind: input, shape index: {}]   ;;  %s4581_s11 = inlined_call_operand.hbm [shape: bf16[160,128], index: 11, kind: input, shape index: {}]   ;;  %s4582_s12 = inlined_call_operand.hbm [shape: bf16[128,128], index: 12, kind: input, shape index: {}]   ;;  %s4583_s13 = inlined_call_operand.hbm [shape: bf16[128,640], index: 13, kind: input, shape index: {}]   ;;  %s4584_s14 = inlined_call_operand.hbm [shape: f32[8,16], index: 14, kind: output, shape index: {0}]   ;;  %s4585_s15 = inlined_call_operand.hbm [shape: f32[8,640], index: 15, kind: output, shape index: {1}]  }
   0x1   :  { %22 = vsyncpa [#allocation16], 0 }
   0x2   :  { %23 = vsyncpa [#allocation19], 0  ;;  %s4003_s18 = smov [#allocation14]  }
   0x3   :  { %s33_s19 = sshll.u32 %s4003_s18, 4  ;;  %s34_s19 = int_to_ptr.vmem [resolvable:$true] %s33_s19 }
   0x4   :  { %s3763_s20 = scalar_lea.vmem %s34_s19, 1920  ;;  %p3768_p1 = scmp.lt.s32.totalorder %s34_s19, %s34_s19 }
   0x5   :  { %p3764_p0 = scmp.ne.s32.totalorder %s34_s19, %s3763_s20  ;;  %p3769_p2 = scmp.lt.s32.totalorder %s3763_s20, %s3763_s20 }
   0x7   :  { %p3770_p3 = por %p3769_p2, %p3768_p1 }
   0x9   :  { %p3771_p4 = pnand %p3770_p3, %p3764_p0 }
   0xb   :  { %3774 = shalt.err (!%p3771_p4)
}
   0xc   :  { %s4004_s21 = smov 640   ;;  %s4005_s22 = smov 40  }
   0xd   :  { %39 = dma.hbm_to_vmem [thread:$0]  %s4572_s2, 1920, %s34_s19, [#allocation15], %s4004_s21, %s4004_s21, %s4005_s22  }
   0xe   :  { %3975 = dma.done.wait [#allocation15], 1920  }
   0xf   :  { %3976 = vsyncadd [#allocation15], 4294965376  ;;  %s4006_s25 = smov [#allocation2]  }
  0x10   :  { %s51_s26 = sshll.u32 %s4006_s25, 4  ;;  %s52_s26 = int_to_ptr.vmem [resolvable:$true] %s51_s26 }
  0x11   :  { %s3783_s27 = scalar_lea.vmem %s52_s26, 1024  ;;  %p3788_p6 = scmp.lt.s32.totalorder %s52_s26, %s52_s26 }
  0x12   :  { %p3784_p5 = scmp.ne.s32.totalorder %s52_s26, %s3783_s27  ;;  %p3789_p7 = scmp.lt.s32.totalorder %s3783_s27, %s3783_s27 }
  0x14   :  { %p3790_p8 = por %p3789_p7, %p3788_p6 }
  0x16   :  { %p3791_p9 = pnand %p3790_p8, %p3784_p5 }
  0x18   :  { %3794 = shalt.err (!%p3791_p9)  }
  0x19   :  { %54 = dma.hbm_to_vmem [thread:$0]  %s4573_s3, 1024, %s52_s26, [#allocation13]  ;;  %v4109_v0 = vld [vmem:[%s4574_s4] sm:$0xff]  ;;  %v4114_v1 = vld [vmem:[%s4574_s4 + $0x8] sm:$0xff]  ;;  %v4119_v2 = vld [vmem:[%s4574_s4 + $0x10] sm:$0xff] }
  0x1a   :  { %v4124_v3 = vld [vmem:[%s4574_s4 + $0x18] sm:$0xff]  ;;  %v4129_v4 = vld [vmem:[%s4574_s4 + $0x20] sm:$0xff]  ;;  %v4134_v5 = vld [vmem:[%s4574_s4 + $0x28] sm:$0xff] }
  0x1b   :  { %v4139_v6 = vld [vmem:[%s4574_s4 + $0x30] sm:$0xff]  ;;  %v4144_v7 = vld [vmem:[%s4574_s4 + $0x38] sm:$0xff]  ;;  %v4149_v8 = vld [vmem:[%s4574_s4 + $0x40] sm:$0xff] }
  0x1c   :  { %v4154_v9 = vld [vmem:[%s4574_s4 + $0x48] sm:$0xff]  ;;  %v4159_v10 = vld [vmem:[%s4574_s4 + $0x50] sm:$0xff]  ;;  %v4164_v11 = vld [vmem:[%s4574_s4 + $0x58] sm:$0xff] }
  0x1d   :  { %v4169_v12 = vld [vmem:[%s4574_s4 + $0x60] sm:$0xff]  ;;  %v4174_v13 = vld [vmem:[%s4574_s4 + $0x68] sm:$0xff]  ;;  %v4179_v14 = vld [vmem:[%s4574_s4 + $0x70] sm:$0xff] }
  0x1e   :  { %v4184_v15 = vld [vmem:[%s4574_s4 + $0x78] sm:$0xff] }
  0x1f   :  { %128 = vsyncadd [#allocation13 + $0x1], 2048  ;;  %v175_v16 = vld [vmem:[%s4576_s6] sm:$0xff]  ;;  %v177_v17 = vld [vmem:[%s4576_s6 + $0x8] sm:$0xff]  ;;  %s4007_s2 = smov [#allocation4]  }
  0x20   :  { %s137_s17 = sshll.u32 %s4007_s2, 4  ;;  %176 = vst [vmem:[#allocation5] sm:$0xff] %v175_v16  ;;  %178 = vst [vmem:[#allocation5 + $0x8] sm:$0xff] %v177_v17  ;;  %v179_v18 = vld [vmem:[%s4576_s6 + $0x10] sm:$0xff]  ;;  %v181_v19 = vld [vmem:[%s4576_s6 + $0x18] sm:$0xff]  ;;  %s138_s17 = int_to_ptr.vmem [resolvable:$true] %s137_s17 }
  0x21   :  { %v183_v20 = vld [vmem:[%s4576_s6 + $0x20] sm:$0xff]  ;;  %180 = vst [vmem:[#allocation5 + $0x10] sm:$0xff] %v179_v18  ;;  %182 = vst [vmem:[#allocation5 + $0x18] sm:$0xff] %v181_v19  ;;  %v185_v21 = vld [vmem:[%s4576_s6 + $0x28] sm:$0xff]  ;;  %s3803_s28 = scalar_lea.vmem %s138_s17, 2560  ;;  %p3808_p11 = scmp.lt.s32.totalorder %s138_s17, %s138_s17 }
  0x22   :  { %184 = vst [vmem:[#allocation5 + $0x20] sm:$0xff] %v183_v20  ;;  %v187_v22 = vld [vmem:[%s4576_s6 + $0x30] sm:$0xff]  ;;  %v189_v23 = vld [vmem:[%s4576_s6 + $0x38] sm:$0xff]  ;;  %p3804_p10 = scmp.ne.s32.totalorder %s138_s17, %s3803_s28  ;;  %p3809_p12 = scmp.lt.s32.totalorder %s3803_s28, %s3803_s28 }
  0x24   :  { %p3810_p13 = por %p3809_p12, %p3808_p11 }
  0x26   :  { %p3811_p0 = pnand %p3810_p13, %p3804_p10 }
  0x28   :  { %3814 = shalt.err (!%p3811_p0)  }
  0x29   :  { %140 = dma.hbm_to_vmem [thread:$0]  %s4575_s5, 2560, %s138_s17, [#allocation13 + $0x2]  ;;  %186 = vst [vmem:[#allocation5 + $0x28] sm:$0xff] %v185_v21  ;;  %188 = vst [vmem:[#allocation5 + $0x30] sm:$0xff] %v187_v22  ;;  %v191_v24 = vld [vmem:[%s4576_s6 + $0x40] sm:$0xff]  ;;  %v193_v25 = vld [vmem:[%s4576_s6 + $0x48] sm:$0xff] }
  0x2a   :  { %190 = vst [vmem:[#allocation5 + $0x38] sm:$0xff] %v189_v23  ;;  %192 = vst [vmem:[#allocation5 + $0x40] sm:$0xff] %v191_v24 }
  0x2b   :  { %194 = vst [vmem:[#allocation5 + $0x48] sm:$0xff] %v193_v25 }
  0x2c   :  { %202 = vsyncadd [#allocation13 + $0x3], 1280  ;;  %v237_v26 = vld [vmem:[%s4577_s7] sm:$0xff]  ;;  %v239_v27 = vld [vmem:[%s4577_s7 + $0x8] sm:$0xff]  ;;  %v4008_v19 = vmov 0.0   ;;  %vm4009_vm0 = vmmov 0  }
  0x2d   :  { %238 = vst [vmem:[#allocation6] sm:$0xff] %v237_v26  ;;  %240 = vst [vmem:[#allocation6 + $0x8] sm:$0xff] %v239_v27  ;;  %v3524_v28 = vld [vmem:[%s4571_s1 + $0x78] sm:$0xff]   ;;  %v3528_v32 = vld [vmem:[%s4571_s1 + $0x70] sm:$0xff]  }
  0x2e   :  { %v3525_v29 = vld [vmem:[%s4571_s1 + $0xf8] sm:$0xff]   ;;  %3328 = vmatprep.subr.bf16.mxu0 %v3524_v28  ;;  %v3529_v33 = vld [vmem:[%s4571_s1 + $0xf0] sm:$0xff]   ;;  %v3532_v36 = vld [vmem:[%s4571_s1 + $0x68] sm:$0xff]  }
  0x2f   :  { %v3526_v30 = vld [vmem:[%s4571_s1 + $0x38] sm:$0xff]   ;;  %3350 = vmatprep.subr.bf16.mxu1 %v3525_v29  ;;  %v3530_v34 = vld [vmem:[%s4571_s1 + $0x30] sm:$0xff]   ;;  %v3533_v37 = vld [vmem:[%s4571_s1 + $0xe8] sm:$0xff]  }
  0x30   :  { %v3527_v31 = vld [vmem:[%s4571_s1 + $0xb8] sm:$0xff]   ;;  %3329 = vmatpush3.bf16.msra.mxu0 %v3526_v30  ;;  %v3531_v35 = vld [vmem:[%s4571_s1 + $0xb0] sm:$0xff]   ;;  %v3534_v38 = vld [vmem:[%s4571_s1 + $0x28] sm:$0xff]  }
  0x31   :  { %3351 = vmatpush3.bf16.msra.mxu1 %v3527_v31  ;;  %3330 = vmatprep.subr.bf16.mxu0 %v3528_v32  ;;  %v3535_v39 = vld [vmem:[%s4571_s1 + $0xa8] sm:$0xff]   ;;  %v3536_v40 = vld [vmem:[%s4571_s1 + $0x60] sm:$0xff]   ;;  %v3540_v44 = vld [vmem:[%s4571_s1 + $0x58] sm:$0xff]  }
  0x32   :  { %3352 = vmatprep.subr.bf16.mxu1 %v3529_v33  ;;  %v3537_v41 = vld [vmem:[%s4571_s1 + $0xe0] sm:$0xff]   ;;  %v3541_v45 = vld [vmem:[%s4571_s1 + $0xd8] sm:$0xff]   ;;  %v3544_v48 = vld [vmem:[%s4571_s1 + $0x50] sm:$0xff]  }
  0x33   :  { %v3538_v42 = vld [vmem:[%s4571_s1 + $0x20] sm:$0xff]   ;;  %v3542_v46 = vld [vmem:[%s4571_s1 + $0x18] sm:$0xff]   ;;  %v3545_v49 = vld [vmem:[%s4571_s1 + $0xd0] sm:$0xff]  }
  0x34   :  { %3331 = vmatpush3.bf16.msra.mxu0 %v3530_v34  ;;  %v3539_v43 = vld [vmem:[%s4571_s1 + $0xa0] sm:$0xff]   ;;  %v3543_v47 = vld [vmem:[%s4571_s1 + $0x98] sm:$0xff]   ;;  %v3546_v50 = vld [vmem:[%s4571_s1 + $0x10] sm:$0xff]  }
  0x35   :  { %3353 = vmatpush3.bf16.msra.mxu1 %v3531_v35  ;;  %3332 = vmatprep.subr.bf16.mxu0 %v3532_v36  ;;  %v3547_v51 = vld [vmem:[%s4571_s1 + $0x90] sm:$0xff]   ;;  %v3548_v52 = vld [vmem:[%s4571_s1 + $0x48] sm:$0xff]   ;;  %v3552_v56 = vld [vmem:[%s4571_s1 + $0x40] sm:$0xff]  }
  0x36   :  { %3354 = vmatprep.subr.bf16.mxu1 %v3533_v37  ;;  %v3549_v53 = vld [vmem:[%s4571_s1 + $0xc8] sm:$0xff]   ;;  %v3553_v57 = vld [vmem:[%s4571_s1 + $0xc0] sm:$0xff]   ;;  %v324_v61 = vld [vmem:[%s4570_s0 + $0x18] sm:$0xff] }
  0x37   :  { %v3550_v54 = vld [vmem:[%s4571_s1 + $0x8] sm:$0xff]   ;;  %v3554_v58 = vld [vmem:[%s4571_s1] sm:$0xff]   ;;  %v409_v16 = vpack.c.bf16 %v324_v61, %v324_v61  ;;  %v323_v18 = vld [vmem:[%s4570_s0 + $0x10] sm:$0xff] }
  0x38   :  { %3333 = vmatpush3.bf16.msra.mxu0 %v3534_v38  ;;  %v3551_v55 = vld [vmem:[%s4571_s1 + $0x88] sm:$0xff]   ;;  %v3555_v59 = vld [vmem:[%s4571_s1 + $0x80] sm:$0xff]   ;;  %v408_v20 = vpack.c.bf16 %v323_v18, %v323_v18  ;;  %v3556_v21 = vld [vmem:[%s4571_s1 + $0x138] sm:$0xff]  }
  0x39   :  { %3355 = vmatpush3.bf16.msra.mxu1 %v3535_v39  ;;  %3334 = vmatprep.subr.bf16.mxu0 %v3536_v40  ;;  %v322_v60 = vld [vmem:[%s4570_s0 + $0x8] sm:$0xff]  ;;  %v321_v62 = vld [vmem:[%s4570_s0] sm:$0xff]  ;;  %v3557_v22 = vld [vmem:[%s4571_s1 + $0x130] sm:$0xff]  }
  0x3a   :  { %3356 = vmatprep.subr.bf16.mxu1 %v3537_v41  ;;  %v407_v63 = vpack.c.bf16 %v322_v60, %v322_v60  ;;  %v406_v17 = vpack.c.bf16 %v321_v62, %v321_v62  ;;  %723 = vmatprep.mubr.bf16.mxu1 %v409_v16  ;;  %v3558_v23 = vld [vmem:[%s4571_s1 + $0x128] sm:$0xff]  }
  0x3c   :  { %3335 = vmatpush3.bf16.msra.mxu0 %v3538_v42  ;;  %683 = vmatprep.mubr.bf16.mxu0 %v407_v63 }
  0x3d   :  { %3357 = vmatpush3.bf16.msra.mxu1 %v3539_v43  ;;  %3336 = vmatprep.subr.bf16.mxu0 %v3540_v44 }
  0x3e   :  { %3358 = vmatprep.subr.bf16.mxu1 %v3541_v45 }
  0x40   :  { %3337 = vmatpush3.bf16.msra.mxu0 %v3542_v46 }
  0x41   :  { %3359 = vmatpush3.bf16.msra.mxu1 %v3543_v47  ;;  %3338 = vmatprep.subr.bf16.mxu0 %v3544_v48 }
  0x42   :  { %3360 = vmatprep.subr.bf16.mxu1 %v3545_v49 }
  0x44   :  { %3339 = vmatpush3.bf16.msra.mxu0 %v3546_v50 }
  0x45   :  { %3361 = vmatpush3.bf16.msra.mxu1 %v3547_v51  ;;  %3340 = vmatprep.subr.bf16.mxu0 %v3548_v52 }
  0x46   :  { %3362 = vmatprep.subr.bf16.mxu1 %v3549_v53 }
  0x48   :  { %3341 = vmatpush3.bf16.msra.mxu0 %v3550_v54 }
  0x49   :  { %3363 = vmatpush3.bf16.msra.mxu1 %v3551_v55  ;;  %3342 = vmatprep.subr.bf16.mxu0 %v3552_v56 }
  0x4a   :  { %3364 = vmatprep.subr.bf16.mxu1 %v3553_v57 }
  0x4c   :  { %3343 = vmatpush3.bf16.msra.mxu0 %v3554_v58 }
  0x4d   :  { %3365 = vmatpush3.bf16.msra.mxu1 %v3555_v59  ;;  %3413 = vmatprep.subr.bf16.mxu0 %v4008_v19 }
  0x4f   :  { %684 = vmatmul.mubr.bf16.vlgmr.msra.gmra.mxu0 %v406_v17 }
  0x50   :  { %724 = vmatmul.mubr.bf16.vlgmr.msra.gmra.mxu1 %v408_v20  ;;  %3414 = vmatpush3.bf16.msra.mxu0 %v3556_v21 }
  0x51   :  { %3429 = vmatprep.mubr.msk.bf16.mxu0 %vm4009_vm0, %v4008_v19  ;;  %3415 = vmatprep.subr.bf16.mxu0 %v4008_v19 }
  0x54   :  { %3416 = vmatpush3.bf16.msra.mxu0 %v3557_v22 }
  0x55   :  { %248 = vsyncadd [#allocation13 + $0x4], 256  ;;  %3417 = vmatprep.subr.bf16.mxu0 %v4008_v19  ;;  %v3559_v24 = vld [vmem:[%s4571_s1 + $0x120] sm:$0xff]   ;;  %v3560_v25 = vld [vmem:[%s4571_s1 + $0x118] sm:$0xff]   ;;  %s4010_s25 = smov [#allocation7]   ;;  %s4011_s7 = smov [#allocation8]  }
  0x56   :  { %v3561_v26 = vld [vmem:[%s4571_s1 + $0x110] sm:$0xff]   ;;  %v3562_v27 = vld [vmem:[%s4571_s1 + $0x108] sm:$0xff]   ;;  %v3563_v28 = vld [vmem:[%s4571_s1 + $0x100] sm:$0xff]   ;;  %s257_s26 = sshll.u32 %s4010_s25, 4  ;;  %s269_s27 = sshll.u32 %s4011_s7, 4  ;;  %s258_s26 = int_to_ptr.vmem [resolvable:$true] %s257_s26  ;;  %s270_s27 = int_to_ptr.vmem [resolvable:$true] %s269_s27 }
  0x57   :  { %v325_v29 = vld [vmem:[%s4570_s0 + $0x20] sm:$0xff]  ;;  %s3823_s28 = scalar_lea.vmem %s258_s26, 128  ;;  %p3828_p2 = scmp.lt.s32.totalorder %s258_s26, %s258_s26 }
  0x58   :  { %3418 = vmatpush3.bf16.msra.mxu0 %v3558_v23  ;;  %v410_v30 = vpack.c.bf16 %v325_v29, %v325_v29  ;;  %p3824_p1 = scmp.ne.s32.totalorder %s258_s26, %s3823_s28  ;;  %p3829_p3 = scmp.lt.s32.totalorder %s3823_s28, %s3823_s28 }
  0x59   :  { %3419 = vmatprep.subr.bf16.mxu0 %v4008_v19 }
  0x5a   :  { %p3830_p4 = por %p3829_p3, %p3828_p2 }
  0x5c   :  { %3420 = vmatpush3.bf16.msra.mxu0 %v3559_v24  ;;  %p3831_p5 = pnand %p3830_p4, %p3824_p1 }
  0x5d   :  { %3421 = vmatprep.subr.bf16.mxu0 %v4008_v19 }
  0x60   :  { %3422 = vmatpush3.bf16.msra.mxu0 %v3560_v25 }
  0x61   :  { %3423 = vmatprep.subr.bf16.mxu0 %v4008_v19 }
  0x64   :  { %3424 = vmatpush3.bf16.msra.mxu0 %v3561_v26 }
  0x65   :  { %3425 = vmatprep.subr.bf16.mxu0 %v4008_v19 }
  0x68   :  { %3426 = vmatpush3.bf16.msra.mxu0 %v3562_v27 }
  0x69   :  { %3427 = vmatprep.subr.bf16.mxu0 %v4008_v19 }
  0x6c   :  { %3428 = vmatpush3.bf16.msra.mxu0 %v3563_v28 }
  0x6f   :  { %3430 = vmatmul.mubr.bf16.vlgmr.msra.gmra.mxu0 %v410_v30 }
  0x70   :  { %3834 = shalt.err (!%p3831_p5)  }
  0x71   :  { %260 = dma.hbm_to_vmem [thread:$0]  %s4578_s8, 128, %s258_s26, [#allocation13 + $0x5] }
  0x72   :  { %s3843_s0 = scalar_lea.vmem %s270_s27, 512  ;;  %p3848_p7 = scmp.lt.s32.totalorder %s270_s27, %s270_s27 }
  0x73   :  { %p3844_p6 = scmp.ne.s32.totalorder %s270_s27, %s3843_s0  ;;  %p3849_p8 = scmp.lt.s32.totalorder %s3843_s0, %s3843_s0 }
  0x75   :  { %p3850_p9 = por %p3849_p8, %p3848_p7 }
  0x77   :  { %p3851_p10 = pnand %p3850_p9, %p3844_p6 }
  0x79   :  { %3854 = shalt.err (!%p3851_p10)  }
  0x7a   :  { %272 = dma.hbm_to_vmem [thread:$0]  %s4579_s9, 512, %s270_s27, [#allocation13 + $0x6] }
  0x7b   :  { %s4012_s2 = smov [#allocation9]   ;;  %s4013_s19 = smov [#allocation10]  }
  0x7c   :  { %s281_s18 = sshll.u32 %s4012_s2, 4  ;;  %s293_s20 = sshll.u32 %s4013_s19, 4  ;;  %s282_s18 = int_to_ptr.vmem [resolvable:$true] %s281_s18  ;;  %s294_s20 = int_to_ptr.vmem [resolvable:$true] %s293_s20 }
  0x7d   :  { %s3863_s4 = scalar_lea.vmem %s282_s18, 2560  ;;  %p3868_p12 = scmp.lt.s32.totalorder %s282_s18, %s282_s18 }
  0x7e   :  { %p3864_p11 = scmp.ne.s32.totalorder %s282_s18, %s3863_s4  ;;  %p3869_p13 = scmp.lt.s32.totalorder %s3863_s4, %s3863_s4 }
  0x80   :  { %p3870_p0 = por %p3869_p13, %p3868_p12 }
  0x82   :  { %p3871_p1 = pnand %p3870_p0, %p3864_p11 }
  0x84   :  { %3874 = shalt.err (!%p3871_p1)  }
  0x85   :  { %284 = dma.hbm_to_vmem [thread:$0]  %s4580_s10, 2560, %s282_s18, [#allocation13 + $0x7] }
  0x86   :  { %s3883_s5 = scalar_lea.vmem %s294_s20, 1280  ;;  %p3888_p3 = scmp.lt.s32.totalorder %s294_s20, %s294_s20 }
  0x87   :  { %p3884_p2 = scmp.ne.s32.totalorder %s294_s20, %s3883_s5  ;;  %p3889_p4 = scmp.lt.s32.totalorder %s3883_s5, %s3883_s5 }
  0x89   :  { %p3890_p5 = por %p3889_p4, %p3888_p3 }
  0x8b   :  { %p3891_p6 = pnand %p3890_p5, %p3884_p2 }
  0x8d   :  { %3894 = shalt.err (!%p3891_p6)  }
  0x8e   :  { %296 = dma.hbm_to_vmem [thread:$0]  %s4581_s11, 1280, %s294_s20, [#allocation13 + $0x8] }
  0x8f   :  { %s4014_s3 = smov [#allocation11]   ;;  %s4015_s23 = smov [#allocation12]  }
  0x90   :  { %s305_s22 = sshll.u32 %s4014_s3, 4  ;;  %s317_s6 = sshll.u32 %s4015_s23, 4  ;;  %s306_s22 = int_to_ptr.vmem [resolvable:$true] %s305_s22  ;;  %s318_s6 = int_to_ptr.vmem [resolvable:$true] %s317_s6 }
  0x91   :  { %s3903_s24 = scalar_lea.vmem %s306_s22, 1024  ;;  %p3908_p8 = scmp.lt.s32.totalorder %s306_s22, %s306_s22 }
  0x92   :  { %p3904_p7 = scmp.ne.s32.totalorder %s306_s22, %s3903_s24  ;;  %p3909_p9 = scmp.lt.s32.totalorder %s3903_s24, %s3903_s24 }
  0x94   :  { %p3910_p10 = por %p3909_p9, %p3908_p8 }
  0x96   :  { %p3911_p11 = pnand %p3910_p10, %p3904_p7 }
  0x98   :  { %3914 = shalt.err (!%p3911_p11)  }
  0x99   :  { %308 = dma.hbm_to_vmem [thread:$0]  %s4582_s12, 1024, %s306_s22, [#allocation13 + $0x9] }
  0x9a   :  { %s3923_s26 = scalar_lea.vmem %s318_s6, 5120  ;;  %p3928_p13 = scmp.lt.s32.totalorder %s318_s6, %s318_s6 }
  0x9b   :  { %p3924_p12 = scmp.ne.s32.totalorder %s318_s6, %s3923_s26  ;;  %p3929_p0 = scmp.lt.s32.totalorder %s3923_s26, %s3923_s26 }
  0x9d   :  { %p3930_p1 = por %p3929_p0, %p3928_p13 }
  0x9f   :  { %p3931_p2 = pnand %p3930_p1, %p3924_p12 }
  0xa1   :  { %3934 = shalt.err (!%p3931_p2)  }
  0xa2   :  { %320 = dma.hbm_to_vmem [thread:$0]  %s4583_s13, 5120, %s318_s6, [#allocation13 + $0xa]  ;;  %v771_v18 = vld [vmem:[#allocation14] ss:$0 sm:$0xff]  ;;  %v772_v22 = vld [vmem:[#allocation14 + $0x1] ss:$0 sm:$0xff] }
 0x10f   :  { %v3344_v31 = vpop.f32.mrf.mxu0 }
 0x110   :  { %v3366_v32 = vpop.f32.mrf.mxu1 }
 0x111   :  { %v3345_v33 = vpop.f32.mrf.mxu0 }
 0x112   :  { %v3367_v34 = vpop.f32.mrf.mxu1  ;;  %v3346_v39 = vadd.f32 %v3345_v33, %v3344_v31 }
 0x113   :  { %v3347_v35 = vpop.f32.mrf.mxu0  ;;  %v3368_v40 = vadd.f32 %v3367_v34, %v3366_v32 }
 0x114   :  { %v3369_v36 = vpop.f32.mrf.mxu1 }
 0x115   :  { %v3348_v37 = vpop.f32.mrf.mxu0  ;;  %v726_v41 = vadd.f32 %v3368_v40, %v3346_v39 }
 0x116   :  { %v3370_v38 = vpop.f32.mrf.mxu1 }
 0x12f   :  { %v765_v42 = vpop.f32.mrf.mxu0 }
 0x130   :  { %v766_v43 = vadd.f32 %v765_v42, %v726_v41 }
 0x131   :  { %v3431_v44 = vpop.f32.mrf.mxu0 }
 0x132   :  { %v773_v45 = vrot.slane %v766_v43, 4  ;;  %v780_v46 = vmul.f32 %v766_v43, %v766_v43 }
 0x133   :  { %v768_v47 = vpop.f32.mrf.mxu0 }
 0x134   :  { %v774_v48 = vadd.f32 %v773_v45, %v766_v43  ;;  %v781_v49 = vrot.slane %v780_v46, 4 }
 0x135   :  { %v3432_v50 = vpop.f32.mrf.mxu0 }
 0x136   :  { %v775_v51 = vrot.slane %v774_v48, 2  ;;  %v782_v52 = vadd.f32 %v781_v49, %v780_v46 }
 0x138   :  { %v776_v53 = vadd.f32 %v775_v51, %v774_v48  ;;  %v783_v54 = vrot.slane %v782_v52, 2 }
 0x13a   :  { %v777_v55 = vrot.slane %v776_v53, 1  ;;  %v784_v56 = vadd.f32 %v783_v54, %v782_v52 }
 0x13c   :  { %v778_v57 = vadd.f32 %v777_v55, %v776_v53  ;;  %v785_v58 = vrot.slane %v784_v56, 1 }
 0x13e   :  { %v779_v59 = vmul.f32 0.125, %v778_v57  ;;  %v786_v60 = vadd.f32 %v785_v58, %v784_v56 }
 0x140   :  { %v787_v61 = vmul.f32 0.125, %v786_v60  ;;  %v788_v62 = vmul.f32 %v779_v59, %v779_v59 }
 0x142   :  { %v789_v63 = vsub.f32 %v787_v61, %v788_v62 }
 0x144   :  { %v790_v16 = vmax.f32 %v789_v63, 0.0 }
 0x146   :  { %v791_v17 = vadd.f32 1e-05, %v790_v16 }
 0x148   :  { %3564 = vrsqrt.f32 %v791_v17 }
 0x155   :  { %v3565_v20 = vpop.eup %3564 }
 0x156   :  { %v793_v21 = vmul.f32 %v3565_v20, %v771_v18 }
 0x158   :  { %v794_v23 = vmul.f32 %v793_v21, %v779_v59  ;;  %v796_v25 = vmul.f32 %v793_v21, %v766_v43 }
 0x15a   :  { %v795_v24 = vsub.f32 %v772_v22, %v794_v23 }
 0x15c   :  { %v797_v26 = vadd.f32 %v796_v25, %v795_v24 }
 0x15e   :  { %v798_v27 = vmul.f32 0.1, %v797_v26 }
 0x160   :  { %v799_v28 = vmax.f32 %v797_v26, %v798_v27 }
 0x161   :  { %3977 = dma.done.wait [#allocation13], 1024 }
 0x162   :  { %3978 = vsyncadd [#allocation13], 4294966272  ;;  %3433 = vmatprep.subr.bf16.mxu1 %v4008_v19  ;;  %3449 = vmatprep.mubr.msk.bf16.mxu1 %vm4009_vm0, %v4008_v19  ;;  %v3566_v29 = vld [vmem:[#allocation2 + $0x38] sm:$0xff]   ;;  %v3567_v30 = vld [vmem:[#allocation2 + $0x30] sm:$0xff]   ;;  %v820_v37 = vpack.c.bf16 %v799_v28, %v799_v28  ;;  %v3194_v24 = vcombine.high %v4179_v14, %v4184_v15  ;;  %v3193_v25 = vcombine.low %v4179_v14, %v4184_v15 }
 0x163   :  { %3434 = vmatpush3.bf16.msra.mxu1 %v3566_v29  ;;  %v3568_v31 = vld [vmem:[#allocation2 + $0x28] sm:$0xff]   ;;  %v3569_v32 = vld [vmem:[#allocation2 + $0x20] sm:$0xff]   ;;  %v3570_v33 = vld [vmem:[#allocation2 + $0x18] sm:$0xff]   ;;  %v3192_v26 = vcombine.high %v4169_v12, %v4174_v13 }
 0x164   :  { %3435 = vmatprep.subr.bf16.mxu1 %v4008_v19  ;;  %v3571_v34 = vld [vmem:[#allocation2 + $0x10] sm:$0xff]   ;;  %v3572_v35 = vld [vmem:[#allocation2 + $0x8] sm:$0xff]   ;;  %v3573_v36 = vld [vmem:[#allocation2] sm:$0xff]  }
 0x165   :  { %v909_v61 = vld [vmem:[#allocation14 + $0x2] ss:$0 sm:$0xff]  ;;  %v910_v16 = vld [vmem:[#allocation14 + $0x3] ss:$0 sm:$0xff] }
 0x167   :  { %3436 = vmatpush3.bf16.msra.mxu1 %v3567_v30 }
 0x168   :  { %3437 = vmatprep.subr.bf16.mxu1 %v4008_v19 }
 0x16b   :  { %3438 = vmatpush3.bf16.msra.mxu1 %v3568_v31 }
 0x16c   :  { %3439 = vmatprep.subr.bf16.mxu1 %v4008_v19 }
 0x16f   :  { %3440 = vmatpush3.bf16.msra.mxu1 %v3569_v32 }
 0x170   :  { %3441 = vmatprep.subr.bf16.mxu1 %v4008_v19 }
 0x173   :  { %3442 = vmatpush3.bf16.msra.mxu1 %v3570_v33 }
 0x174   :  { %3443 = vmatprep.subr.bf16.mxu1 %v4008_v19 }
 0x177   :  { %3444 = vmatpush3.bf16.msra.mxu1 %v3571_v34 }
 0x178   :  { %3445 = vmatprep.subr.bf16.mxu1 %v4008_v19 }
 0x17b   :  { %3446 = vmatpush3.bf16.msra.mxu1 %v3572_v35 }
 0x17c   :  { %3447 = vmatprep.subr.bf16.mxu1 %v4008_v19 }
 0x17f   :  { %3448 = vmatpush3.bf16.msra.mxu1 %v3573_v36 }
 0x182   :  { %3450 = vmatmul.mubr.bf16.vlgmr.msra.gmra.mxu1 %v820_v37 }
 0x242   :  { %v903_v38 = vpop.f32.mrf.mxu1 }
 0x243   :  { %v911_v39 = vrot.slane %v903_v38, 4  ;;  %v918_v40 = vmul.f32 %v903_v38, %v903_v38 }
 0x244   :  { %v3451_v41 = vpop.f32.mrf.mxu1 }
 0x245   :  { %v912_v42 = vadd.f32 %v911_v39, %v903_v38  ;;  %v919_v43 = vrot.slane %v918_v40, 4 }
 0x246   :  { %v906_v44 = vpop.f32.mrf.mxu1 }
 0x247   :  { %v913_v45 = vrot.slane %v912_v42, 2  ;;  %v920_v46 = vadd.f32 %v919_v43, %v918_v40 }
 0x248   :  { %v3452_v47 = vpop.f32.mrf.mxu1 }
 0x249   :  { %v914_v48 = vadd.f32 %v913_v45, %v912_v42  ;;  %v921_v49 = vrot.slane %v920_v46, 2 }
 0x24b   :  { %v915_v50 = vrot.slane %v914_v48, 1  ;;  %v922_v51 = vadd.f32 %v921_v49, %v920_v46 }
 0x24d   :  { %v916_v52 = vadd.f32 %v915_v50, %v914_v48  ;;  %v923_v53 = vrot.slane %v922_v51, 1 }
 0x24f   :  { %v917_v54 = vmul.f32 0.125, %v916_v52  ;;  %v924_v55 = vadd.f32 %v923_v53, %v922_v51 }
 0x251   :  { %v925_v56 = vmul.f32 0.125, %v924_v55  ;;  %v926_v57 = vmul.f32 %v917_v54, %v917_v54 }
 0x253   :  { %v927_v58 = vsub.f32 %v925_v56, %v926_v57 }
 0x255   :  { %v928_v59 = vmax.f32 %v927_v58, 0.0 }
 0x257   :  { %v929_v60 = vadd.f32 1e-05, %v928_v59 }
 0x259   :  { %3574 = vrsqrt.f32 %v929_v60 }
 0x266   :  { %v3575_v62 = vpop.eup %3574 }
 0x267   :  { %v931_v63 = vmul.f32 %v3575_v62, %v909_v61 }
 0x269   :  { %v932_v17 = vmul.f32 %v931_v63, %v917_v54  ;;  %v934_v20 = vmul.f32 %v931_v63, %v903_v38 }
 0x26b   :  { %v933_v18 = vsub.f32 %v910_v16, %v932_v17 }
 0x26d   :  { %v935_v21 = vadd.f32 %v934_v20, %v933_v18 }
 0x26f   :  { %v936_v22 = vmul.f32 0.1, %v935_v21 }
 0x271   :  { %v937_v23 = vmax.f32 %v935_v21, %v936_v22 }
 0x272   :  { %3979 = dma.done.wait [#allocation13 + $0x1], 2048 }
 0x273   :  { %3980 = vsyncadd [#allocation13 + $0x1], 4294965248  ;;  %1038 = vmatprep.subr.bf16.mxu0 %v3194_v24  ;;  %v3191_v27 = vcombine.low %v4169_v12, %v4174_v13  ;;  %v3190_v28 = vcombine.high %v4159_v10, %v4164_v11  ;;  %v4016_v29 = vmov 0   ;;  %v3189_v14 = vcombine.low %v4159_v10, %v4164_v11 }
 0x274   :  { %1039 = vmatpush1.bf16.msra.mxu0 %v3193_v25  ;;  %1070 = vmatprep.mubr.bf16.mxu0 %v4016_v29  ;;  %v3188_v15 = vcombine.high %v4149_v8, %v4154_v9  ;;  %v3187_v30 = vcombine.low %v4149_v8, %v4154_v9  ;;  %v3186_v12 = vcombine.high %v4139_v6, %v4144_v7  ;;  %vm1089_vm1 = vcmask 261120  }
 0x275   :  { %1040 = vmatprep.subr.bf16.mxu0 %v3192_v26  ;;  %v3185_v13 = vcombine.low %v4139_v6, %v4144_v7  ;;  %v3184_v10 = vcombine.high %v4129_v4, %v4134_v5  ;;  %v3183_v11 = vcombine.low %v4129_v4, %v4134_v5  ;;  %v3182_v8 = vcombine.high %v4119_v2, %v4124_v3 }
 0x276   :  { %v3181_v9 = vcombine.low %v4119_v2, %v4124_v3  ;;  %v3180_v6 = vcombine.high %v4109_v0, %v4114_v1  ;;  %v3179_v7 = vcombine.low %v4109_v0, %v4114_v1  ;;  %v957_v31 = vpack.c.bf16 %v937_v23, %v937_v23 }
 0x277   :  { %v4017_v23 = vmov 1966171168   ;;  %v1132_v25 = vlaneseq }
 0x278   :  { %1041 = vmatpush1.bf16.msra.mxu0 %v3191_v27  ;;  %v1130_v24 = vunpack.c.l.s4 %v4017_v23 }
 0x279   :  { %1042 = vmatprep.subr.bf16.mxu0 %v3190_v28  ;;  %v4444_v27 = vshrl.u32 %v1132_v25, 7 }
 0x27a   :  { %v1131_v26 = vunpack.c.0.s8 %v1130_v24 }
 0x27c   :  { %1043 = vmatpush1.bf16.msra.mxu0 %v3189_v14  ;;  %v4447_v14 = vsub.s32 %v1131_v26, %v4444_v27 }
 0x27d   :  { %1044 = vmatprep.subr.bf16.mxu0 %v3188_v15 }
 0x280   :  { %1045 = vmatpush1.bf16.msra.mxu0 %v3187_v30 }
 0x281   :  { %1046 = vmatprep.subr.bf16.mxu0 %v3186_v12 }
 0x284   :  { %1047 = vmatpush1.bf16.msra.mxu0 %v3185_v13  ;;  %v1080_v13 = vld [vmem:[#allocation14 + $0x4] ss:$8 sm:$0x3] }
 0x285   :  { %1048 = vmatprep.subr.bf16.mxu0 %v3184_v10 }
 0x288   :  { %1049 = vmatpush1.bf16.msra.mxu0 %v3183_v11  ;;  %v4452_v11 = vsub.s32 0, %v4444_v27 }
 0x289   :  { %1050 = vmatprep.subr.bf16.mxu0 %v3182_v8  ;;  %v4455_v8 = vsub.s32 1, %v4444_v27 }
 0x28c   :  { %1051 = vmatpush1.bf16.msra.mxu0 %v3181_v9 }
 0x28d   :  { %1052 = vmatprep.subr.bf16.mxu0 %v3180_v6 }
 0x290   :  { %1053 = vmatpush1.bf16.msra.mxu0 %v3179_v7 }
 0x293   :  { %1071 = vmatmul.mubr.bf16.vlgmr.msra.gmra.mxu0 %v957_v31 }
 0x353   :  { %v4431_v4 = vpop.f32.mrf.mxu0 }
 0x354   :  { %v1083_v5 = vrot.slane %v4431_v4, 4  ;;  %v1099_v2 = vmul.f32 %v4431_v4, %v4431_v4 }
 0x355   :  { %v4436_v3 = vpop.f32.mrf.mxu0 }
 0x356   :  { %v1084_v32 = vadd.f32 %v1083_v5, %v4431_v4  ;;  %v1101_v33 = vrot.slane %v1099_v2, 4  ;;  %v1090_v0 = vsel %vm1089_vm1, %v4436_v3, 0.0  ;;  %v1100_v1 = vmul.f32 %v4436_v3, %v4436_v3 }
 0x357   :  { %v1091_v34 = vrot.slane %v1090_v0, 4  ;;  %v1076_v35 = vpop.f32.mrf.mxu0 }
 0x358   :  { %v1085_v36 = vrot.slane %v1084_v32, 2  ;;  %v1102_v37 = vadd.f32 %v1101_v33, %v1099_v2  ;;  %v1107_v38 = vsel %vm1089_vm1, %v1100_v1, 0.0  ;;  %v1082_v33 = vld [vmem:[#allocation14 + $0x5] ss:$8 sm:$0x3] }
 0x359   :  { %v1092_v39 = vadd.f32 %v1091_v34, %v1090_v0  ;;  %v1108_v40 = vrot.slane %v1107_v38, 4  ;;  %v1077_v41 = vpop.f32.mrf.mxu0 }
 0x35a   :  { %v1086_v42 = vadd.f32 %v1085_v36, %v1084_v32  ;;  %v1103_v43 = vrot.slane %v1102_v37, 2 }
 0x35b   :  { %v1093_v44 = vrot.slane %v1092_v39, 2  ;;  %v1109_v45 = vadd.f32 %v1108_v40, %v1107_v38 }
 0x35c   :  { %v1087_v46 = vrot.slane %v1086_v42, 1  ;;  %v1104_v47 = vadd.f32 %v1103_v43, %v1102_v37 }
 0x35d   :  { %v1094_v48 = vadd.f32 %v1093_v44, %v1092_v39  ;;  %v1110_v49 = vrot.slane %v1109_v45, 2 }
 0x35e   :  { %v1088_v50 = vadd.f32 %v1087_v46, %v1086_v42  ;;  %v1105_v51 = vrot.slane %v1104_v47, 1 }
 0x35f   :  { %v1095_v52 = vrot.slane %v1094_v48, 1  ;;  %v1111_v53 = vadd.f32 %v1110_v49, %v1109_v45 }
 0x360   :  { %v1097_v54 = vmul.f32 0.125, %v1088_v50  ;;  %v1106_v55 = vadd.f32 %v1105_v51, %v1104_v47 }
 0x361   :  { %v1096_v56 = vadd.f32 %v1095_v52, %v1094_v48  ;;  %v1112_v57 = vrot.slane %v1111_v53, 1 }
 0x362   :  { %v1114_v58 = vmul.f32 0.125, %v1106_v55  ;;  %v1116_v59 = vmul.f32 %v1097_v54, %v1097_v54 }
 0x363   :  { %v1098_v60 = vmul.f32 0.125, %v1096_v56  ;;  %v1113_v61 = vadd.f32 %v1112_v57, %v1111_v53 }
 0x364   :  { %v1118_v62 = vsub.f32 %v1114_v58, %v1116_v59 }
 0x365   :  { %v1115_v63 = vmul.f32 0.125, %v1113_v61  ;;  %v1117_v16 = vmul.f32 %v1098_v60, %v1098_v60 }
 0x366   :  { %v1120_v17 = vmax.f32 %v1118_v62, 0.0 }
 0x367   :  { %v1119_v18 = vsub.f32 %v1115_v63, %v1117_v16 }
 0x368   :  { %v1122_v20 = vadd.f32 1e-05, %v1120_v17 }
 0x369   :  { %v1121_v21 = vmax.f32 %v1119_v18, 0.0 }
 0x36a   :  { %3576 = vrsqrt.f32 %v1122_v20 }
 0x36b   :  { %v1123_v22 = vadd.f32 1e-05, %v1121_v21 }
 0x36d   :  { %3578 = vrsqrt.f32 %v1123_v22 }
 0x377   :  { %v3577_v28 = vpop.eup %3576 }
 0x37a   :  { %v3579_v15 = vpop.eup %3578 }
 0x37b   :  { %v1128_v30 = vcombine.low %v3577_v28, %v3579_v15 }
 0x37d   :  { %v1135_v12 = vrot.slane %v1128_v30, %v4447_v14 }
 0x37f   :  { %v1142_v10 = vrot.slane %v1135_v12, %v4447_v14 }
 0x381   :  { %v1144_v9 = vmul.f32 %v1142_v10, %v1080_v13 }
 0x383   :  { %v1149_v6 = vrot.slane %v1144_v9, %v4452_v11  ;;  %v1153_v7 = vrot.slane %v1144_v9, %v4455_v8 }
 0x385   :  { %v1156_v31 = vmul.f32 %v1149_v6, %v1097_v54  ;;  %v1157_v5 = vmul.f32 %v1153_v7, %v1098_v60  ;;  %v1177_v34 = vmul.f32 %v1149_v6, %v4431_v4  ;;  %v1178_v35 = vmul.f32 %v1153_v7, %v4436_v3 }
 0x387   :  { %v1160_v2 = vcombine.low %v1156_v31, %v1157_v5 }
 0x389   :  { %v1167_v32 = vrot.slane %v1160_v2, %v4447_v14 }
 0x38b   :  { %v1174_v0 = vrot.slane %v1167_v32, %v4447_v14 }
 0x38d   :  { %v1176_v1 = vsub.f32 %v1082_v33, %v1174_v0 }
 0x38f   :  { %v1183_v36 = vrot.slane %v1176_v1, %v4452_v11  ;;  %v1187_v37 = vrot.slane %v1176_v1, %v4455_v8 }
 0x391   :  { %v1190_v38 = vadd.f32 %v1183_v36, %v1177_v34  ;;  %v1191_v39 = vadd.f32 %v1187_v37, %v1178_v35 }
 0x393   :  { %v1192_v40 = vmul.f32 0.1, %v1190_v38  ;;  %v1193_v41 = vmul.f32 0.1, %v1191_v39 }
 0x395   :  { %v1194_v42 = vmax.f32 %v1190_v38, %v1192_v40  ;;  %v1195_v43 = vmax.f32 %v1191_v39, %v1193_v41 }
 0x396   :  { %3981 = dma.done.wait [#allocation13 + $0x2], 2560 }
 0x397   :  { %3982 = vsyncadd [#allocation13 + $0x2], 4294964736  ;;  %v1221_v44 = vpack.c.bf16 %v1195_v43, %v1195_v43  ;;  %v3580_v45 = vld [vmem:[#allocation4 + $0x74] ss:$8 sps:$4 sm:$0xff]   ;;  %v3582_v46 = vld [vmem:[#allocation4 + $0x70] ss:$8 sps:$4 sm:$0xff]   ;;  %v1220_v63 = vpack.c.bf16 %v1194_v42, %v1194_v42 }
 0x398   :  { %1325 = vmatprep.subr.bf16.mxu1 %v3580_v45  ;;  %v3583_v4 = vld [vmem:[#allocation4 + $0x64] ss:$8 sps:$4 sm:$0xff]   ;;  %v3585_v3 = vld [vmem:[#allocation4 + $0x60] ss:$8 sps:$4 sm:$0xff]   ;;  %v3586_v47 = vld [vmem:[#allocation4 + $0x54] ss:$8 sps:$4 sm:$0xff]  }
 0x399   :  { %3215 = vmatprep.mubr.msk.bf16.mxu1 %vm1089_vm1, %v1221_v44  ;;  %1326 = vmatpush1.bf16.msra.mxu1 %v3582_v46  ;;  %v3588_v48 = vld [vmem:[#allocation4 + $0x50] ss:$8 sps:$4 sm:$0xff]   ;;  %v3589_v49 = vld [vmem:[#allocation4 + $0x44] ss:$8 sps:$4 sm:$0xff]   ;;  %v3591_v50 = vld [vmem:[#allocation4 + $0x40] ss:$8 sps:$4 sm:$0xff]  }
 0x39a   :  { %1327 = vmatprep.subr.bf16.mxu1 %v3583_v4  ;;  %v3592_v51 = vld [vmem:[#allocation4 + $0x34] ss:$8 sps:$4 sm:$0xff]   ;;  %v3594_v52 = vld [vmem:[#allocation4 + $0x30] ss:$8 sps:$4 sm:$0xff]   ;;  %v3595_v53 = vld [vmem:[#allocation4 + $0x24] ss:$8 sps:$4 sm:$0xff]  }
 0x39b   :  { %v3597_v54 = vld [vmem:[#allocation4 + $0x20] ss:$8 sps:$4 sm:$0xff]   ;;  %v3598_v55 = vld [vmem:[#allocation4 + $0x14] ss:$8 sps:$4 sm:$0xff]   ;;  %v3600_v56 = vld [vmem:[#allocation4 + $0x10] ss:$8 sps:$4 sm:$0xff]  }
 0x39c   :  { %v3601_v57 = vld [vmem:[#allocation4 + $0x4] ss:$8 sps:$4 sm:$0xff]   ;;  %v3603_v58 = vld [vmem:[#allocation4] ss:$8 sps:$4 sm:$0xff]   ;;  %v3604_v59 = vld [vmem:[#allocation4 + $0x94] ss:$8 sps:$4 sm:$0xff]  }
 0x39d   :  { %1328 = vmatpush1.bf16.msra.mxu1 %v3585_v3  ;;  %v3606_v60 = vld [vmem:[#allocation4 + $0x90] ss:$8 sps:$4 sm:$0xff]   ;;  %v3607_v61 = vld [vmem:[#allocation4 + $0x84] ss:$8 sps:$4 sm:$0xff]   ;;  %v3609_v62 = vld [vmem:[#allocation4 + $0x80] ss:$8 sps:$4 sm:$0xff]  }
 0x39e   :  { %1329 = vmatprep.subr.bf16.mxu1 %v3586_v47 }
 0x3a1   :  { %1330 = vmatpush1.bf16.msra.mxu1 %v3588_v48 }
 0x3a2   :  { %1331 = vmatprep.subr.bf16.mxu1 %v3589_v49 }
 0x3a5   :  { %1332 = vmatpush1.bf16.msra.mxu1 %v3591_v50 }
 0x3a6   :  { %1333 = vmatprep.subr.bf16.mxu1 %v3592_v51 }
 0x3a9   :  { %1334 = vmatpush1.bf16.msra.mxu1 %v3594_v52 }
 0x3aa   :  { %1335 = vmatprep.subr.bf16.mxu1 %v3595_v53 }
 0x3ad   :  { %1336 = vmatpush1.bf16.msra.mxu1 %v3597_v54  ;;  %v1367_v54 = vld [vmem:[#allocation14 + $0x6] ss:$8 sm:$0x3] }
 0x3ae   :  { %1337 = vmatprep.subr.bf16.mxu1 %v3598_v55 }
 0x3b1   :  { %1338 = vmatpush1.bf16.msra.mxu1 %v3600_v56 }
 0x3b2   :  { %1339 = vmatprep.subr.bf16.mxu1 %v3601_v57 }
 0x3b5   :  { %1340 = vmatpush1.bf16.msra.mxu1 %v3603_v58 }
 0x3b6   :  { %1353 = vmatprep.subr.bf16.mxu1 %v3604_v59 }
 0x3b9   :  { %1354 = vmatpush2.bf16.msra.mxu1 %v3606_v60 }
 0x3ba   :  { %1355 = vmatprep.subr.bf16.mxu1 %v3607_v61 }
 0x3bd   :  { %1356 = vmatpush2.bf16.msra.mxu1 %v3609_v62 }
 0x3c0   :  { %1358 = vmatmul.mubr.bf16.vlgmr.msra.gmra.mxu1 %v1220_v63  ;;  %v1369_v63 = vld [vmem:[#allocation14 + $0x7] ss:$8 sm:$0x3] }
 0x480   :  { %v1359_v16 = vpop.f32.mrf.mxu1 }
 0x481   :  { %v1370_v17 = vrot.slane %v1359_v16, 4  ;;  %v1385_v18 = vmul.f32 %v1359_v16, %v1359_v16 }
 0x482   :  { %v1361_v20 = vpop.f32.mrf.mxu1 }
 0x483   :  { %v1371_v21 = vadd.f32 %v1370_v17, %v1359_v16  ;;  %v1387_v22 = vrot.slane %v1385_v18, 4  ;;  %v1376_v23 = vsel %vm1089_vm1, %v1361_v20, 0.0  ;;  %v1386_v24 = vmul.f32 %v1361_v20, %v1361_v20 }
 0x484   :  { %v1377_v25 = vrot.slane %v1376_v23, 4  ;;  %v1363_v26 = vpop.f32.mrf.mxu1 }
 0x485   :  { %v1372_v28 = vrot.slane %v1371_v21, 2  ;;  %v1388_v15 = vadd.f32 %v1387_v22, %v1385_v18  ;;  %v1393_v30 = vsel %vm1089_vm1, %v1386_v24, 0.0 }
 0x486   :  { %v1378_v12 = vadd.f32 %v1377_v25, %v1376_v23  ;;  %v1394_v13 = vrot.slane %v1393_v30, 4  ;;  %v1364_v10 = vpop.f32.mrf.mxu1 }
 0x487   :  { %v1373_v9 = vadd.f32 %v1372_v28, %v1371_v21  ;;  %v1389_v6 = vrot.slane %v1388_v15, 2 }
 0x488   :  { %v1379_v7 = vrot.slane %v1378_v12, 2  ;;  %v1395_v31 = vadd.f32 %v1394_v13, %v1393_v30 }
 0x489   :  { %v1374_v5 = vrot.slane %v1373_v9, 1  ;;  %v1390_v2 = vadd.f32 %v1389_v6, %v1388_v15 }
 0x48a   :  { %v1380_v32 = vadd.f32 %v1379_v7, %v1378_v12  ;;  %v1396_v33 = vrot.slane %v1395_v31, 2 }
 0x48b   :  { %v1375_v0 = vadd.f32 %v1374_v5, %v1373_v9  ;;  %v1391_v1 = vrot.slane %v1390_v2, 1 }
 0x48c   :  { %v1381_v34 = vrot.slane %v1380_v32, 1  ;;  %v1397_v35 = vadd.f32 %v1396_v33, %v1395_v31 }
 0x48d   :  { %v1383_v36 = vmul.f32 0.125, %v1375_v0  ;;  %v1392_v37 = vadd.f32 %v1391_v1, %v1390_v2 }
 0x48e   :  { %v1382_v38 = vadd.f32 %v1381_v34, %v1380_v32  ;;  %v1398_v39 = vrot.slane %v1397_v35, 1 }
 0x48f   :  { %v1400_v40 = vmul.f32 0.125, %v1392_v37  ;;  %v1402_v41 = vmul.f32 %v1383_v36, %v1383_v36 }
 0x490   :  { %v1384_v42 = vmul.f32 0.125, %v1382_v38  ;;  %v1399_v43 = vadd.f32 %v1398_v39, %v1397_v35 }
 0x491   :  { %v1404_v44 = vsub.f32 %v1400_v40, %v1402_v41 }
 0x492   :  { %v1401_v45 = vmul.f32 0.125, %v1399_v43  ;;  %v1403_v46 = vmul.f32 %v1384_v42, %v1384_v42 }
 0x493   :  { %v1406_v4 = vmax.f32 %v1404_v44, 0.0 }
 0x494   :  { %v1405_v3 = vsub.f32 %v1401_v45, %v1403_v46 }
 0x495   :  { %v1408_v47 = vadd.f32 1e-05, %v1406_v4 }
 0x496   :  { %v1407_v48 = vmax.f32 %v1405_v3, 0.0 }
 0x497   :  { %3610 = vrsqrt.f32 %v1408_v47 }
 0x498   :  { %v1409_v49 = vadd.f32 1e-05, %v1407_v48 }
 0x49a   :  { %3612 = vrsqrt.f32 %v1409_v49 }
 0x4a4   :  { %v3611_v50 = vpop.eup %3610 }
 0x4a7   :  { %v3613_v51 = vpop.eup %3612 }
 0x4a8   :  { %v1414_v52 = vcombine.low %v3611_v50, %v3613_v51 }
 0x4aa   :  { %v1421_v53 = vrot.slane %v1414_v52, %v4447_v14 }
 0x4ac   :  { %v1428_v55 = vrot.slane %v1421_v53, %v4447_v14 }
 0x4ae   :  { %v1430_v56 = vmul.f32 %v1428_v55, %v1367_v54 }
 0x4b0   :  { %v1435_v57 = vrot.slane %v1430_v56, %v4452_v11  ;;  %v1439_v58 = vrot.slane %v1430_v56, %v4455_v8 }
 0x4b2   :  { %v1442_v59 = vmul.f32 %v1435_v57, %v1383_v36  ;;  %v1443_v60 = vmul.f32 %v1439_v58, %v1384_v42  ;;  %v1463_v21 = vmul.f32 %v1435_v57, %v1359_v16  ;;  %v1464_v22 = vmul.f32 %v1439_v58, %v1361_v20 }
 0x4b4   :  { %v1446_v61 = vcombine.low %v1442_v59, %v1443_v60 }
 0x4b6   :  { %v1453_v62 = vrot.slane %v1446_v61, %v4447_v14 }
 0x4b8   :  { %v1460_v17 = vrot.slane %v1453_v62, %v4447_v14 }
 0x4ba   :  { %v1462_v18 = vsub.f32 %v1369_v63, %v1460_v17 }
 0x4bc   :  { %v1469_v23 = vrot.slane %v1462_v18, %v4452_v11  ;;  %v1473_v24 = vrot.slane %v1462_v18, %v4455_v8 }
 0x4be   :  { %v1476_v25 = vadd.f32 %v1469_v23, %v1463_v21  ;;  %v1477_v26 = vadd.f32 %v1473_v24, %v1464_v22 }
 0x4c0   :  { %v1478_v28 = vmul.f32 0.1, %v1476_v25  ;;  %v1479_v15 = vmul.f32 0.1, %v1477_v26 }
 0x4c2   :  { %v1480_v30 = vmax.f32 %v1476_v25, %v1478_v28  ;;  %v1481_v12 = vmax.f32 %v1477_v26, %v1479_v15 }
 0x4c3   :  { %3983 = dma.done.wait [#allocation13 + $0x3], 1280 }
 0x4c4   :  { %3984 = vsyncadd [#allocation13 + $0x3], 4294966016  ;;  %1570 = vmatprep.subr.bf16.mxu0 %v4016_v29  ;;  %v1506_v13 = vpack.c.bf16 %v1481_v12, %v1481_v12  ;;  %v3614_v10 = vld [vmem:[#allocation5 + $0x38] sm:$0xff]   ;;  %v3615_v16 = vld [vmem:[#allocation5 + $0x30] sm:$0xff]   ;;  %v1505_v33 = vpack.c.bf16 %v1480_v30, %v1480_v30 }
 0x4c5   :  { %1571 = vmatpush1.bf16.msra.mxu0 %v3614_v10  ;;  %v3616_v20 = vld [vmem:[#allocation5 + $0x28] sm:$0xff]   ;;  %v3617_v9 = vld [vmem:[#allocation5 + $0x20] sm:$0xff]   ;;  %v3618_v6 = vld [vmem:[#allocation5 + $0x18] sm:$0xff]  }
 0x4c6   :  { %3226 = vmatprep.mubr.msk.bf16.mxu0 %vm1089_vm1, %v1506_v13  ;;  %1572 = vmatprep.subr.bf16.mxu0 %v4016_v29  ;;  %v3619_v7 = vld [vmem:[#allocation5 + $0x10] sm:$0xff]   ;;  %v3620_v31 = vld [vmem:[#allocation5 + $0x8] sm:$0xff]   ;;  %v3621_v5 = vld [vmem:[#allocation5] sm:$0xff]  }
 0x4c7   :  { %v3622_v2 = vld [vmem:[#allocation5 + $0x48] sm:$0xff]   ;;  %v3623_v32 = vld [vmem:[#allocation5 + $0x40] sm:$0xff]  }
 0x4c8   :  { %v1610_v55 = vld [vmem:[#allocation14 + $0x28] ss:$0 sm:$0xff]  ;;  %v1611_v58 = vld [vmem:[#allocation14 + $0x29] ss:$0 sm:$0xff] }
 0x4c9   :  { %1573 = vmatpush1.bf16.msra.mxu0 %v3615_v16 }
 0x4ca   :  { %1574 = vmatprep.subr.bf16.mxu0 %v4016_v29 }
 0x4cd   :  { %1575 = vmatpush1.bf16.msra.mxu0 %v3616_v20 }
 0x4ce   :  { %1576 = vmatprep.subr.bf16.mxu0 %v4016_v29 }
 0x4d1   :  { %1577 = vmatpush1.bf16.msra.mxu0 %v3617_v9 }
 0x4d2   :  { %1578 = vmatprep.subr.bf16.mxu0 %v4016_v29 }
 0x4d5   :  { %1579 = vmatpush1.bf16.msra.mxu0 %v3618_v6 }
 0x4d6   :  { %1580 = vmatprep.subr.bf16.mxu0 %v4016_v29 }
 0x4d9   :  { %1581 = vmatpush1.bf16.msra.mxu0 %v3619_v7 }
 0x4da   :  { %1582 = vmatprep.subr.bf16.mxu0 %v4016_v29 }
 0x4dd   :  { %1583 = vmatpush1.bf16.msra.mxu0 %v3620_v31 }
 0x4de   :  { %1584 = vmatprep.subr.bf16.mxu0 %v4016_v29 }
 0x4e1   :  { %1585 = vmatpush1.bf16.msra.mxu0 %v3621_v5 }
 0x4e2   :  { %1598 = vmatprep.subr.bf16.mxu0 %v4016_v29 }
 0x4e5   :  { %1599 = vmatpush2.bf16.msra.mxu0 %v3622_v2 }
 0x4e6   :  { %1600 = vmatprep.subr.bf16.mxu0 %v4016_v29 }
 0x4e9   :  { %1601 = vmatpush2.bf16.msra.mxu0 %v3623_v32 }
 0x4ec   :  { %1603 = vmatmul.mubr.bf16.vlgmr.msra.gmra.mxu0 %v1505_v33 }
 0x5ac   :  { %v1604_v0 = vpop.f32.mrf.mxu0 }
 0x5ad   :  { %v1612_v1 = vsel %vm1089_vm1, %v1604_v0, 0.0  ;;  %v1620_v34 = vmul.f32 %v1604_v0, %v1604_v0 }
 0x5ae   :  { %v1613_v35 = vrot.slane %v1612_v1, 4  ;;  %v1606_v36 = vpop.f32.mrf.mxu0 }
 0x5af   :  { %v1621_v37 = vsel %vm1089_vm1, %v1620_v34, 0.0 }
 0x5b0   :  { %v1614_v38 = vadd.f32 %v1613_v35, %v1612_v1  ;;  %v1622_v39 = vrot.slane %v1621_v37, 4  ;;  %v1607_v40 = vpop.f32.mrf.mxu0 }
 0x5b2   :  { %v1615_v41 = vrot.slane %v1614_v38, 2  ;;  %v1623_v42 = vadd.f32 %v1622_v39, %v1621_v37  ;;  %v1608_v43 = vpop.f32.mrf.mxu0 }
 0x5b4   :  { %v1616_v44 = vadd.f32 %v1615_v41, %v1614_v38  ;;  %v1624_v45 = vrot.slane %v1623_v42, 2 }
 0x5b6   :  { %v1617_v46 = vrot.slane %v1616_v44, 1  ;;  %v1625_v4 = vadd.f32 %v1624_v45, %v1623_v42 }
 0x5b8   :  { %v1618_v3 = vadd.f32 %v1617_v46, %v1616_v44  ;;  %v1626_v47 = vrot.slane %v1625_v4, 1 }
 0x5ba   :  { %v1619_v48 = vmul.f32 0.125, %v1618_v3  ;;  %v1627_v49 = vadd.f32 %v1626_v47, %v1625_v4 }
 0x5bc   :  { %v1628_v50 = vmul.f32 0.125, %v1627_v49  ;;  %v1629_v51 = vmul.f32 %v1619_v48, %v1619_v48 }
 0x5be   :  { %v1630_v52 = vsub.f32 %v1628_v50, %v1629_v51 }
 0x5c0   :  { %v1631_v53 = vmax.f32 %v1630_v52, 0.0 }
 0x5c2   :  { %v1632_v54 = vadd.f32 1e-05, %v1631_v53 }
 0x5c4   :  { %3624 = vrsqrt.f32 %v1632_v54 }
 0x5d1   :  { %v3625_v56 = vpop.eup %3624 }
 0x5d2   :  { %v1634_v57 = vmul.f32 %v3625_v56, %v1610_v55 }
 0x5d4   :  { %v1635_v59 = vmul.f32 %v1634_v57, %v1619_v48  ;;  %v1637_v61 = vmul.f32 %v1634_v57, %v1604_v0 }
 0x5d6   :  { %v1636_v60 = vsub.f32 %v1611_v58, %v1635_v59 }
 0x5d8   :  { %v1638_v62 = vadd.f32 %v1637_v61, %v1636_v60 }
 0x5da   :  { %v1639_v63 = vmul.f32 0.1, %v1638_v62 }
 0x5dc   :  { %v1640_v17 = vmax.f32 %v1638_v62, %v1639_v63 }
 0x5dd   :  { %3985 = dma.done.wait [#allocation13 + $0x4], 256 }
 0x5de   :  { %3986 = vsyncadd [#allocation13 + $0x4], 4294967040  ;;  %3453 = vmatprep.subr.bf16.mxu1 %v4008_v19  ;;  %3457 = vmatprep.mubr.msk.bf16.mxu1 %vm4009_vm0, %v4008_v19  ;;  %v3626_v18 = vld [vmem:[#allocation6 + $0x8] sm:$0xff]   ;;  %v3627_v21 = vld [vmem:[#allocation6] sm:$0xff]   ;;  %v1649_v22 = vpack.c.bf16 %v1640_v17, %v1640_v17  ;;  %vm1707_vm2 = vcmask 130048  }
 0x5df   :  { %3454 = vmatpush3.bf16.msra.mxu1 %v3626_v18  ;;  %v1705_v37 = vld [vmem:[#allocation14 + $0x2a] ss:$0 sm:$0xff]  ;;  %v1706_v40 = vld [vmem:[#allocation14 + $0x2b] ss:$0 sm:$0xff] }
 0x5e0   :  { %3455 = vmatprep.subr.bf16.mxu1 %v4008_v19 }
 0x5e3   :  { %3456 = vmatpush3.bf16.msra.mxu1 %v3627_v21 }
 0x5e6   :  { %3458 = vmatmul.mubr.msk.bf16.vlgmr.msra.gmra.mxu1 %vm1089_vm1, %v1649_v22 }
 0x6a6   :  { %v1699_v23 = vpop.f32.mrf.mxu1 }
 0x6a7   :  { %v1708_v24 = vsel %vm1707_vm2, %v1699_v23, 0.0  ;;  %v1716_v25 = vmul.f32 %v1699_v23, %v1699_v23 }
 0x6a8   :  { %v1709_v26 = vrot.slane %v1708_v24, 4  ;;  %v3459_v28 = vpop.f32.mrf.mxu1 }
 0x6a9   :  { %v1717_v15 = vsel %vm1707_vm2, %v1716_v25, 0.0 }
 0x6aa   :  { %v1710_v30 = vadd.f32 %v1709_v26, %v1708_v24  ;;  %v1718_v12 = vrot.slane %v1717_v15, 4  ;;  %v1702_v13 = vpop.f32.mrf.mxu1 }
 0x6ac   :  { %v1711_v10 = vrot.slane %v1710_v30, 2  ;;  %v1719_v16 = vadd.f32 %v1718_v12, %v1717_v15  ;;  %v3460_v20 = vpop.f32.mrf.mxu1 }
 0x6ae   :  { %v1712_v9 = vadd.f32 %v1711_v10, %v1710_v30  ;;  %v1720_v6 = vrot.slane %v1719_v16, 2 }
 0x6b0   :  { %v1713_v7 = vrot.slane %v1712_v9, 1  ;;  %v1721_v31 = vadd.f32 %v1720_v6, %v1719_v16 }
 0x6b2   :  { %v1714_v5 = vadd.f32 %v1713_v7, %v1712_v9  ;;  %v1722_v2 = vrot.slane %v1721_v31, 1 }
 0x6b4   :  { %v1715_v32 = vmul.f32 0.125, %v1714_v5  ;;  %v1723_v33 = vadd.f32 %v1722_v2, %v1721_v31 }
 0x6b6   :  { %v1724_v0 = vmul.f32 0.125, %v1723_v33  ;;  %v1725_v1 = vmul.f32 %v1715_v32, %v1715_v32 }
 0x6b8   :  { %v1726_v34 = vsub.f32 %v1724_v0, %v1725_v1 }
 0x6ba   :  { %v1727_v35 = vmax.f32 %v1726_v34, 0.0 }
 0x6bc   :  { %v1728_v36 = vadd.f32 1e-05, %v1727_v35 }
 0x6be   :  { %3628 = vrsqrt.f32 %v1728_v36 }
 0x6cb   :  { %v3629_v38 = vpop.eup %3628 }
 0x6cc   :  { %v1730_v39 = vmul.f32 %v3629_v38, %v1705_v37 }
 0x6ce   :  { %v1731_v41 = vmul.f32 %v1730_v39, %v1715_v32  ;;  %v1733_v43 = vmul.f32 %v1730_v39, %v1699_v23 }
 0x6d0   :  { %v1732_v42 = vsub.f32 %v1706_v40, %v1731_v41 }
 0x6d2   :  { %v1734_v44 = vadd.f32 %v1733_v43, %v1732_v42 }
 0x6d4   :  { %1735 = vst.msk [vmem:[#allocation17] sm:$0xff] %vm1707_vm2, %v1734_v44 }
 0x6d5   :  { %3987 = dma.done.wait [#allocation13 + $0x5], 128 }
 0x6d6   :  { %3988 = vsyncadd [#allocation13 + $0x5], 4294967168  ;;  %3461 = vmatprep.subr.bf16.mxu1 %v4008_v19  ;;  %3463 = vmatprep.mubr.msk.bf16.mxu1 %vm4009_vm0, %v4008_v19  ;;  %v3630_v45 = vld [vmem:[#allocation7] sm:$0xff]   ;;  %v1742_v46 = vpack.c.bf16 %v1734_v44, %v1734_v44 }
 0x6d7   :  { %3462 = vmatpush3.bf16.msra.mxu1 %v3630_v45  ;;  %v1792_v25 = vld [vmem:[#allocation14 + $0x2c] ss:$0 sm:$0xff]  ;;  %v1793_v15 = vld [vmem:[#allocation14 + $0x2d] ss:$0 sm:$0xff] }
 0x6da   :  { %3464 = vmatmul.mubr.msk.bf16.vlgmr.msra.gmra.mxu1 %vm1707_vm2, %v1742_v46 }
 0x79a   :  { %v1786_v4 = vpop.f32.mrf.mxu1 }
 0x79b   :  { %v1794_v3 = vsel %vm1089_vm1, %v1786_v4, 0.0  ;;  %v1802_v47 = vmul.f32 %v1786_v4, %v1786_v4 }
 0x79c   :  { %v1795_v48 = vrot.slane %v1794_v3, 4  ;;  %v3465_v49 = vpop.f32.mrf.mxu1 }
 0x79d   :  { %v1803_v50 = vsel %vm1089_vm1, %v1802_v47, 0.0 }
 0x79e   :  { %v1796_v51 = vadd.f32 %v1795_v48, %v1794_v3  ;;  %v1804_v52 = vrot.slane %v1803_v50, 4  ;;  %v1789_v53 = vpop.f32.mrf.mxu1 }
 0x7a0   :  { %v1797_v54 = vrot.slane %v1796_v51, 2  ;;  %v1805_v55 = vadd.f32 %v1804_v52, %v1803_v50  ;;  %v3466_v56 = vpop.f32.mrf.mxu1 }
 0x7a2   :  { %v1798_v57 = vadd.f32 %v1797_v54, %v1796_v51  ;;  %v1806_v58 = vrot.slane %v1805_v55, 2 }
 0x7a4   :  { %v1799_v59 = vrot.slane %v1798_v57, 1  ;;  %v1807_v60 = vadd.f32 %v1806_v58, %v1805_v55 }
 0x7a6   :  { %v1800_v61 = vadd.f32 %v1799_v59, %v1798_v57  ;;  %v1808_v62 = vrot.slane %v1807_v60, 1 }
 0x7a8   :  { %v1801_v63 = vmul.f32 0.125, %v1800_v61  ;;  %v1809_v17 = vadd.f32 %v1808_v62, %v1807_v60 }
 0x7aa   :  { %v1810_v18 = vmul.f32 0.125, %v1809_v17  ;;  %v1811_v21 = vmul.f32 %v1801_v63, %v1801_v63 }
 0x7ac   :  { %v1812_v22 = vsub.f32 %v1810_v18, %v1811_v21 }
 0x7ae   :  { %v1813_v23 = vmax.f32 %v1812_v22, 0.0 }
 0x7b0   :  { %v1814_v24 = vadd.f32 1e-05, %v1813_v23 }
 0x7b2   :  { %3631 = vrsqrt.f32 %v1814_v24 }
 0x7bf   :  { %v3632_v26 = vpop.eup %3631 }
 0x7c0   :  { %v1816_v28 = vmul.f32 %v3632_v26, %v1792_v25 }
 0x7c2   :  { %v1817_v30 = vmul.f32 %v1816_v28, %v1801_v63  ;;  %v1819_v13 = vmul.f32 %v1816_v28, %v1786_v4 }
 0x7c4   :  { %v1818_v12 = vsub.f32 %v1793_v15, %v1817_v30 }
 0x7c6   :  { %v1820_v10 = vadd.f32 %v1819_v13, %v1818_v12 }
 0x7c8   :  { %v1821_v16 = vmax.f32 %v1820_v10, 0.0 }
 0x7c9   :  { %3989 = dma.done.wait [#allocation13 + $0x6], 512 }
 0x7ca   :  { %3990 = vsyncadd [#allocation13 + $0x6], 4294966784  ;;  %1885 = vmatprep.mubr.bf16.mxu1 %v4016_v29  ;;  %v3633_v20 = vld [vmem:[#allocation8 + $0x14] ss:$8 sps:$4 sm:$0xff]   ;;  %v3635_v9 = vld [vmem:[#allocation8 + $0x10] ss:$8 sps:$4 sm:$0xff]   ;;  %v1829_v31 = vpack.c.bf16 %v1821_v16, %v1821_v16 }
 0x7cb   :  { %1865 = vmatprep.subr.bf16.mxu1 %v3633_v20  ;;  %v3636_v6 = vld [vmem:[#allocation8 + $0x4] ss:$8 sps:$4 sm:$0xff]   ;;  %v3638_v7 = vld [vmem:[#allocation8] ss:$8 sps:$4 sm:$0xff]  }
 0x7cc   :  { %1866 = vmatpush1.bf16.msra.mxu1 %v3635_v9  ;;  %v1895_v30 = vld [vmem:[#allocation14 + $0x2e] ss:$8 sm:$0x3] }
 0x7cd   :  { %1867 = vmatprep.subr.bf16.mxu1 %v3636_v6 }
 0x7d0   :  { %1868 = vmatpush1.bf16.msra.mxu1 %v3638_v7 }
 0x7d3   :  { %3236 = vmatmul.mubr.msk.bf16.vlgmr.msra.gmra.mxu1 %vm1089_vm1, %v1829_v31  ;;  %v1897_v31 = vld [vmem:[#allocation14 + $0x2f] ss:$8 sm:$0x3] }
 0x893   :  { %v1887_v5 = vpop.f32.mrf.mxu1 }
 0x894   :  { %v1898_v2 = vrot.slane %v1887_v5, 4  ;;  %v1913_v32 = vmul.f32 %v1887_v5, %v1887_v5 }
 0x895   :  { %v1889_v33 = vpop.f32.mrf.mxu1 }
 0x896   :  { %v1899_v0 = vadd.f32 %v1898_v2, %v1887_v5  ;;  %v1915_v1 = vrot.slane %v1913_v32, 4  ;;  %v1904_v34 = vsel %vm1089_vm1, %v1889_v33, 0.0  ;;  %v1914_v35 = vmul.f32 %v1889_v33, %v1889_v33 }
 0x897   :  { %v1905_v36 = vrot.slane %v1904_v34, 4  ;;  %v1891_v37 = vpop.f32.mrf.mxu1 }
 0x898   :  { %v1900_v38 = vrot.slane %v1899_v0, 2  ;;  %v1916_v39 = vadd.f32 %v1915_v1, %v1913_v32  ;;  %v1921_v40 = vsel %vm1089_vm1, %v1914_v35, 0.0 }
 0x899   :  { %v1906_v41 = vadd.f32 %v1905_v36, %v1904_v34  ;;  %v1922_v42 = vrot.slane %v1921_v40, 4  ;;  %v1892_v43 = vpop.f32.mrf.mxu1 }
 0x89a   :  { %v1901_v44 = vadd.f32 %v1900_v38, %v1899_v0  ;;  %v1917_v45 = vrot.slane %v1916_v39, 2 }
 0x89b   :  { %v1907_v46 = vrot.slane %v1906_v41, 2  ;;  %v1923_v4 = vadd.f32 %v1922_v42, %v1921_v40 }
 0x89c   :  { %v1902_v3 = vrot.slane %v1901_v44, 1  ;;  %v1918_v47 = vadd.f32 %v1917_v45, %v1916_v39 }
 0x89d   :  { %v1908_v48 = vadd.f32 %v1907_v46, %v1906_v41  ;;  %v1924_v49 = vrot.slane %v1923_v4, 2 }
 0x89e   :  { %v1903_v50 = vadd.f32 %v1902_v3, %v1901_v44  ;;  %v1919_v51 = vrot.slane %v1918_v47, 1 }
 0x89f   :  { %v1909_v52 = vrot.slane %v1908_v48, 1  ;;  %v1925_v53 = vadd.f32 %v1924_v49, %v1923_v4 }
 0x8a0   :  { %v1911_v54 = vmul.f32 0.125, %v1903_v50  ;;  %v1920_v55 = vadd.f32 %v1919_v51, %v1918_v47 }
 0x8a1   :  { %v1910_v56 = vadd.f32 %v1909_v52, %v1908_v48  ;;  %v1926_v57 = vrot.slane %v1925_v53, 1 }
 0x8a2   :  { %v1928_v58 = vmul.f32 0.125, %v1920_v55  ;;  %v1930_v59 = vmul.f32 %v1911_v54, %v1911_v54 }
 0x8a3   :  { %v1912_v60 = vmul.f32 0.125, %v1910_v56  ;;  %v1927_v61 = vadd.f32 %v1926_v57, %v1925_v53 }
 0x8a4   :  { %v1932_v62 = vsub.f32 %v1928_v58, %v1930_v59 }
 0x8a5   :  { %v1929_v63 = vmul.f32 0.125, %v1927_v61  ;;  %v1931_v17 = vmul.f32 %v1912_v60, %v1912_v60 }
 0x8a6   :  { %v1934_v18 = vmax.f32 %v1932_v62, 0.0 }
 0x8a7   :  { %v1933_v21 = vsub.f32 %v1929_v63, %v1931_v17 }
 0x8a8   :  { %v1936_v22 = vadd.f32 1e-05, %v1934_v18 }
 0x8a9   :  { %v1935_v23 = vmax.f32 %v1933_v21, 0.0 }
 0x8aa   :  { %3639 = vrsqrt.f32 %v1936_v22 }
 0x8ab   :  { %v1937_v24 = vadd.f32 1e-05, %v1935_v23 }
 0x8ad   :  { %3641 = vrsqrt.f32 %v1937_v24 }
 0x8b7   :  { %v3640_v25 = vpop.eup %3639 }
 0x8ba   :  { %v3642_v26 = vpop.eup %3641 }
 0x8bb   :  { %v1942_v28 = vcombine.low %v3640_v25, %v3642_v26 }
 0x8bd   :  { %v1949_v15 = vrot.slane %v1942_v28, %v4447_v14 }
 0x8bf   :  { %v1956_v12 = vrot.slane %v1949_v15, %v4447_v14 }
 0x8c1   :  { %v1958_v13 = vmul.f32 %v1956_v12, %v1895_v30 }
 0x8c3   :  { %v1963_v10 = vrot.slane %v1958_v13, %v4452_v11  ;;  %v1967_v16 = vrot.slane %v1958_v13, %v4455_v8 }
 0x8c5   :  { %v1970_v20 = vmul.f32 %v1963_v10, %v1911_v54  ;;  %v1971_v9 = vmul.f32 %v1967_v16, %v1912_v60  ;;  %v1991_v0 = vmul.f32 %v1963_v10, %v1887_v5  ;;  %v1992_v1 = vmul.f32 %v1967_v16, %v1889_v33 }
 0x8c7   :  { %v1974_v6 = vcombine.low %v1970_v20, %v1971_v9 }
 0x8c9   :  { %v1981_v7 = vrot.slane %v1974_v6, %v4447_v14 }
 0x8cb   :  { %v1988_v2 = vrot.slane %v1981_v7, %v4447_v14 }
 0x8cd   :  { %v1990_v32 = vsub.f32 %v1897_v31, %v1988_v2 }
 0x8cf   :  { %v1997_v34 = vrot.slane %v1990_v32, %v4452_v11  ;;  %v2001_v35 = vrot.slane %v1990_v32, %v4455_v8 }
 0x8d1   :  { %v2004_v36 = vadd.f32 %v1997_v34, %v1991_v0  ;;  %v2005_v37 = vadd.f32 %v2001_v35, %v1992_v1 }
 0x8d3   :  { %v2006_v38 = vmax.f32 %v2004_v36, 0.0  ;;  %v2007_v39 = vmax.f32 %v2005_v37, 0.0 }
 0x8d4   :  { %3991 = dma.done.wait [#allocation13 + $0x7], 2560 }
 0x8d5   :  { %3992 = vsyncadd [#allocation13 + $0x7], 4294964736  ;;  %v2031_v40 = vpack.c.bf16 %v2007_v39, %v2007_v39  ;;  %v3643_v41 = vld [vmem:[#allocation9 + $0x74] ss:$8 sps:$4 sm:$0xff]   ;;  %v3645_v42 = vld [vmem:[#allocation9 + $0x70] ss:$8 sps:$4 sm:$0xff]   ;;  %v2030_v57 = vpack.c.bf16 %v2006_v38, %v2006_v38 }
 0x8d6   :  { %2135 = vmatprep.subr.bf16.mxu1 %v3643_v41  ;;  %v3646_v43 = vld [vmem:[#allocation9 + $0x64] ss:$8 sps:$4 sm:$0xff]   ;;  %v3648_v5 = vld [vmem:[#allocation9 + $0x60] ss:$8 sps:$4 sm:$0xff]   ;;  %v3649_v33 = vld [vmem:[#allocation9 + $0x54] ss:$8 sps:$4 sm:$0xff]  }
 0x8d7   :  { %3257 = vmatprep.mubr.msk.bf16.mxu1 %vm1089_vm1, %v2031_v40  ;;  %2136 = vmatpush1.bf16.msra.mxu1 %v3645_v42  ;;  %v3651_v44 = vld [vmem:[#allocation9 + $0x50] ss:$8 sps:$4 sm:$0xff]   ;;  %v3652_v45 = vld [vmem:[#allocation9 + $0x44] ss:$8 sps:$4 sm:$0xff]   ;;  %v3654_v46 = vld [vmem:[#allocation9 + $0x40] ss:$8 sps:$4 sm:$0xff]  }
 0x8d8   :  { %2137 = vmatprep.subr.bf16.mxu1 %v3646_v43  ;;  %v3655_v4 = vld [vmem:[#allocation9 + $0x34] ss:$8 sps:$4 sm:$0xff]   ;;  %v3657_v3 = vld [vmem:[#allocation9 + $0x30] ss:$8 sps:$4 sm:$0xff]   ;;  %v3658_v47 = vld [vmem:[#allocation9 + $0x24] ss:$8 sps:$4 sm:$0xff]  }
 0x8d9   :  { %v3660_v48 = vld [vmem:[#allocation9 + $0x20] ss:$8 sps:$4 sm:$0xff]   ;;  %v3661_v49 = vld [vmem:[#allocation9 + $0x14] ss:$8 sps:$4 sm:$0xff]   ;;  %v3663_v50 = vld [vmem:[#allocation9 + $0x10] ss:$8 sps:$4 sm:$0xff]  }
 0x8da   :  { %v3664_v51 = vld [vmem:[#allocation9 + $0x4] ss:$8 sps:$4 sm:$0xff]   ;;  %v3666_v52 = vld [vmem:[#allocation9] ss:$8 sps:$4 sm:$0xff]   ;;  %v3667_v53 = vld [vmem:[#allocation9 + $0x94] ss:$8 sps:$4 sm:$0xff]  }
 0x8db   :  { %2138 = vmatpush1.bf16.msra.mxu1 %v3648_v5  ;;  %v3669_v54 = vld [vmem:[#allocation9 + $0x90] ss:$8 sps:$4 sm:$0xff]   ;;  %v3670_v55 = vld [vmem:[#allocation9 + $0x84] ss:$8 sps:$4 sm:$0xff]   ;;  %v3672_v56 = vld [vmem:[#allocation9 + $0x80] ss:$8 sps:$4 sm:$0xff]  }
 0x8dc   :  { %2139 = vmatprep.subr.bf16.mxu1 %v3649_v33 }
 0x8df   :  { %2140 = vmatpush1.bf16.msra.mxu1 %v3651_v44 }
 0x8e0   :  { %2141 = vmatprep.subr.bf16.mxu1 %v3652_v45 }
 0x8e3   :  { %2142 = vmatpush1.bf16.msra.mxu1 %v3654_v46 }
 0x8e4   :  { %2143 = vmatprep.subr.bf16.mxu1 %v3655_v4 }
 0x8e7   :  { %2144 = vmatpush1.bf16.msra.mxu1 %v3657_v3 }
 0x8e8   :  { %2145 = vmatprep.subr.bf16.mxu1 %v3658_v47 }
 0x8eb   :  { %2146 = vmatpush1.bf16.msra.mxu1 %v3660_v48  ;;  %v2177_v48 = vld [vmem:[#allocation14 + $0x50] ss:$8 sm:$0x3] }
 0x8ec   :  { %2147 = vmatprep.subr.bf16.mxu1 %v3661_v49 }
 0x8ef   :  { %2148 = vmatpush1.bf16.msra.mxu1 %v3663_v50 }
 0x8f0   :  { %2149 = vmatprep.subr.bf16.mxu1 %v3664_v51 }
 0x8f3   :  { %2150 = vmatpush1.bf16.msra.mxu1 %v3666_v52 }
 0x8f4   :  { %2163 = vmatprep.subr.bf16.mxu1 %v3667_v53 }
 0x8f7   :  { %2164 = vmatpush2.bf16.msra.mxu1 %v3669_v54 }
 0x8f8   :  { %2165 = vmatprep.subr.bf16.mxu1 %v3670_v55 }
 0x8fb   :  { %2166 = vmatpush2.bf16.msra.mxu1 %v3672_v56 }
 0x8fe   :  { %2168 = vmatmul.mubr.bf16.vlgmr.msra.gmra.mxu1 %v2030_v57  ;;  %v2179_v57 = vld [vmem:[#allocation14 + $0x51] ss:$8 sm:$0x3] }
 0x9be   :  { %v2169_v58 = vpop.f32.mrf.mxu1 }
 0x9bf   :  { %v2180_v59 = vrot.slane %v2169_v58, 4  ;;  %v2195_v60 = vmul.f32 %v2169_v58, %v2169_v58 }
 0x9c0   :  { %v2171_v61 = vpop.f32.mrf.mxu1 }
 0x9c1   :  { %v2181_v62 = vadd.f32 %v2180_v59, %v2169_v58  ;;  %v2197_v63 = vrot.slane %v2195_v60, 4  ;;  %v2186_v17 = vsel %vm1089_vm1, %v2171_v61, 0.0  ;;  %v2196_v18 = vmul.f32 %v2171_v61, %v2171_v61 }
 0x9c2   :  { %v2187_v21 = vrot.slane %v2186_v17, 4  ;;  %v2173_v22 = vpop.f32.mrf.mxu1 }
 0x9c3   :  { %v2182_v23 = vrot.slane %v2181_v62, 2  ;;  %v2198_v24 = vadd.f32 %v2197_v63, %v2195_v60  ;;  %v2203_v25 = vsel %vm1089_vm1, %v2196_v18, 0.0 }
 0x9c4   :  { %v2188_v26 = vadd.f32 %v2187_v21, %v2186_v17  ;;  %v2204_v28 = vrot.slane %v2203_v25, 4  ;;  %v2174_v15 = vpop.f32.mrf.mxu1 }
 0x9c5   :  { %v2183_v30 = vadd.f32 %v2182_v23, %v2181_v62  ;;  %v2199_v12 = vrot.slane %v2198_v24, 2 }
 0x9c6   :  { %v2189_v13 = vrot.slane %v2188_v26, 2  ;;  %v2205_v10 = vadd.f32 %v2204_v28, %v2203_v25 }
 0x9c7   :  { %v2184_v16 = vrot.slane %v2183_v30, 1  ;;  %v2200_v20 = vadd.f32 %v2199_v12, %v2198_v24 }
 0x9c8   :  { %v2190_v9 = vadd.f32 %v2189_v13, %v2188_v26  ;;  %v2206_v6 = vrot.slane %v2205_v10, 2 }
 0x9c9   :  { %v2185_v7 = vadd.f32 %v2184_v16, %v2183_v30  ;;  %v2201_v31 = vrot.slane %v2200_v20, 1 }
 0x9ca   :  { %v2191_v2 = vrot.slane %v2190_v9, 1  ;;  %v2207_v32 = vadd.f32 %v2206_v6, %v2205_v10 }
 0x9cb   :  { %v2193_v0 = vmul.f32 0.125, %v2185_v7  ;;  %v2202_v1 = vadd.f32 %v2201_v31, %v2200_v20 }
 0x9cc   :  { %v2192_v34 = vadd.f32 %v2191_v2, %v2190_v9  ;;  %v2208_v35 = vrot.slane %v2207_v32, 1 }
 0x9cd   :  { %v2210_v36 = vmul.f32 0.125, %v2202_v1  ;;  %v2212_v37 = vmul.f32 %v2193_v0, %v2193_v0 }
 0x9ce   :  { %v2194_v38 = vmul.f32 0.125, %v2192_v34  ;;  %v2209_v39 = vadd.f32 %v2208_v35, %v2207_v32 }
 0x9cf   :  { %v2214_v40 = vsub.f32 %v2210_v36, %v2212_v37 }
 0x9d0   :  { %v2211_v41 = vmul.f32 0.125, %v2209_v39  ;;  %v2213_v42 = vmul.f32 %v2194_v38, %v2194_v38 }
 0x9d1   :  { %v2216_v43 = vmax.f32 %v2214_v40, 0.0 }
 0x9d2   :  { %v2215_v5 = vsub.f32 %v2211_v41, %v2213_v42 }
 0x9d3   :  { %v2218_v33 = vadd.f32 1e-05, %v2216_v43 }
 0x9d4   :  { %v2217_v44 = vmax.f32 %v2215_v5, 0.0 }
 0x9d5   :  { %3673 = vrsqrt.f32 %v2218_v33 }
 0x9d6   :  { %v2219_v45 = vadd.f32 1e-05, %v2217_v44 }
 0x9d8   :  { %3675 = vrsqrt.f32 %v2219_v45 }
 0x9e2   :  { %v3674_v46 = vpop.eup %3673 }
 0x9e5   :  { %v3676_v4 = vpop.eup %3675 }
 0x9e6   :  { %v2224_v3 = vcombine.low %v3674_v46, %v3676_v4 }
 0x9e8   :  { %v2231_v47 = vrot.slane %v2224_v3, %v4447_v14 }
 0x9ea   :  { %v2238_v49 = vrot.slane %v2231_v47, %v4447_v14 }
 0x9ec   :  { %v2240_v50 = vmul.f32 %v2238_v49, %v2177_v48 }
 0x9ee   :  { %v2245_v51 = vrot.slane %v2240_v50, %v4452_v11  ;;  %v2249_v52 = vrot.slane %v2240_v50, %v4455_v8 }
 0x9f0   :  { %v2252_v53 = vmul.f32 %v2245_v51, %v2193_v0  ;;  %v2253_v54 = vmul.f32 %v2249_v52, %v2194_v38  ;;  %v2273_v62 = vmul.f32 %v2245_v51, %v2169_v58  ;;  %v2274_v63 = vmul.f32 %v2249_v52, %v2171_v61 }
 0x9f2   :  { %v2256_v55 = vcombine.low %v2252_v53, %v2253_v54 }
 0x9f4   :  { %v2263_v56 = vrot.slane %v2256_v55, %v4447_v14 }
 0x9f6   :  { %v2270_v59 = vrot.slane %v2263_v56, %v4447_v14 }
 0x9f8   :  { %v2272_v60 = vsub.f32 %v2179_v57, %v2270_v59 }
 0x9fa   :  { %v2279_v17 = vrot.slane %v2272_v60, %v4452_v11  ;;  %v2283_v18 = vrot.slane %v2272_v60, %v4455_v8 }
 0x9fc   :  { %v2286_v21 = vadd.f32 %v2279_v17, %v2273_v62  ;;  %v2287_v22 = vadd.f32 %v2283_v18, %v2274_v63 }
 0x9fe   :  { %v2288_v23 = vmax.f32 %v2286_v21, 0.0  ;;  %v2289_v24 = vmax.f32 %v2287_v22, 0.0 }
 0x9ff   :  { %3993 = dma.done.wait [#allocation13 + $0x8], 1280 }
 0xa00   :  { %3994 = vsyncadd [#allocation13 + $0x8], 4294966016  ;;  %2377 = vmatprep.subr.bf16.mxu0 %v4016_v29  ;;  %v2313_v25 = vpack.c.bf16 %v2289_v24, %v2289_v24  ;;  %v3677_v26 = vld [vmem:[#allocation10 + $0x38] sm:$0xff]   ;;  %v3678_v14 = vld [vmem:[#allocation10 + $0x30] sm:$0xff]   ;;  %v2312_v16 = vpack.c.bf16 %v2288_v23, %v2288_v23 }
 0xa01   :  { %2378 = vmatpush1.bf16.msra.mxu0 %v3677_v26  ;;  %v3679_v58 = vld [vmem:[#allocation10 + $0x28] sm:$0xff]   ;;  %v3680_v61 = vld [vmem:[#allocation10 + $0x20] sm:$0xff]   ;;  %v3681_v28 = vld [vmem:[#allocation10 + $0x18] sm:$0xff]  }
 0xa02   :  { %3268 = vmatprep.mubr.msk.bf16.mxu0 %vm1089_vm1, %v2313_v25  ;;  %2379 = vmatprep.subr.bf16.mxu0 %v4016_v29  ;;  %v3682_v15 = vld [vmem:[#allocation10 + $0x10] sm:$0xff]   ;;  %v3683_v30 = vld [vmem:[#allocation10 + $0x8] sm:$0xff]   ;;  %v3684_v12 = vld [vmem:[#allocation10] sm:$0xff]  }
 0xa03   :  { %v3685_v13 = vld [vmem:[#allocation10 + $0x48] sm:$0xff]   ;;  %v3686_v10 = vld [vmem:[#allocation10 + $0x40] sm:$0xff]  }
 0xa04   :  { %v2417_v46 = vld [vmem:[#allocation14 + $0x52] ss:$0 sm:$0xff]  ;;  %v2418_v47 = vld [vmem:[#allocation14 + $0x53] ss:$0 sm:$0xff] }
 0xa05   :  { %2380 = vmatpush1.bf16.msra.mxu0 %v3678_v14 }
 0xa06   :  { %2381 = vmatprep.subr.bf16.mxu0 %v4016_v29 }
 0xa09   :  { %2382 = vmatpush1.bf16.msra.mxu0 %v3679_v58 }
 0xa0a   :  { %2383 = vmatprep.subr.bf16.mxu0 %v4016_v29 }
 0xa0d   :  { %2384 = vmatpush1.bf16.msra.mxu0 %v3680_v61 }
 0xa0e   :  { %2385 = vmatprep.subr.bf16.mxu0 %v4016_v29 }
 0xa11   :  { %2386 = vmatpush1.bf16.msra.mxu0 %v3681_v28 }
 0xa12   :  { %2387 = vmatprep.subr.bf16.mxu0 %v4016_v29 }
 0xa15   :  { %2388 = vmatpush1.bf16.msra.mxu0 %v3682_v15 }
 0xa16   :  { %2389 = vmatprep.subr.bf16.mxu0 %v4016_v29 }
 0xa19   :  { %2390 = vmatpush1.bf16.msra.mxu0 %v3683_v30 }
 0xa1a   :  { %2391 = vmatprep.subr.bf16.mxu0 %v4016_v29 }
 0xa1d   :  { %2392 = vmatpush1.bf16.msra.mxu0 %v3684_v12 }
 0xa1e   :  { %2405 = vmatprep.subr.bf16.mxu0 %v4016_v29 }
 0xa21   :  { %2406 = vmatpush2.bf16.msra.mxu0 %v3685_v13 }
 0xa22   :  { %2407 = vmatprep.subr.bf16.mxu0 %v4016_v29 }
 0xa25   :  { %2408 = vmatpush2.bf16.msra.mxu0 %v3686_v10 }
 0xa28   :  { %2410 = vmatmul.mubr.bf16.vlgmr.msra.gmra.mxu0 %v2312_v16 }
 0xae8   :  { %v2411_v20 = vpop.f32.mrf.mxu0 }
 0xae9   :  { %v2419_v9 = vrot.slane %v2411_v20, 4  ;;  %v2426_v6 = vmul.f32 %v2411_v20, %v2411_v20 }
 0xaea   :  { %v2413_v7 = vpop.f32.mrf.mxu0 }
 0xaeb   :  { %v2420_v31 = vadd.f32 %v2419_v9, %v2411_v20  ;;  %v2427_v2 = vrot.slane %v2426_v6, 4 }
 0xaec   :  { %v2414_v32 = vpop.f32.mrf.mxu0 }
 0xaed   :  { %v2421_v0 = vrot.slane %v2420_v31, 2  ;;  %v2428_v1 = vadd.f32 %v2427_v2, %v2426_v6 }
 0xaee   :  { %v2415_v34 = vpop.f32.mrf.mxu0 }
 0xaef   :  { %v2422_v35 = vadd.f32 %v2421_v0, %v2420_v31  ;;  %v2429_v36 = vrot.slane %v2428_v1, 2 }
 0xaf1   :  { %v2423_v37 = vrot.slane %v2422_v35, 1  ;;  %v2430_v38 = vadd.f32 %v2429_v36, %v2428_v1 }
 0xaf3   :  { %v2424_v39 = vadd.f32 %v2423_v37, %v2422_v35  ;;  %v2431_v40 = vrot.slane %v2430_v38, 1 }
 0xaf5   :  { %v2425_v41 = vmul.f32 0.125, %v2424_v39  ;;  %v2432_v42 = vadd.f32 %v2431_v40, %v2430_v38 }
 0xaf7   :  { %v2433_v43 = vmul.f32 0.125, %v2432_v42  ;;  %v2434_v5 = vmul.f32 %v2425_v41, %v2425_v41 }
 0xaf9   :  { %v2435_v33 = vsub.f32 %v2433_v43, %v2434_v5 }
 0xafb   :  { %v2436_v44 = vmax.f32 %v2435_v33, 0.0 }
 0xafd   :  { %v2437_v45 = vadd.f32 1e-05, %v2436_v44 }
 0xaff   :  { %3687 = vrsqrt.f32 %v2437_v45 }
 0xb0c   :  { %v3688_v4 = vpop.eup %3687 }
 0xb0d   :  { %v2439_v3 = vmul.f32 %v3688_v4, %v2417_v46 }
 0xb0f   :  { %v2440_v48 = vmul.f32 %v2439_v3, %v2425_v41  ;;  %v2442_v50 = vmul.f32 %v2439_v3, %v2411_v20 }
 0xb11   :  { %v2441_v49 = vsub.f32 %v2418_v47, %v2440_v48 }
 0xb13   :  { %v2443_v51 = vadd.f32 %v2442_v50, %v2441_v49 }
 0xb15   :  { %v2444_v52 = vmax.f32 %v2443_v51, 0.0 }
 0xb16   :  { %3995 = dma.done.wait [#allocation13 + $0x9], 1024 }
 0xb17   :  { %3996 = vsyncadd [#allocation13 + $0x9], 4294966272  ;;  %3467 = vmatprep.subr.bf16.mxu1 %v4008_v19  ;;  %3483 = vmatprep.mubr.msk.bf16.mxu1 %vm4009_vm0, %v4008_v19  ;;  %v3689_v53 = vld [vmem:[#allocation11 + $0x38] sm:$0xff]   ;;  %v3690_v54 = vld [vmem:[#allocation11 + $0x30] sm:$0xff]   ;;  %v2463_v63 = vpack.c.bf16 %v2444_v52, %v2444_v52 }
 0xb18   :  { %3468 = vmatpush3.bf16.msra.mxu1 %v3689_v53  ;;  %v3691_v55 = vld [vmem:[#allocation11 + $0x28] sm:$0xff]   ;;  %v3692_v56 = vld [vmem:[#allocation11 + $0x20] sm:$0xff]   ;;  %v3693_v57 = vld [vmem:[#allocation11 + $0x18] sm:$0xff]  }
 0xb19   :  { %3469 = vmatprep.subr.bf16.mxu1 %v4008_v19  ;;  %v3694_v59 = vld [vmem:[#allocation11 + $0x10] sm:$0xff]   ;;  %v3695_v60 = vld [vmem:[#allocation11 + $0x8] sm:$0xff]   ;;  %v3696_v62 = vld [vmem:[#allocation11] sm:$0xff]  }
 0xb1a   :  { %v2552_v2 = vld [vmem:[#allocation14 + $0x54] ss:$0 sm:$0xff]  ;;  %v2553_v1 = vld [vmem:[#allocation14 + $0x55] ss:$0 sm:$0xff] }
 0xb1c   :  { %3470 = vmatpush3.bf16.msra.mxu1 %v3690_v54 }
 0xb1d   :  { %3471 = vmatprep.subr.bf16.mxu1 %v4008_v19 }
 0xb20   :  { %3472 = vmatpush3.bf16.msra.mxu1 %v3691_v55 }
 0xb21   :  { %3473 = vmatprep.subr.bf16.mxu1 %v4008_v19 }
 0xb24   :  { %3474 = vmatpush3.bf16.msra.mxu1 %v3692_v56 }
 0xb25   :  { %3475 = vmatprep.subr.bf16.mxu1 %v4008_v19 }
 0xb28   :  { %3476 = vmatpush3.bf16.msra.mxu1 %v3693_v57 }
 0xb29   :  { %3477 = vmatprep.subr.bf16.mxu1 %v4008_v19 }
 0xb2c   :  { %3478 = vmatpush3.bf16.msra.mxu1 %v3694_v59 }
 0xb2d   :  { %3479 = vmatprep.subr.bf16.mxu1 %v4008_v19 }
 0xb30   :  { %3480 = vmatpush3.bf16.msra.mxu1 %v3695_v60 }
 0xb31   :  { %3481 = vmatprep.subr.bf16.mxu1 %v4008_v19 }
 0xb34   :  { %3482 = vmatpush3.bf16.msra.mxu1 %v3696_v62 }
 0xb37   :  { %3484 = vmatmul.mubr.bf16.vlgmr.msra.gmra.mxu1 %v2463_v63 }
 0xbf7   :  { %v2546_v17 = vpop.f32.mrf.mxu1 }
 0xbf8   :  { %v2554_v18 = vrot.slane %v2546_v17, 4  ;;  %v2561_v21 = vmul.f32 %v2546_v17, %v2546_v17 }
 0xbf9   :  { %v3485_v22 = vpop.f32.mrf.mxu1 }
 0xbfa   :  { %v2555_v23 = vadd.f32 %v2554_v18, %v2546_v17  ;;  %v2562_v24 = vrot.slane %v2561_v21, 4 }
 0xbfb   :  { %v2549_v25 = vpop.f32.mrf.mxu1 }
 0xbfc   :  { %v2556_v26 = vrot.slane %v2555_v23, 2  ;;  %v2563_v14 = vadd.f32 %v2562_v24, %v2561_v21 }
 0xbfd   :  { %v3486_v58 = vpop.f32.mrf.mxu1 }
 0xbfe   :  { %v2557_v61 = vadd.f32 %v2556_v26, %v2555_v23  ;;  %v2564_v28 = vrot.slane %v2563_v14, 2 }
 0xc00   :  { %v2558_v15 = vrot.slane %v2557_v61, 1  ;;  %v2565_v30 = vadd.f32 %v2564_v28, %v2563_v14 }
 0xc02   :  { %v2559_v12 = vadd.f32 %v2558_v15, %v2557_v61  ;;  %v2566_v13 = vrot.slane %v2565_v30, 1 }
 0xc04   :  { %v2560_v10 = vmul.f32 0.125, %v2559_v12  ;;  %v2567_v16 = vadd.f32 %v2566_v13, %v2565_v30 }
 0xc06   :  { %v2568_v20 = vmul.f32 0.125, %v2567_v16  ;;  %v2569_v9 = vmul.f32 %v2560_v10, %v2560_v10 }
 0xc08   :  { %v2570_v6 = vsub.f32 %v2568_v20, %v2569_v9 }
 0xc0a   :  { %v2571_v7 = vmax.f32 %v2570_v6, 0.0 }
 0xc0c   :  { %v2572_v31 = vadd.f32 1e-05, %v2571_v7 }
 0xc0e   :  { %3697 = vrsqrt.f32 %v2572_v31 }
 0xc1b   :  { %v3698_v32 = vpop.eup %3697 }
 0xc1c   :  { %v2574_v0 = vmul.f32 %v3698_v32, %v2552_v2 }
 0xc1e   :  { %v2575_v34 = vmul.f32 %v2574_v0, %v2560_v10  ;;  %v2577_v36 = vmul.f32 %v2574_v0, %v2546_v17 }
 0xc20   :  { %v2576_v35 = vsub.f32 %v2553_v1, %v2575_v34 }
 0xc22   :  { %v2578_v37 = vadd.f32 %v2577_v36, %v2576_v35 }
 0xc24   :  { %v2579_v38 = vmax.f32 %v2578_v37, 0.0 }
 0xc25   :  { %3997 = dma.done.wait [#allocation13 + $0xa], 5120 }
 0xc26   :  { %3998 = vsyncadd [#allocation13 + $0xa], 4294962176  ;;  %2902 = vmatprep.mubr.bf16.mxu0 %v4016_v29  ;;  %2943 = vmatprep.mubr.bf16.mxu1 %v4016_v29  ;;  %v3699_v39 = vld [vmem:[#allocation12 + $0x11c] ss:$20 sps:$4 sm:$0xff]   ;;  %v3701_v40 = vld [vmem:[#allocation12 + $0x118] ss:$20 sps:$4 sm:$0xff]   ;;  %v2631_v18 = vpack.c.bf16 %v2579_v38, %v2579_v38 }
 0xc27   :  { %2870 = vmatprep.subr.bf16.mxu0 %v3699_v39  ;;  %v3702_v41 = vld [vmem:[#allocation12 + $0xf4] ss:$20 sps:$4 sm:$0xff]   ;;  %v3704_v42 = vld [vmem:[#allocation12 + $0xf0] ss:$20 sps:$4 sm:$0xff]   ;;  %v3705_v43 = vld [vmem:[#allocation12 + $0xcc] ss:$20 sps:$4 sm:$0xff]  }
 0xc28   :  { %2871 = vmatpush1.bf16.msra.mxu0 %v3701_v40  ;;  %v3707_v5 = vld [vmem:[#allocation12 + $0xc8] ss:$20 sps:$4 sm:$0xff]   ;;  %v3708_v33 = vld [vmem:[#allocation12 + $0xa4] ss:$20 sps:$4 sm:$0xff]   ;;  %v3722_v45 = vld [vmem:[#allocation12 + $0x120] ss:$20 sps:$4 sm:$0xff]  }
 0xc29   :  { %2872 = vmatprep.subr.bf16.mxu0 %v3702_v41  ;;  %v3719_v44 = vld [vmem:[#allocation12 + $0x124] ss:$20 sps:$4 sm:$0xff]   ;;  %v3710_v46 = vld [vmem:[#allocation12 + $0xa0] ss:$20 sps:$4 sm:$0xff]   ;;  %v3711_v4 = vld [vmem:[#allocation12 + $0x7c] ss:$20 sps:$4 sm:$0xff]  }
 0xc2a   :  { %2911 = vmatprep.subr.bf16.mxu1 %v3719_v44  ;;  %v3725_v29 = vld [vmem:[#allocation12 + $0xfc] ss:$20 sps:$4 sm:$0xff]   ;;  %v3728_v3 = vld [vmem:[#allocation12 + $0xf8] ss:$20 sps:$4 sm:$0xff]   ;;  %v3729_v47 = vld [vmem:[#allocation12 + $0xd4] ss:$20 sps:$4 sm:$0xff]  }
 0xc2b   :  { %2912 = vmatpush1.bf16.msra.mxu1 %v3722_v45  ;;  %v3713_v48 = vld [vmem:[#allocation12 + $0x78] ss:$20 sps:$4 sm:$0xff]   ;;  %v3714_v49 = vld [vmem:[#allocation12 + $0x54] ss:$20 sps:$4 sm:$0xff]   ;;  %v3731_v50 = vld [vmem:[#allocation12 + $0xd0] ss:$20 sps:$4 sm:$0xff]  }
 0xc2c   :  { %2873 = vmatpush1.bf16.msra.mxu0 %v3704_v42  ;;  %2913 = vmatprep.subr.bf16.mxu1 %v3725_v29  ;;  %v3733_v51 = vld [vmem:[#allocation12 + $0xac] ss:$20 sps:$4 sm:$0xff]   ;;  %v3716_v52 = vld [vmem:[#allocation12 + $0x50] ss:$20 sps:$4 sm:$0xff]   ;;  %v3735_v54 = vld [vmem:[#allocation12 + $0xa8] ss:$20 sps:$4 sm:$0xff]  }
 0xc2d   :  { %2874 = vmatprep.subr.bf16.mxu0 %v3705_v43  ;;  %v3717_v53 = vld [vmem:[#allocation12 + $0x2c] ss:$20 sps:$4 sm:$0xff]   ;;  %v3737_v55 = vld [vmem:[#allocation12 + $0x84] ss:$20 sps:$4 sm:$0xff]   ;;  %v3721_v56 = vld [vmem:[#allocation12 + $0x28] ss:$20 sps:$4 sm:$0xff]  }
 0xc2e   :  { %v3723_v57 = vld [vmem:[#allocation12 + $0x4] ss:$20 sps:$4 sm:$0xff]   ;;  %v3739_v59 = vld [vmem:[#allocation12 + $0x80] ss:$20 sps:$4 sm:$0xff]   ;;  %v3741_v60 = vld [vmem:[#allocation12 + $0x5c] ss:$20 sps:$4 sm:$0xff]  }
 0xc2f   :  { %2914 = vmatpush1.bf16.msra.mxu1 %v3728_v3  ;;  %v3727_v62 = vld [vmem:[#allocation12] ss:$20 sps:$4 sm:$0xff]   ;;  %v3743_v63 = vld [vmem:[#allocation12 + $0x58] ss:$20 sps:$4 sm:$0xff]   ;;  %v3732_v21 = vld [vmem:[#allocation12 + $0x128] ss:$20 sps:$4 sm:$0xff]  }
 0xc30   :  { %2875 = vmatpush1.bf16.msra.mxu0 %v3707_v5  ;;  %2915 = vmatprep.subr.bf16.mxu1 %v3729_v47  ;;  %v3745_v17 = vld [vmem:[#allocation12 + $0x34] ss:$20 sps:$4 sm:$0xff]   ;;  %v3747_v22 = vld [vmem:[#allocation12 + $0x30] ss:$20 sps:$4 sm:$0xff]   ;;  %v3749_v23 = vld [vmem:[#allocation12 + $0xc] ss:$20 sps:$4 sm:$0xff]  }
 0xc31   :  { %2876 = vmatprep.subr.bf16.mxu0 %v3708_v33  ;;  %v3736_v24 = vld [vmem:[#allocation12 + $0x100] ss:$20 sps:$4 sm:$0xff]   ;;  %v3751_v25 = vld [vmem:[#allocation12 + $0x8] ss:$20 sps:$4 sm:$0xff]   ;;  %v3740_v26 = vld [vmem:[#allocation12 + $0xd8] ss:$20 sps:$4 sm:$0xff]  }
 0xc32   :  { %v3744_v14 = vld [vmem:[#allocation12 + $0xb0] ss:$20 sps:$4 sm:$0xff]   ;;  %v3748_v58 = vld [vmem:[#allocation12 + $0x88] ss:$20 sps:$4 sm:$0xff]   ;;  %v3752_v61 = vld [vmem:[#allocation12 + $0x60] ss:$20 sps:$4 sm:$0xff]  }
 0xc33   :  { %2916 = vmatpush1.bf16.msra.mxu1 %v3731_v50  ;;  %v3753_v28 = vld [vmem:[#allocation12 + $0x38] ss:$20 sps:$4 sm:$0xff]   ;;  %v3754_v15 = vld [vmem:[#allocation12 + $0x10] ss:$20 sps:$4 sm:$0xff]   ;;  %s4018_s12 = smov [#allocation17]  }
 0xc34   :  { %2877 = vmatpush1.bf16.msra.mxu0 %v3710_v46  ;;  %2917 = vmatprep.subr.bf16.mxu1 %v3733_v51  ;;  %s3008_s13 = sshll.u32 %s4018_s12, 4  ;;  %s3009_s13 = int_to_ptr.vmem [resolvable:$true] %s3008_s13 }
 0xc35   :  { %2878 = vmatprep.subr.bf16.mxu0 %v3711_v4  ;;  %s3935_s27 = scalar_lea.vmem %s3009_s13, 128  ;;  %p3940_p4 = scmp.lt.s32.totalorder %s3009_s13, %s3009_s13 }
 0xc36   :  { %p3936_p3 = scmp.ne.s32.totalorder %s3009_s13, %s3935_s27  ;;  %p3941_p5 = scmp.lt.s32.totalorder %s3935_s27, %s3935_s27 }
 0xc37   :  { %2918 = vmatpush1.bf16.msra.mxu1 %v3735_v54 }
 0xc38   :  { %2879 = vmatpush1.bf16.msra.mxu0 %v3713_v48  ;;  %2919 = vmatprep.subr.bf16.mxu1 %v3737_v55  ;;  %p3942_p6 = por %p3941_p5, %p3940_p4 }
 0xc39   :  { %2880 = vmatprep.subr.bf16.mxu0 %v3714_v49 }
 0xc3a   :  { %p3943_p7 = pnand %p3942_p6, %p3936_p3 }
 0xc3b   :  { %2920 = vmatpush1.bf16.msra.mxu1 %v3739_v59 }
 0xc3c   :  { %2881 = vmatpush1.bf16.msra.mxu0 %v3716_v52  ;;  %2921 = vmatprep.subr.bf16.mxu1 %v3741_v60 }
 0xc3d   :  { %2882 = vmatprep.subr.bf16.mxu0 %v3717_v53 }
 0xc3f   :  { %2922 = vmatpush1.bf16.msra.mxu1 %v3743_v63 }
 0xc40   :  { %2883 = vmatpush1.bf16.msra.mxu0 %v3721_v56  ;;  %2923 = vmatprep.subr.bf16.mxu1 %v3745_v17 }
 0xc41   :  { %2884 = vmatprep.subr.bf16.mxu0 %v3723_v57 }
 0xc43   :  { %2924 = vmatpush1.bf16.msra.mxu1 %v3747_v22 }
 0xc44   :  { %2885 = vmatpush1.bf16.msra.mxu0 %v3727_v62  ;;  %2925 = vmatprep.subr.bf16.mxu1 %v3749_v23 }
 0xc45   :  { %3487 = vmatprep.subr.bf16.mxu0 %v4008_v19 }
 0xc47   :  { %2903 = vmatmul.mubr.bf16.vlgmr.msra.gmra.mxu0 %v2631_v18  ;;  %2926 = vmatpush1.bf16.msra.mxu1 %v3751_v25 }
 0xc48   :  { %3488 = vmatpush3.bf16.msra.mxu0 %v3732_v21  ;;  %3503 = vmatprep.mubr.msk.bf16.mxu0 %vm4009_vm0, %v4008_v19 }
 0xc49   :  { %3489 = vmatprep.subr.bf16.mxu0 %v4008_v19 }
 0xc4a   :  { %2944 = vmatmul.mubr.bf16.vlgmr.msra.gmra.mxu1 %v2631_v18 }
 0xc4c   :  { %3490 = vmatpush3.bf16.msra.mxu0 %v3736_v24 }
 0xc4d   :  { %3491 = vmatprep.subr.bf16.mxu0 %v4008_v19 }
 0xc50   :  { %3492 = vmatpush3.bf16.msra.mxu0 %v3740_v26 }
 0xc51   :  { %3493 = vmatprep.subr.bf16.mxu0 %v4008_v19 }
 0xc54   :  { %3494 = vmatpush3.bf16.msra.mxu0 %v3744_v14 }
 0xc55   :  { %3495 = vmatprep.subr.bf16.mxu0 %v4008_v19 }
 0xc58   :  { %3496 = vmatpush3.bf16.msra.mxu0 %v3748_v58 }
 0xc59   :  { %3497 = vmatprep.subr.bf16.mxu0 %v4008_v19 }
 0xc5c   :  { %3498 = vmatpush3.bf16.msra.mxu0 %v3752_v61 }
 0xc5d   :  { %3499 = vmatprep.subr.bf16.mxu0 %v4008_v19 }
 0xc60   :  { %3500 = vmatpush3.bf16.msra.mxu0 %v3753_v28 }
 0xc61   :  { %3501 = vmatprep.subr.bf16.mxu0 %v4008_v19 }
 0xc64   :  { %3502 = vmatpush3.bf16.msra.mxu0 %v3754_v15 }
 0xc67   :  { %3504 = vmatmul.mubr.bf16.vlgmr.msra.gmra.mxu0 %v2631_v18 }
 0xc68   :  { %3946 = shalt.err (!%p3943_p7)
}
 0xc69   :  { %3011 = dma.vmem_to_hbm [thread:$0]  %s3009_s13, 128, %s4584_s14, [#allocation16]   ;;  %v2633_v30 = vld [vmem:[#allocation14 + $0x56] ss:$8 sm:$0xf]  ;;  %v2647_v6 = vsub.s32 2, %v4444_v27 }
 0xc6a   :  { %v2634_v12 = vld [vmem:[#allocation14 + $0x56] ss:$8 sm:$0x10]  ;;  %v2651_v32 = vsub.s32 3, %v4444_v27  ;;  %v2655_v42 = vsub.s32 4, %v4444_v27  ;;  %s4019_s14 = smov [#allocation18]  }
 0xc6b   :  { %v2635_v13 = vor.u32 %v2634_v12, %v2633_v30  ;;  %s3018_s29 = sshll.u32 %s4019_s14, 4  ;;  %s3019_s29 = int_to_ptr.vmem [resolvable:$true] %s3018_s29 }
 0xc6c   :  { %s3955_s0 = scalar_lea.vmem %s3019_s29, 640  ;;  %p3960_p9 = scmp.lt.s32.totalorder %s3019_s29, %s3019_s29 }
 0xc6d   :  { %v2640_v19 = vrot.slane %v2635_v13, %v4452_v11  ;;  %v2644_v10 = vrot.slane %v2635_v13, %v4455_v8  ;;  %v2648_v34 = vrot.slane %v2635_v13, %v2647_v6  ;;  %v2652_v35 = vrot.slane %v2635_v13, %v2651_v32  ;;  %p3956_p8 = scmp.ne.s32.totalorder %s3019_s29, %s3955_s0  ;;  %p3961_p10 = scmp.lt.s32.totalorder %s3955_s0, %s3955_s0 }
 0xc6e   :  { %v2656_v43 = vrot.slane %v2635_v13, %v2655_v42 }
 0xc6f   :  { %p3962_p11 = por %p3961_p10, %p3960_p9 }
 0xc71   :  { %p3963_p12 = pnand %p3962_p11, %p3956_p8 }
 0xd07   :  { %v2904_v16 = vpop.f32.mrf.mxu0 }
 0xd08   :  { %v2905_v20 = vadd.f32 %v2904_v16, %v2640_v19 }
 0xd09   :  { %v2906_v9 = vpop.f32.mrf.mxu0 }
 0xd0a   :  { %v2992_v7 = vmax.f32 %v2905_v20, 0.0  ;;  %v2907_v31 = vadd.f32 %v2906_v9, %v2644_v10  ;;  %v2945_v36 = vpop.f32.mrf.mxu1 }
 0xd0b   :  { %v2908_v2 = vpop.f32.mrf.mxu0  ;;  %v2946_v11 = vadd.f32 %v2945_v36, %v2648_v34 }
 0xd0c   :  { %2997 = vst [vmem:[#allocation18] sm:$0xff] %v2992_v7  ;;  %v2993_v0 = vmax.f32 %v2907_v31, 0.0  ;;  %v2947_v37 = vpop.f32.mrf.mxu1 }
 0xd0d   :  { %v2909_v1 = vpop.f32.mrf.mxu0  ;;  %v2994_v8 = vmax.f32 %v2946_v11, 0.0  ;;  %v2948_v38 = vadd.f32 %v2947_v37, %v2652_v35 }
 0xd0e   :  { %2998 = vst [vmem:[#allocation18 + $0x8] sm:$0xff] %v2993_v0  ;;  %v2949_v39 = vpop.f32.mrf.mxu1 }
 0xd0f   :  { %2999 = vst [vmem:[#allocation18 + $0x10] sm:$0xff] %v2994_v8  ;;  %v2995_v40 = vmax.f32 %v2948_v38, 0.0 }
 0xd10   :  { %v2950_v41 = vpop.f32.mrf.mxu1 }
 0xd11   :  { %3000 = vst [vmem:[#allocation18 + $0x18] sm:$0xff] %v2995_v40 }
 0xd27   :  { %v2986_v5 = vpop.f32.mrf.mxu0 }
 0xd28   :  { %v2987_v33 = vadd.f32 %v2986_v5, %v2656_v43 }
 0xd29   :  { %v3505_v44 = vpop.f32.mrf.mxu0 }
 0xd2a   :  { %v2996_v45 = vmax.f32 %v2987_v33, 0.0 }
 0xd2b   :  { %v2989_v46 = vpop.f32.mrf.mxu0 }
 0xd2c   :  { %3001 = vst [vmem:[#allocation18 + $0x20] sm:$0xff] %v2996_v45 }
 0xd2d   :  { %v3506_v4 = vpop.f32.mrf.mxu0 }
 0xd2e   :  { %3966 = shalt.err (!%p3963_p12)
}
 0xd2f   :  { %3021 = dma.vmem_to_hbm [thread:$0]  %s3019_s29, 640, %s4585_s15, [#allocation19]  }
 0xd30   :  { %3999 = dma.done.wait [#allocation16], 128  }
 0xd31   :  { %4000 = vsyncadd [#allocation16], 4294967168 }
 0xd32   :  { %4001 = dma.done.wait [#allocation19], 640  }
 0xd33   :  { %4002 = vsyncadd [#allocation19], 4294966656 }
 0xd34   :  { %3028 = vsyncpa [#allocation15], 1 }
 0xd35   :  { %3029 = vsyncpa [#allocation16], 1 }
 0xd36   :  { %3030 = vsyncpa [#allocation19], 1 }
 0xd37   :  { %3031 = vsyncmov [#allocation13] }
 0xd3a   :  { %s3032_s2 = vpop.sfrf %3031 }
 0xd3b   :  { %p3317_p13 = scmp.ne.s32.totalorder %s3032_s2, 0 }
 0xd3d   :  { %3036 = shalt.err (%p3317_p13)  }
 0xd3e   :  { %3038 = vsyncmov [#allocation13 + $0x1] }
 0xd41   :  { %s3039_s18 = vpop.sfrf %3038 }
 0xd42   :  { %p3318_p0 = scmp.ne.s32.totalorder %s3039_s18, 0 }
 0xd44   :  { %3043 = shalt.err (%p3318_p0)  }
 0xd45   :  { %3045 = vsyncmov [#allocation13 + $0x2] }
 0xd48   :  { %s3046_s19 = vpop.sfrf %3045 }
 0xd49   :  { %p3319_p1 = scmp.ne.s32.totalorder %s3046_s19, 0 }
 0xd4b   :  { %3050 = shalt.err (%p3319_p1)  }
 0xd4c   :  { %3052 = vsyncmov [#allocation13 + $0x3] }
 0xd4f   :  { %s3053_s15 = vpop.sfrf %3052 }
 0xd50   :  { %p3320_p2 = scmp.ne.s32.totalorder %s3053_s15, 0 }
 0xd52   :  { %3057 = shalt.err (%p3320_p2)  }
 0xd53   :  { %3059 = vsyncmov [#allocation13 + $0x4] }
 0xd56   :  { %s3060_s20 = vpop.sfrf %3059 }
 0xd57   :  { %p3321_p3 = scmp.ne.s32.totalorder %s3060_s20, 0 }
 0xd59   :  { %3064 = shalt.err (%p3321_p3)  }
 0xd5a   :  { %3066 = vsyncmov [#allocation13 + $0x5] }
 0xd5d   :  { %s3067_s4 = vpop.sfrf %3066 }
 0xd5e   :  { %p3322_p4 = scmp.ne.s32.totalorder %s3067_s4, 0 }
 0xd60   :  { %3071 = shalt.err (%p3322_p4)  }
 0xd61   :  { %3073 = vsyncmov [#allocation13 + $0x6] }
 0xd64   :  { %s3074_s8 = vpop.sfrf %3073 }
 0xd65   :  { %p3323_p5 = scmp.ne.s32.totalorder %s3074_s8, 0 }
 0xd67   :  { %3078 = shalt.err (%p3323_p5)  }
 0xd68   :  { %3080 = vsyncmov [#allocation13 + $0x7] }
 0xd6b   :  { %s3081_s21 = vpop.sfrf %3080 }
 0xd6c   :  { %p3324_p6 = scmp.ne.s32.totalorder %s3081_s21, 0 }
 0xd6e   :  { %3085 = shalt.err (%p3324_p6)  }
 0xd6f   :  { %3087 = vsyncmov [#allocation13 + $0x8] }
 0xd72   :  { %s3088_s5 = vpop.sfrf %3087 }
 0xd73   :  { %p3325_p7 = scmp.ne.s32.totalorder %s3088_s5, 0 }
 0xd75   :  { %3092 = shalt.err (%p3325_p7)  }
 0xd76   :  { %3094 = vsyncmov [#allocation13 + $0x9] }
 0xd79   :  { %s3095_s9 = vpop.sfrf %3094 }
 0xd7a   :  { %p3326_p8 = scmp.ne.s32.totalorder %s3095_s9, 0 }
 0xd7c   :  { %3099 = shalt.err (%p3326_p8)  }
 0xd7d   :  { %3101 = vsyncmov [#allocation13 + $0xa] }
 0xd80   :  { %s3102_s17 = vpop.sfrf %3101 }
 0xd81   :  { %p3327_p9 = scmp.ne.s32.totalorder %s3102_s17, 0 }
 0xd83   :  { %3106 = shalt.err (%p3327_p9)  }

</bundles_post_ra>
